<compile_context>
chip_gen: v7x
topology: tpu7x:2x2x1
jax: 0.10.0
libtpu: 0.0.40
codegen_flags: <defaults>
</compile_context>

<pallas_src>
import jax
import jax.numpy as jnp
import numpy as np
from jax.experimental import pallas as pl
from jax.experimental.pallas import tpu as pltpu


CLIP_RES = 224          # CLIP expected input resolution
PATCH = 16              # stand-in patch size  (224/16 = 14x14 patch grid)
GRID = CLIP_RES // PATCH
OUT_HW = 16             # output spatial size of ClipPatchExtractor
FEATURE_DIM = 128       # stand-in CLIP embedding width (lane-dense)


# ----------------------------------------------------------------------------
# Bilinear interpolation matrix (PyTorch F.interpolate, align_corners=False).
# ----------------------------------------------------------------------------
def _interp_matrix(in_size, out_size):
    if in_size == out_size:
        return jnp.eye(out_size, dtype=jnp.float32)
    pos = (jnp.arange(out_size, dtype=jnp.float32) + 0.5) * (in_size / out_size) - 0.5
    pos = jnp.clip(pos, 0.0, in_size - 1.0)
    lo = jnp.floor(pos).astype(jnp.int32)
    hi = jnp.minimum(lo + 1, in_size - 1)
    frac = pos - lo.astype(jnp.float32)
    return (jax.nn.one_hot(lo, in_size, dtype=jnp.float32) * (1.0 - frac)[:, None]
            + jax.nn.one_hot(hi, in_size, dtype=jnp.float32) * frac[:, None])


# ----------------------------------------------------------------------------
# Patch-mean-pool matrices.  For row r = py*16 + px:
#   poolL[r, i] = [i % 16 == py]             (sums rows of each patch column)
#   poolR[r, j] = [j % 16 == px] / 196       (selects+averages patch columns)
# so that colp[r] = sum_j (poolL @ resized_c)[r, j] * poolR[r, j]
#                 = mean over the 14x14 patch grid of within-patch pixel (py,px),
# produced directly in sublane ("column") orientation — no relayout needed.
# ----------------------------------------------------------------------------
def _pool_matrices():
    r = np.arange(PATCH * PATCH)
    py = r // PATCH
    px = r % PATCH
    i = np.arange(CLIP_RES)
    pool_l = (i[None, :] % PATCH == py[:, None]).astype(np.float32)
    pool_r = (i[None, :] % PATCH == px[:, None]).astype(np.float32) / float(GRID * GRID)
    return jnp.asarray(pool_l), jnp.asarray(pool_r)


# ----------------------------------------------------------------------------
# Fused kernel: resize -> (stand-in) encode_image -> 1x1 -> 16x16 broadcast.
# Grid = (B,).  One program handles one image entirely on-chip.
# ----------------------------------------------------------------------------
def _clip_patch_kernel(x_ref, ry_ref, rxt_ref, pool_l_ref, pool_r_ref,
                       wt_ref, b_ref, o_ref, res_ref):
    _, C, H, W = x_ref.shape
    out_px = o_ref.shape[2]                                       # 16*16 = 256

    # --- 1) separable bilinear resize (align_corners=False) ------------------
    # column pass for ALL channels at once: (C*H, W) @ (W, 224), bf16 MXU.
    x2 = x_ref[0].astype(jnp.bfloat16).reshape(C * H, W)
    cols = jnp.dot(x2, rxt_ref[...], preferred_element_type=jnp.float32)
    cols = cols.astype(jnp.bfloat16)                              # (C*H, 224)

    emb = b_ref[...]                                              # (D, 1) acc, init = bias
    for c in range(C):                                            # tiny static unroll (C=3)
        # row pass: (224, H) @ (H, 224) -> resized channel, kept in VMEM scratch.
        res_c = jnp.dot(ry_ref[...], cols[c * H:(c + 1) * H, :],
                        preferred_element_type=jnp.float32)       # (224, 224) f32
        res_ref[c] = res_c
        # TODO(synk): the real clip_model.encode_image (pretrained CLIP ViT) is not
        # reproduced; it would consume this on-chip resized image from res_ref.

        # --- 2) stand-in encoder: 14x14 patch mean-pool as a (256,1) column ---
        t = jnp.dot(pool_l_ref[...], res_c,
                    preferred_element_type=jnp.float32)           # (256, 224)
        colp = jnp.sum(t * pool_r_ref[...], axis=1, keepdims=True)  # (256, 1)

        # --- 3) linear projection, accumulated per channel: (D,256)@(256,1) ---
        emb = emb + jnp.dot(wt_ref[c], colp,
                            preferred_element_type=jnp.float32)   # (D, 1)

    # --- 4) F.interpolate(1x1 -> 16x16, bilinear) == broadcast ----------------
    # lane-dense (D, 256) store: unmasked full-width vst, already in NCHW layout.
    o_ref[0] = jnp.broadcast_to(emb, (emb.shape[0], out_px))


def _vmem_limit_bytes(C, H, W, D):
    operands = (C * H * W * 4                          # image block (f32)
                + (CLIP_RES * H + W * CLIP_RES) * 2    # interp matrices (bf16)
                + 2 * PATCH * PATCH * CLIP_RES * 4     # pooling matrices
                + C * D * PATCH * PATCH * 4            # projection weight
                + D * 4                                # bias
                + D * OUT_HW * OUT_HW * 4)             # output block
    scratch = C * CLIP_RES * CLIP_RES * 4
    need = 3 * operands + scratch + (8 << 20)
    return int(min(max(need, 32 << 20), 60 << 20))


def init_params(key, in_channels=3, feature_dim=FEATURE_DIM):
    k_w, k_b = jax.random.split(key)
    k_dim = PATCH * PATCH * in_channels                # 768, row order (c, py, px)
    scale = 1.0 / np.sqrt(k_dim)
    return {
        "w_proj": jax.random.normal(k_w, (k_dim, feature_dim), jnp.float32) * scale,
        "b_proj": jax.random.normal(k_b, (feature_dim,), jnp.float32) * scale,
    }


@jax.jit
def clip_patch_extractor_forward(params, images):
    """images: (B, C, H, W) f32 -> (B, feature_dim, 16, 16) (NCHW, like PyTorch)."""
    B, C, H, W = images.shape
    D = params["b_proj"].shape[0]

    ry = _interp_matrix(H, CLIP_RES).astype(jnp.bfloat16)        # (224, H)
    rxt = _interp_matrix(W, CLIP_RES).T.astype(jnp.bfloat16)     # (W, 224)
    pool_l, pool_r = _pool_matrices()                            # (256, 224) each, f32
    wt = params["w_proj"].reshape(C, PATCH * PATCH, D).transpose(0, 2, 1)  # (C, D, 256)
    b_col = params["b_proj"].reshape(D, 1)                       # (D, 1)

    out = pl.pallas_call(
        _clip_patch_kernel,
        out_shape=jax.ShapeDtypeStruct((B, D, OUT_HW * OUT_HW), jnp.float32),
        grid=(B,),
        in_specs=[
            pl.BlockSpec((1, C, H, W), lambda b: (b, 0, 0, 0)),
            pl.BlockSpec((CLIP_RES, H), lambda b: (0, 0)),
            pl.BlockSpec((W, CLIP_RES), lambda b: (0, 0)),
            pl.BlockSpec((PATCH * PATCH, CLIP_RES), lambda b: (0, 0)),
            pl.BlockSpec((PATCH * PATCH, CLIP_RES), lambda b: (0, 0)),
            pl.BlockSpec((C, D, PATCH * PATCH), lambda b: (0, 0, 0)),
            pl.BlockSpec((D, 1), lambda b: (0, 0)),
        ],
        out_specs=pl.BlockSpec((1, D, OUT_HW * OUT_HW), lambda b: (b, 0, 0)),
        scratch_shapes=[pltpu.VMEM((C, CLIP_RES, CLIP_RES), jnp.float32)],
        compiler_params=pltpu.CompilerParams(
            dimension_semantics=("parallel",),
            vmem_limit_bytes=_vmem_limit_bytes(C, H, W, D),
        ),
    )(images, ry, rxt, pool_l, pool_r, wt, b_col)

    # Free row-major split of the last dim — no XLA relayout pass.
    return out.reshape(B, D, OUT_HW, OUT_HW)


# ----------------------------------------------------------------------------
# Pure-JAX reference (same math, no Pallas) for a sanity cross-check.
# ----------------------------------------------------------------------------
def _reference_forward(params, images):
    B, C, H, W = images.shape
    D = params["b_proj"].shape[0]
    if (H, W) != (CLIP_RES, CLIP_RES):
        ry = _interp_matrix(H, CLIP_RES)
        rx = _interp_matrix(W, CLIP_RES)
        resized = jnp.einsum('oh,bchw,pw->bcop', ry, images, rx)
    else:
        resized = images
    # stand-in encode_image: 14x14 patch mean-pool + linear projection
    pooled = resized.reshape(B, C, GRID, PATCH, GRID, PATCH).mean(axis=(2, 4))  # (B,C,16,16)
    emb = pooled.reshape(B, C * PATCH * PATCH) @ params["w_proj"] + params["b_proj"][None, :]
    return jnp.broadcast_to(emb[:, :, None, None], (B, D, OUT_HW, OUT_HW))


if __name__ == "__main__":
    key = jax.random.PRNGKey(0)
    k_img, k_params = jax.random.split(key)

    B, C, H, W = 2, 3, 64, 64                     # small non-224 input -> resize path
    images = jax.random.normal(k_img, (B, C, H, W), jnp.float32)
    params = init_params(k_params, in_channels=C, feature_dim=FEATURE_DIM)

    out = clip_patch_extractor_forward(params, images)
    jax.block_until_ready(out)

    assert out.shape == (B, FEATURE_DIM, OUT_HW, OUT_HW), out.shape
    assert bool(jnp.all(jnp.isfinite(out)))

    ref = _reference_forward(params, images)
    err = float(jnp.max(jnp.abs(out - ref)) / (jnp.max(jnp.abs(ref)) + 1e-6))
    assert err < 5e-2, f"mismatch vs reference: rel-max-err={err}"

    print("KERNEL_OK")
</pallas_src>

<mosaic_0001>
module attributes {stable_mosaic.version = 11 : i64} {
  func.func @_clip_patch_kernel(%arg0: i32, %arg1: memref<1x3x64x64xf32, #tpu.memory_space<vmem>>, %arg2: memref<224x64xbf16, #tpu.memory_space<vmem>>, %arg3: memref<64x224xbf16, #tpu.memory_space<vmem>>, %arg4: memref<256x224xf32, #tpu.memory_space<vmem>>, %arg5: memref<256x224xf32, #tpu.memory_space<vmem>>, %arg6: memref<3x128x256xf32, #tpu.memory_space<vmem>>, %arg7: memref<128x1xf32, #tpu.memory_space<vmem>>, %arg8: memref<1x128x256xf32, #tpu.memory_space<vmem>>, %arg9: memref<3x224x224xf32, #tpu.memory_space<vmem>>) attributes {dimension_semantics = [#tpu.dimension_semantics<parallel>], iteration_bounds = array<i64: 2>, scalar_prefetch = 0 : i64, scratch_operands = 1 : i64, tpu.core_type = #tpu.core_type<tc>, window_params = [{transform_indices = @transform_0, window_bounds = array<i64: 1, 3, 64, 64>}, {pipeline_mode = #tpu.pipeline_mode<synchronous>, transform_indices = @transform_1, window_bounds = array<i64: 224, 64>}, {pipeline_mode = #tpu.pipeline_mode<synchronous>, transform_indices = @transform_2, window_bounds = array<i64: 64, 224>}, {pipeline_mode = #tpu.pipeline_mode<synchronous>, transform_indices = @transform_3, window_bounds = array<i64: 256, 224>}, {pipeline_mode = #tpu.pipeline_mode<synchronous>, transform_indices = @transform_4, window_bounds = array<i64: 256, 224>}, {pipeline_mode = #tpu.pipeline_mode<synchronous>, transform_indices = @transform_5, window_bounds = array<i64: 3, 128, 256>}, {pipeline_mode = #tpu.pipeline_mode<synchronous>, transform_indices = @transform_6, window_bounds = array<i64: 128, 1>}, {transform_indices = @transform_7, window_bounds = array<i64: 1, 128, 256>}]} {
    %c0 = arith.constant 0 : index
    %c0_0 = arith.constant 0 : index
    %c0_1 = arith.constant 0 : index
    %c0_2 = arith.constant 0 : index
    %0 = vector.load %arg1[%c0, %c0_0, %c0_1, %c0_2] : memref<1x3x64x64xf32, #tpu.memory_space<vmem>>, vector<1x3x64x64xf32>
    %1 = vector.shape_cast %0 : vector<1x3x64x64xf32> to vector<3x64x64xf32>
    %2 = arith.truncf %1 : vector<3x64x64xf32> to vector<3x64x64xbf16>
    %3 = vector.shape_cast %2 : vector<3x64x64xbf16> to vector<192x64xbf16>
    %c0_3 = arith.constant 0 : index
    %c0_4 = arith.constant 0 : index
    %4 = vector.load %arg3[%c0_3, %c0_4] : memref<64x224xbf16, #tpu.memory_space<vmem>>, vector<64x224xbf16>
    %cst = arith.constant dense<0.000000e+00> : vector<192x224xf32>
    %5 = tpu.matmul %3, %4, %cst {dimension_numbers = #tpu.dot_dimension_numbers<[1], [0], [0], [1], [0, 0, 1, 1], [], []>} : vector<192x64xbf16>, vector<64x224xbf16>, vector<192x224xf32> -> vector<192x224xf32>
    %6 = arith.truncf %5 : vector<192x224xf32> to vector<192x224xbf16>
    %c0_5 = arith.constant 0 : index
    %c0_6 = arith.constant 0 : index
    %7 = vector.load %arg7[%c0_5, %c0_6] : memref<128x1xf32, #tpu.memory_space<vmem>>, vector<128x1xf32>
    %c0_7 = arith.constant 0 : index
    %c0_8 = arith.constant 0 : index
    %8 = vector.load %arg2[%c0_7, %c0_8] : memref<224x64xbf16, #tpu.memory_space<vmem>>, vector<224x64xbf16>
    %9 = vector.extract_strided_slice %6 {offsets = [0, 0], sizes = [64, 224], strides = [1, 1]} : vector<192x224xbf16> to vector<64x224xbf16>
    %cst_9 = arith.constant dense<0.000000e+00> : vector<224x224xf32>
    %10 = tpu.matmul %8, %9, %cst_9 {dimension_numbers = #tpu.dot_dimension_numbers<[1], [0], [0], [1], [0, 0, 1, 1], [], []>} : vector<224x64xbf16>, vector<64x224xbf16>, vector<224x224xf32> -> vector<224x224xf32>
    %c0_10 = arith.constant 0 : index
    %c0_11 = arith.constant 0 : index
    %c0_12 = arith.constant 0 : index
    %11 = vector.load %arg9[%c0_10, %c0_11, %c0_12] : memref<3x224x224xf32, #tpu.memory_space<vmem>>, vector<1x224x224xf32>
    %12 = vector.shape_cast %11 : vector<1x224x224xf32> to vector<224x224xf32>
    %13 = vector.shape_cast %10 : vector<224x224xf32> to vector<1x224x224xf32>
    tpu.vector_store %arg9[%c0_10, %c0_11, %c0_12], %13 {strides = array<i32>} : memref<3x224x224xf32, #tpu.memory_space<vmem>>, vector<1x224x224xf32>,
    %c0_13 = arith.constant 0 : index
    %c0_14 = arith.constant 0 : index
    %14 = vector.load %arg4[%c0_13, %c0_14] : memref<256x224xf32, #tpu.memory_space<vmem>>, vector<256x224xf32>
    %cst_15 = arith.constant dense<0.000000e+00> : vector<256x224xf32>
    %15 = tpu.matmul %14, %10, %cst_15 {dimension_numbers = #tpu.dot_dimension_numbers<[1], [0], [0], [1], [0, 0, 1, 1], [], []>} : vector<256x224xf32>, vector<224x224xf32>, vector<256x224xf32> -> vector<256x224xf32>
    %c0_16 = arith.constant 0 : index
    %c0_17 = arith.constant 0 : index
    %16 = vector.load %arg5[%c0_16, %c0_17] : memref<256x224xf32, #tpu.memory_space<vmem>>, vector<256x224xf32>
    %17 = arith.mulf %15, %16 : vector<256x224xf32>
    %cst_18 = arith.constant dense<0.000000e+00> : vector<256xf32>
    %18 = vector.multi_reduction <add>, %17, %cst_18 [1] : vector<256x224xf32> to vector<256xf32>
    %19 = vector.shape_cast %18 : vector<256xf32> to vector<256x1xf32>
    %c0_19 = arith.constant 0 : index
    %c0_20 = arith.constant 0 : index
    %c0_21 = arith.constant 0 : index
    %20 = vector.load %arg6[%c0_19, %c0_20, %c0_21] : memref<3x128x256xf32, #tpu.memory_space<vmem>>, vector<1x128x256xf32>
    %21 = vector.shape_cast %20 : vector<1x128x256xf32> to vector<128x256xf32>
    %cst_22 = arith.constant dense<0.000000e+00> : vector<128x1xf32>
    %22 = tpu.matmul %21, %19, %cst_22 {dimension_numbers = #tpu.dot_dimension_numbers<[1], [0], [0], [1], [0, 0, 1, 1], [], []>} : vector<128x256xf32>, vector<256x1xf32>, vector<128x1xf32> -> vector<128x1xf32>
    %23 = arith.addf %7, %22 : vector<128x1xf32>
    %c0_23 = arith.constant 0 : index
    %c0_24 = arith.constant 0 : index
    %24 = vector.load %arg2[%c0_23, %c0_24] : memref<224x64xbf16, #tpu.memory_space<vmem>>, vector<224x64xbf16>
    %25 = vector.extract_strided_slice %6 {offsets = [64, 0], sizes = [64, 224], strides = [1, 1]} : vector<192x224xbf16> to vector<64x224xbf16>
    %cst_25 = arith.constant dense<0.000000e+00> : vector<224x224xf32>
    %26 = tpu.matmul %24, %25, %cst_25 {dimension_numbers = #tpu.dot_dimension_numbers<[1], [0], [0], [1], [0, 0, 1, 1], [], []>} : vector<224x64xbf16>, vector<64x224xbf16>, vector<224x224xf32> -> vector<224x224xf32>
    %c1 = arith.constant 1 : index
    %c0_26 = arith.constant 0 : index
    %c0_27 = arith.constant 0 : index
    %27 = vector.load %arg9[%c1, %c0_26, %c0_27] : memref<3x224x224xf32, #tpu.memory_space<vmem>>, vector<1x224x224xf32>
    %28 = vector.shape_cast %27 : vector<1x224x224xf32> to vector<224x224xf32>
    %29 = vector.shape_cast %26 : vector<224x224xf32> to vector<1x224x224xf32>
    tpu.vector_store %arg9[%c1, %c0_26, %c0_27], %29 {strides = array<i32>} : memref<3x224x224xf32, #tpu.memory_space<vmem>>, vector<1x224x224xf32>,
    %c0_28 = arith.constant 0 : index
    %c0_29 = arith.constant 0 : index
    %30 = vector.load %arg4[%c0_28, %c0_29] : memref<256x224xf32, #tpu.memory_space<vmem>>, vector<256x224xf32>
    %cst_30 = arith.constant dense<0.000000e+00> : vector<256x224xf32>
    %31 = tpu.matmul %30, %26, %cst_30 {dimension_numbers = #tpu.dot_dimension_numbers<[1], [0], [0], [1], [0, 0, 1, 1], [], []>} : vector<256x224xf32>, vector<224x224xf32>, vector<256x224xf32> -> vector<256x224xf32>
    %c0_31 = arith.constant 0 : index
    %c0_32 = arith.constant 0 : index
    %32 = vector.load %arg5[%c0_31, %c0_32] : memref<256x224xf32, #tpu.memory_space<vmem>>, vector<256x224xf32>
    %33 = arith.mulf %31, %32 : vector<256x224xf32>
    %cst_33 = arith.constant dense<0.000000e+00> : vector<256xf32>
    %34 = vector.multi_reduction <add>, %33, %cst_33 [1] : vector<256x224xf32> to vector<256xf32>
    %35 = vector.shape_cast %34 : vector<256xf32> to vector<256x1xf32>
    %c1_34 = arith.constant 1 : index
    %c0_35 = arith.constant 0 : index
    %c0_36 = arith.constant 0 : index
    %36 = vector.load %arg6[%c1_34, %c0_35, %c0_36] : memref<3x128x256xf32, #tpu.memory_space<vmem>>, vector<1x128x256xf32>
    %37 = vector.shape_cast %36 : vector<1x128x256xf32> to vector<128x256xf32>
    %cst_37 = arith.constant dense<0.000000e+00> : vector<128x1xf32>
    %38 = tpu.matmul %37, %35, %cst_37 {dimension_numbers = #tpu.dot_dimension_numbers<[1], [0], [0], [1], [0, 0, 1, 1], [], []>} : vector<128x256xf32>, vector<256x1xf32>, vector<128x1xf32> -> vector<128x1xf32>
    %39 = arith.addf %23, %38 : vector<128x1xf32>
    %c0_38 = arith.constant 0 : index
    %c0_39 = arith.constant 0 : index
    %40 = vector.load %arg2[%c0_38, %c0_39] : memref<224x64xbf16, #tpu.memory_space<vmem>>, vector<224x64xbf16>
    %41 = vector.extract_strided_slice %6 {offsets = [128, 0], sizes = [64, 224], strides = [1, 1]} : vector<192x224xbf16> to vector<64x224xbf16>
    %cst_40 = arith.constant dense<0.000000e+00> : vector<224x224xf32>
    %42 = tpu.matmul %40, %41, %cst_40 {dimension_numbers = #tpu.dot_dimension_numbers<[1], [0], [0], [1], [0, 0, 1, 1], [], []>} : vector<224x64xbf16>, vector<64x224xbf16>, vector<224x224xf32> -> vector<224x224xf32>
    %c2 = arith.constant 2 : index
    %c0_41 = arith.constant 0 : index
    %c0_42 = arith.constant 0 : index
    %43 = vector.load %arg9[%c2, %c0_41, %c0_42] : memref<3x224x224xf32, #tpu.memory_space<vmem>>, vector<1x224x224xf32>
    %44 = vector.shape_cast %43 : vector<1x224x224xf32> to vector<224x224xf32>
    %45 = vector.shape_cast %42 : vector<224x224xf32> to vector<1x224x224xf32>
    tpu.vector_store %arg9[%c2, %c0_41, %c0_42], %45 {strides = array<i32>} : memref<3x224x224xf32, #tpu.memory_space<vmem>>, vector<1x224x224xf32>,
    %c0_43 = arith.constant 0 : index
    %c0_44 = arith.constant 0 : index
    %46 = vector.load %arg4[%c0_43, %c0_44] : memref<256x224xf32, #tpu.memory_space<vmem>>, vector<256x224xf32>
    %cst_45 = arith.constant dense<0.000000e+00> : vector<256x224xf32>
    %47 = tpu.matmul %46, %42, %cst_45 {dimension_numbers = #tpu.dot_dimension_numbers<[1], [0], [0], [1], [0, 0, 1, 1], [], []>} : vector<256x224xf32>, vector<224x224xf32>, vector<256x224xf32> -> vector<256x224xf32>
    %c0_46 = arith.constant 0 : index
    %c0_47 = arith.constant 0 : index
    %48 = vector.load %arg5[%c0_46, %c0_47] : memref<256x224xf32, #tpu.memory_space<vmem>>, vector<256x224xf32>
    %49 = arith.mulf %47, %48 : vector<256x224xf32>
    %cst_48 = arith.constant dense<0.000000e+00> : vector<256xf32>
    %50 = vector.multi_reduction <add>, %49, %cst_48 [1] : vector<256x224xf32> to vector<256xf32>
    %51 = vector.shape_cast %50 : vector<256xf32> to vector<256x1xf32>
    %c2_49 = arith.constant 2 : index
    %c0_50 = arith.constant 0 : index
    %c0_51 = arith.constant 0 : index
    %52 = vector.load %arg6[%c2_49, %c0_50, %c0_51] : memref<3x128x256xf32, #tpu.memory_space<vmem>>, vector<1x128x256xf32>
    %53 = vector.shape_cast %52 : vector<1x128x256xf32> to vector<128x256xf32>
    %cst_52 = arith.constant dense<0.000000e+00> : vector<128x1xf32>
    %54 = tpu.matmul %53, %51, %cst_52 {dimension_numbers = #tpu.dot_dimension_numbers<[1], [0], [0], [1], [0, 0, 1, 1], [], []>} : vector<128x256xf32>, vector<256x1xf32>, vector<128x1xf32> -> vector<128x1xf32>
    %55 = arith.addf %39, %54 : vector<128x1xf32>
    %56 = vector.shape_cast %55 : vector<128x1xf32> to vector<128x1xf32>
    %57 = vector.broadcast %56 : vector<128x1xf32> to vector<128x256xf32>
    %c0_53 = arith.constant 0 : index
    %c0_54 = arith.constant 0 : index
    %c0_55 = arith.constant 0 : index
    %58 = vector.load %arg8[%c0_53, %c0_54, %c0_55] : memref<1x128x256xf32, #tpu.memory_space<vmem>>, vector<1x128x256xf32>
    %59 = vector.shape_cast %58 : vector<1x128x256xf32> to vector<128x256xf32>
    %60 = vector.shape_cast %57 : vector<128x256xf32> to vector<1x128x256xf32>
    tpu.vector_store %arg8[%c0_53, %c0_54, %c0_55], %60 {strides = array<i32>} : memref<1x128x256xf32, #tpu.memory_space<vmem>>, vector<1x128x256xf32>,
    return
  }
  func.func @transform_0(%arg0: i32) -> (i32, i32, i32, i32) {
    %c0_i32 = arith.constant 0 : i32
    %c0_i32_0 = arith.constant 0 : i32
    %c0_i32_1 = arith.constant 0 : i32
    %c0_i32_2 = arith.constant 0 : i32
    return %arg0, %c0_i32, %c0_i32_0, %c0_i32_1 : i32, i32, i32, i32
  }
  func.func @transform_1(%arg0: i32) -> (i32, i32) {
    %c0_i32 = arith.constant 0 : i32
    %c0_i32_0 = arith.constant 0 : i32
    %c0_i32_1 = arith.constant 0 : i32
    return %c0_i32, %c0_i32_0 : i32, i32
  }
  func.func @transform_2(%arg0: i32) -> (i32, i32) {
    %c0_i32 = arith.constant 0 : i32
    %c0_i32_0 = arith.constant 0 : i32
    %c0_i32_1 = arith.constant 0 : i32
    return %c0_i32, %c0_i32_0 : i32, i32
  }
  func.func @transform_3(%arg0: i32) -> (i32, i32) {
    %c0_i32 = arith.constant 0 : i32
    %c0_i32_0 = arith.constant 0 : i32
    %c0_i32_1 = arith.constant 0 : i32
    return %c0_i32, %c0_i32_0 : i32, i32
  }
  func.func @transform_4(%arg0: i32) -> (i32, i32) {
    %c0_i32 = arith.constant 0 : i32
    %c0_i32_0 = arith.constant 0 : i32
    %c0_i32_1 = arith.constant 0 : i32
    return %c0_i32, %c0_i32_0 : i32, i32
  }
  func.func @transform_5(%arg0: i32) -> (i32, i32, i32) {
    %c0_i32 = arith.constant 0 : i32
    %c0_i32_0 = arith.constant 0 : i32
    %c0_i32_1 = arith.constant 0 : i32
    %c0_i32_2 = arith.constant 0 : i32
    return %c0_i32, %c0_i32_0, %c0_i32_1 : i32, i32, i32
  }
  func.func @transform_6(%arg0: i32) -> (i32, i32) {
    %c0_i32 = arith.constant 0 : i32
    %c0_i32_0 = arith.constant 0 : i32
    %c0_i32_1 = arith.constant 0 : i32
    return %c0_i32, %c0_i32_0 : i32, i32
  }
  func.func @transform_7(%arg0: i32) -> (i32, i32, i32) {
    %c0_i32 = arith.constant 0 : i32
    %c0_i32_0 = arith.constant 0 : i32
    %c0_i32_1 = arith.constant 0 : i32
    return %arg0, %c0_i32, %c0_i32_0 : i32, i32, i32
  }
}

</mosaic_0001>

<bundles_post_ra>
// kernel: clip_patch_extractor_forward.1
= control target key start
LH: loop header
LB: loop body
LE: loop exit
PB: predicated region body
PF: predicated region fallthrough
CT: control target
= control target key end

     0   :  { %s5373_s24 = smov 0   ;;  %s7910_s0 = inlined_call_operand.vmem [shape: f32[2,3,64,64], index: 0, kind: input, shape index: {}]   ;;  %s7911_s1 = inlined_call_operand.vmem [shape: bf16[224,64], index: 1, kind: input, shape index: {}]   ;;  %s7912_s2 = inlined_call_operand.vmem [shape: bf16[64,224], index: 2, kind: input, shape index: {}]   ;;  %s7913_s3 = inlined_call_operand.vmem [shape: f32[256,224], index: 3, kind: input, shape index: {}]   ;;  %s7914_s4 = inlined_call_operand.vmem [shape: f32[256,224], index: 4, kind: input, shape index: {}]   ;;  %s7915_s5 = inlined_call_operand.vmem [shape: f32[3,128,256], index: 5, kind: input, shape index: {}]   ;;  %s7916_s6 = inlined_call_operand.vmem [shape: f32[128,1], index: 6, kind: input, shape index: {}]   ;;  %s7917_s7 = inlined_call_operand.vmem [shape: f32[2,128,256], index: 7, kind: output, shape index: {}]  }
   0x1 LB: > { %s4471_s25 = sadd.s32 4294967295, %s5330_s24   ;;  %p4475_p0 = scmp.ge.s32.totalorder %s5330_s24, 1  ;;  %s5330_s24 = sphi %s5373_s24, %s17_s24  }
   0x2   : > { %p237_p1 = scmp.lt.s32.totalorder %s5330_s24, 3 }
   0x4   : > { %p238_p2 = pnand %p4475_p0, %p237_p1 }
   0x6   : > { %241 = sbr.rel (%p238_p2) target bundleno = 2939 (0xb7b), region = 48 }
   0xd   : > { %v5270_v0 = vld [vmem:[%s7912_s2 + $0x4] ss:$8 sps:$4 sm:$0xff]   ;;  %p269_p3 = scmp.lt.s32.totalorder %s4471_s25, 1  ;;  %v5272_v1 = vld [vmem:[%s7912_s2] ss:$8 sps:$4 sm:$0xff]   ;;  %v7918_v2 = vmov 0  }
   0xe   : > { %433 = vmatprep.mubr.bf16.mxu0 %v7918_v2  ;;  %523 = vmatprep.mubr.bf16.mxu1 %v7918_v2  ;;  %v5273_v3 = vld [vmem:[%s7912_s2 + $0x14] ss:$8 sps:$4 sm:$0xff]   ;;  %v5275_v4 = vld [vmem:[%s7912_s2 + $0x10] ss:$8 sps:$4 sm:$0xff]   ;;  %v5276_v5 = vld [vmem:[%s7912_s2 + $0x24] ss:$8 sps:$4 sm:$0xff]  }
   0xf   : > { %401 = vmatprep.subr.bf16.mxu0 %v5270_v0  ;;  %s8040_s25 = smov (!%p269_p3, %s4471_s25), 1  ;;  %5250 = vmatprep.subr.bf16.mxu1 %v5270_v0  ;;  %v5278_v6 = vld [vmem:[%s7912_s2 + $0x20] ss:$8 sps:$4 sm:$0xff]   ;;  %v5279_v7 = vld [vmem:[%s7912_s2 + $0x34] ss:$8 sps:$4 sm:$0xff]   ;;  %vm364_vm0 = vcmask 523264  }
  0x10   : > { %402 = vmatpush1.bf16.msra.mxu0 %v5272_v1  ;;  %5254 = vmatpush1.bf16.msra.mxu1 %v5272_v1  ;;  %s5258_s13 = smul.u32 192, %s8040_s25  ;;  %v5281_v8 = vld [vmem:[%s7912_s2 + $0x30] ss:$8 sps:$4 sm:$0xff]   ;;  %v5282_v54 = vld [vmem:[%s7911_s1] sm:$0xff]   ;;  %v5283_v55 = vld [vmem:[%s7911_s1 + $0x8] sm:$0xff]   ;;  %vm908_vm1 = vcmask 785408  }
  0x11   : > { %403 = vmatprep.subr.bf16.mxu0 %v5273_v3  ;;  %5251 = vmatprep.subr.bf16.mxu1 %v5273_v3  ;;  %v5284_v56 = vld [vmem:[%s7911_s1 + $0x10] sm:$0xff]   ;;  %v5285_v57 = vld [vmem:[%s7911_s1 + $0x18] sm:$0xff]   ;;  %v5286_v58 = vld [vmem:[%s7911_s1 + $0x20] sm:$0xff]   ;;  %s4745_s8 = sshll.u32 %s8040_s25, 8 }
  0x12   : > { %5268 = vset.pattern.permute.xlu0 %v7918_v2  ;;  %5269 = vset.pattern.permute.xlu1 %v7918_v2  ;;  %s5406_s16 = scalar_lea.vmem %s7910_s0, %s5258_s13  ;;  %v5287_v59 = vld [vmem:[%s7911_s1 + $0x28] sm:$0xff]   ;;  %v5288_v60 = vld [vmem:[%s7911_s1 + $0x30] sm:$0xff]   ;;  %v5289_v61 = vld [vmem:[%s7911_s1 + $0x38] sm:$0xff]   ;;  %s7873_s11 = scalar_lea.vmem %s7917_s7, %s4745_s8 }
  0x13   : > { %v280_v9 = vld [vmem:[%s5406_s16] sm:$0xff]  ;;  %v281_v10 = vld [vmem:[%s5406_s16 + $0x8] sm:$0xff]  ;;  %v282_v12 = vld [vmem:[%s5406_s16 + $0x10] sm:$0xff] }
  0x14   : > { %404 = vmatpush1.bf16.msra.mxu0 %v5275_v4  ;;  %5255 = vmatpush1.bf16.msra.mxu1 %v5275_v4  ;;  %v304_v11 = vpack.c.bf16 %v281_v10, %v280_v9  ;;  %v283_v13 = vld [vmem:[%s5406_s16 + $0x18] sm:$0xff]  ;;  %v284_v15 = vld [vmem:[%s5406_s16 + $0x20] sm:$0xff]  ;;  %v285_v16 = vld [vmem:[%s5406_s16 + $0x28] sm:$0xff] }
  0x15   : > { %405 = vmatprep.subr.bf16.mxu0 %v5276_v5  ;;  %5252 = vmatprep.subr.bf16.mxu1 %v5276_v5  ;;  %v305_v14 = vpack.c.bf16 %v283_v13, %v282_v12  ;;  %v306_v17 = vpack.c.bf16 %v285_v16, %v284_v15  ;;  %v286_v18 = vld [vmem:[%s5406_s16 + $0x30] sm:$0xff]  ;;  %v287_v19 = vld [vmem:[%s5406_s16 + $0x38] sm:$0xff]  ;;  %v300_v24 = vld [vmem:[%s5406_s16 + $0xa0] sm:$0xff] }
  0x16   : > { %v307_v20 = vpack.c.bf16 %v287_v19, %v286_v18  ;;  %v298_v21 = vld [vmem:[%s5406_s16 + $0x90] sm:$0xff]  ;;  %v299_v22 = vld [vmem:[%s5406_s16 + $0x98] sm:$0xff]  ;;  %v301_v25 = vld [vmem:[%s5406_s16 + $0xa8] sm:$0xff] }
  0x17   : > { %v313_v23 = vpack.c.bf16 %v299_v22, %v298_v21  ;;  %v314_v26 = vpack.c.bf16 %v301_v25, %v300_v24  ;;  %v302_v27 = vld [vmem:[%s5406_s16 + $0xb0] sm:$0xff]  ;;  %v303_v28 = vld [vmem:[%s5406_s16 + $0xb8] sm:$0xff]  ;;  %v5290_v4 = vld [vmem:[%s7911_s1 + $0x40] sm:$0xff]  }
  0x18   : > { %406 = vmatpush1.bf16.msra.mxu0 %v5278_v6  ;;  %5256 = vmatpush1.bf16.msra.mxu1 %v5278_v6  ;;  %v315_v29 = vpack.c.bf16 %v303_v28, %v302_v27  ;;  %v5292_v18 = vld [vmem:[%s7911_s1 + $0x50] sm:$0xff]   ;;  %v5294_v21 = vld [vmem:[%s7911_s1 + $0x60] sm:$0xff]   ;;  %v5295_v22 = vld [vmem:[%s7911_s1 + $0x68] sm:$0xff]  }
  0x19   : > { %407 = vmatprep.subr.bf16.mxu0 %v5279_v7  ;;  %5253 = vmatprep.subr.bf16.mxu1 %v5279_v7  ;;  %v289_v24 = vld [vmem:[%s5406_s16 + $0x48] sm:$0xff]  ;;  %v291_v27 = vld [vmem:[%s5406_s16 + $0x58] sm:$0xff] }
  0x1c   : > { %408 = vmatpush1.bf16.msra.mxu0 %v5281_v8  ;;  %5257 = vmatpush1.bf16.msra.mxu1 %v5281_v8 }
  0x1f   : > { %4487 = vmatmul.mubr.msk.bf16.vlgmr.msra.gmra.mrb[0].mxu0 %vm364_vm0, %v304_v11  ;;  %4496 = vmatmul.mubr.msk.bf16.vlgmr.msra.gmra.mrb[0].mxu1 %vm364_vm0, %v313_v23  ;;  %v5291_v11 = vld [vmem:[%s7911_s1 + $0x48] sm:$0xff]   ;;  %v288_v23 = vld [vmem:[%s5406_s16 + $0x40] sm:$0xff] }
  0x20   : > { %443 = vmatprep.mubr.bf16.mxu0 %v7918_v2  ;;  %533 = vmatprep.mubr.bf16.mxu1 %v7918_v2  ;;  %v308_v25 = vpack.c.bf16 %v289_v24, %v288_v23 }
  0x27   : > { %4488 = vmatmul.mubr.msk.bf16.gmra.mrb[4].mxu0 %vm364_vm0, %v305_v14  ;;  %4497 = vmatmul.mubr.msk.bf16.gmra.mrb[4].mxu1 %vm364_vm0, %v314_v26  ;;  %v290_v26 = vld [vmem:[%s5406_s16 + $0x50] sm:$0xff] }
  0x28   : > { %453 = vmatprep.mubr.bf16.mxu0 %v7918_v2  ;;  %543 = vmatprep.mubr.bf16.mxu1 %v7918_v2  ;;  %v309_v28 = vpack.c.bf16 %v291_v27, %v290_v26 }
  0x2f   : > { %4489 = vmatmul.mubr.msk.bf16.gmra.mrb[8].mxu0 %vm364_vm0, %v306_v17  ;;  %4498 = vmatmul.mubr.msk.bf16.gmra.mrb[8].mxu1 %vm364_vm0, %v315_v29  ;;  %v292_v29 = vld [vmem:[%s5406_s16 + $0x60] sm:$0xff] }
  0x30   : > { %463 = vmatprep.mubr.bf16.mxu0 %v7918_v2  ;;  %766 = vmatprep.mubr.bf16.mxu1 %v7918_v2 }
  0x37   : > { %4490 = vmatmul.mubr.msk.bf16.gmra.mrb[12].mxu0 %vm364_vm0, %v307_v20  ;;  %v5293_v20 = vld [vmem:[%s7911_s1 + $0x58] sm:$0xff]  }
  0x38   : > { %473 = vmatprep.mubr.bf16.mxu0 %v7918_v2 }
  0x3f   : > { %4491 = vmatmul.mubr.msk.bf16.gmra.mrb[16].mxu0 %vm364_vm0, %v308_v25 }
  0x40   : > { %483 = vmatprep.mubr.bf16.mxu0 %v7918_v2 }
  0x47   : > { %4492 = vmatmul.mubr.msk.bf16.gmra.mrb[20].mxu0 %vm364_vm0, %v309_v28 }
  0x48   : > { %493 = vmatprep.mubr.bf16.mxu0 %v7918_v2 }
  0xf2   : > { %v435_v30 = vpop.f32.mrb[0].mxu0  ;;  %v5484_v62 = vpop.f32.mrb[0].mxu1 }
  0xf3   : > { %v437_v31 = vpop.f32.mrb[1].mxu0  ;;  %v5487_v63 = vpop.f32.mrb[1].mxu1 }
  0xf4   : > { %v439_v32 = vpop.f32.mrb[2].mxu0  ;;  %v5489_v0 = vpop.f32.mrb[2].mxu1 }
  0xf5   : > { %v554_v33 = vpack.c.bf16 %v439_v32, %v435_v30  ;;  %v441_v34 = vpop.f32.mrb[3].mxu0  ;;  %v5493_v3 = vpop.f32.mrb[3].mxu1  ;;  %v293_v30 = vld [vmem:[%s5406_s16 + $0x68] sm:$0xff]  ;;  %v294_v32 = vld [vmem:[%s5406_s16 + $0x70] sm:$0xff] }
  0xf6   : > { %v555_v35 = vpack.c.bf16 %v441_v34, %v437_v31  ;;  %v310_v31 = vpack.c.bf16 %v293_v30, %v292_v29 }
  0xf8   : > { %734 = vmatprep.subr.bf16.mxu1 %v555_v35  ;;  %4493 = vmatmul.mubr.msk.bf16.gmra.mrb[24].mxu0 %vm364_vm0, %v310_v31  ;;  %v296_v35 = vld [vmem:[%s5406_s16 + $0x80] sm:$0xff] }
  0xf9   : > { %735 = vmatpush1.bf16.msra.mxu1 %v554_v33  ;;  %503 = vmatprep.mubr.bf16.mxu0 %v7918_v2  ;;  %v295_v33 = vld [vmem:[%s5406_s16 + $0x78] sm:$0xff] }
  0xfa   : > { %v445_v36 = vpop.f32.mrb[4].mxu0  ;;  %v5501_v6 = vpop.f32.mrb[4].mxu1  ;;  %v311_v34 = vpack.c.bf16 %v295_v33, %v294_v32 }
  0xfb   : > { %v447_v37 = vpop.f32.mrb[5].mxu0  ;;  %v5504_v7 = vpop.f32.mrb[5].mxu1 }
  0xfc   : > { %v449_v38 = vpop.f32.mrb[6].mxu0  ;;  %v5506_v8 = vpop.f32.mrb[6].mxu1 }
  0xfd   : > { %v556_v39 = vpack.c.bf16 %v449_v38, %v445_v36  ;;  %v451_v40 = vpop.f32.mrb[7].mxu0  ;;  %v5510_v10 = vpop.f32.mrb[7].mxu1  ;;  %v297_v36 = vld [vmem:[%s5406_s16 + $0x88] sm:$0xff] }
  0xfe   : > { %v557_v41 = vpack.c.bf16 %v451_v40, %v447_v37  ;;  %v312_v37 = vpack.c.bf16 %v297_v36, %v296_v35  ;;  %v965_v38 = vld [vmem:[%s7913_s3 + $0x8] sm:$0xff] }
 0x100   : > { %736 = vmatprep.subr.bf16.mxu1 %v557_v41  ;;  %4494 = vmatmul.mubr.msk.bf16.gmra.mrb[28].mxu0 %vm364_vm0, %v311_v34 }
 0x101   : > { %737 = vmatpush1.bf16.msra.mxu1 %v556_v39  ;;  %513 = vmatprep.mubr.bf16.mxu0 %v7918_v2 }
 0x102   : > { %v455_v42 = vpop.f32.mrb[8].mxu0  ;;  %v5518_v13 = vpop.f32.mrb[8].mxu1 }
 0x103   : > { %v457_v43 = vpop.f32.mrb[9].mxu0  ;;  %v5521_v14 = vpop.f32.mrb[9].mxu1 }
 0x104   : > { %v459_v44 = vpop.f32.mrb[10].mxu0  ;;  %v5523_v15 = vpop.f32.mrb[10].mxu1 }
 0x105   : > { %v558_v45 = vpack.c.bf16 %v459_v44, %v455_v42  ;;  %v461_v46 = vpop.f32.mrb[11].mxu0  ;;  %v5527_v17 = vpop.f32.mrb[11].mxu1 }
 0x106   : > { %v559_v47 = vpack.c.bf16 %v461_v46, %v457_v43 }
 0x108   : > { %738 = vmatprep.subr.bf16.mxu1 %v559_v47  ;;  %4495 = vmatmul.mubr.msk.bf16.gmra.mrb[32].mxu0 %vm364_vm0, %v312_v37 }
 0x109   : > { %739 = vmatpush1.bf16.msra.mxu1 %v558_v45  ;;  %4527 = vmatprep.mubr.msk.f32.mxu0 %vm908_vm1, %v965_v38 }
 0x10a   : > { %v465_v48 = vpop.f32.mrb[12].mxu0 }
 0x10b   : > { %v467_v49 = vpop.f32.mrb[13].mxu0 }
 0x10c   : > { %v469_v50 = vpop.f32.mrb[14].mxu0 }
 0x10d   : > { %v560_v51 = vpack.c.bf16 %v469_v50, %v465_v48  ;;  %v471_v52 = vpop.f32.mrb[15].mxu0 }
 0x10e   : > { %v561_v53 = vpack.c.bf16 %v471_v52, %v467_v49 }
 0x110   : > { %740 = vmatprep.subr.bf16.mxu1 %v561_v53 }
 0x111   : > { %741 = vmatpush1.bf16.msra.mxu1 %v560_v51 }
 0x114   : > { %4513 = vmatmul.mubr.msk.bf16.vlgmr.msra.gmra.mrb[12].mxu1 %vm364_vm0, %v5282_v54 }
 0x115   : > { %776 = vmatprep.mubr.bf16.mxu1 %v7918_v2 }
 0x11c   : > { %4514 = vmatmul.mubr.msk.bf16.gmra.mrb[16].mxu1 %vm364_vm0, %v5283_v55 }
 0x11d   : > { %786 = vmatprep.mubr.bf16.mxu1 %v7918_v2 }
 0x124   : > { %4515 = vmatmul.mubr.msk.bf16.gmra.mrb[20].mxu1 %vm364_vm0, %v5284_v56 }
 0x125   : > { %796 = vmatprep.mubr.bf16.mxu1 %v7918_v2 }
 0x12c   : > { %4516 = vmatmul.mubr.msk.bf16.gmra.mrb[24].mxu1 %vm364_vm0, %v5285_v57 }
 0x12d   : > { %806 = vmatprep.mubr.bf16.mxu1 %v7918_v2 }
 0x134   : > { %4517 = vmatmul.mubr.msk.bf16.gmra.mrb[28].mxu1 %vm364_vm0, %v5286_v58 }
 0x135   : > { %816 = vmatprep.mubr.bf16.mxu1 %v7918_v2 }
 0x13c   : > { %4518 = vmatmul.mubr.msk.bf16.gmra.mrb[32].mxu1 %vm364_vm0, %v5287_v59 }
 0x13d   : > { %826 = vmatprep.mubr.bf16.mxu1 %v7918_v2 }
 0x144   : > { %4519 = vmatmul.mubr.msk.bf16.gmra.mrb[36].mxu1 %vm364_vm0, %v5288_v60 }
 0x145   : > { %836 = vmatprep.mubr.bf16.mxu1 %v7918_v2 }
 0x14c   : > { %4520 = vmatmul.mubr.msk.bf16.gmra.mrb[40].mxu1 %vm364_vm0, %v5289_v61 }
 0x14d   : > { %846 = vmatprep.mubr.bf16.mxu1 %v7918_v2 }
 0x154   : > { %4521 = vmatmul.mubr.msk.bf16.gmra.mrb[44].mxu1 %vm364_vm0, %v5290_v4 }
 0x155   : > { %856 = vmatprep.mubr.bf16.mxu1 %v7918_v2 }
 0x15c   : > { %4522 = vmatmul.mubr.msk.bf16.gmra.mrb[48].mxu1 %vm364_vm0, %v5291_v11 }
 0x15d   : > { %866 = vmatprep.mubr.bf16.mxu1 %v7918_v2 }
 0x164   : > { %4523 = vmatmul.mubr.msk.bf16.gmra.mrb[52].mxu1 %vm364_vm0, %v5292_v18 }
 0x165   : > { %876 = vmatprep.mubr.bf16.mxu1 %v7918_v2 }
 0x16c   : > { %4524 = vmatmul.mubr.msk.bf16.gmra.mrb[56].mxu1 %vm364_vm0, %v5293_v20 }
 0x16d   : > { %886 = vmatprep.mubr.bf16.mxu1 %v7918_v2 }
 0x174   : > { %4525 = vmatmul.mubr.msk.bf16.gmra.mrb[60].mxu1 %vm364_vm0, %v5294_v21 }
 0x175   : > { %896 = vmatprep.mubr.bf16.mxu1 %v7918_v2 }
 0x17c   : > { %4526 = vmatmul.mubr.msk.bf16.gmra.mrb[64].mxu1 %vm364_vm0, %v5295_v22 }
 0x1e7   : > { %v768_v39 = vpop.f32.mrb[12].mxu1 }
 0x1e8   : > { %v770_v40 = vpop.f32.mrb[13].mxu1 }
 0x1e9   : > { %v772_v41 = vpop.f32.mrb[14].mxu1 }
 0x1ea   : > { %v4988_v42 = vpack.c.bf16 %v772_v41, %v768_v39  ;;  %v774_v43 = vpop.f32.mrb[15].mxu1 }
 0x1eb   : > { %v4986_v44 = vpack.c.bf16 %v774_v43, %v770_v40 }
 0x1ed   : > { %4987 = vmatprep.subr.bf16.mxu0 %v4986_v44 }
 0x1ee   : > { %4989 = vmatpush1.bf16.msra.mxu0 %v4988_v42 }
 0x1ef   : > { %v778_v45 = vpop.f32.mrb[16].mxu1 }
 0x1f0   : > { %v780_v46 = vpop.f32.mrb[17].mxu1 }
 0x1f1   : > { %v782_v47 = vpop.f32.mrb[18].mxu1 }
 0x1f2   : > { %v4992_v48 = vpack.c.bf16 %v782_v47, %v778_v45  ;;  %v784_v49 = vpop.f32.mrb[19].mxu1 }
 0x1f3   : > { %v4990_v50 = vpack.c.bf16 %v784_v49, %v780_v46 }
 0x1f5   : > { %4991 = vmatprep.subr.bf16.mxu0 %v4990_v50 }
 0x1f6   : > { %4993 = vmatpush1.bf16.msra.mxu0 %v4992_v48 }
 0x1f7   : > { %v788_v51 = vpop.f32.mrb[20].mxu1 }
 0x1f8   : > { %v790_v52 = vpop.f32.mrb[21].mxu1 }
 0x1f9   : > { %v792_v53 = vpop.f32.mrb[22].mxu1 }
 0x1fa   : > { %v4996_v54 = vpack.c.bf16 %v792_v53, %v788_v51  ;;  %v794_v55 = vpop.f32.mrb[23].mxu1 }
 0x1fb   : > { %v4994_v56 = vpack.c.bf16 %v794_v55, %v790_v52 }
 0x1fd   : > { %4995 = vmatprep.subr.bf16.mxu0 %v4994_v56 }
 0x1fe   : > { %4997 = vmatpush1.bf16.msra.mxu0 %v4996_v54 }
 0x1ff   : > { %v798_v57 = vpop.f32.mrb[24].mxu1 }
 0x200   : > { %v800_v58 = vpop.f32.mrb[25].mxu1 }
 0x201   : > { %v802_v59 = vpop.f32.mrb[26].mxu1 }
 0x202   : > { %v5000_v60 = vpack.c.bf16 %v802_v59, %v798_v57  ;;  %v804_v61 = vpop.f32.mrb[27].mxu1 }
 0x203   : > { %v4998_v4 = vpack.c.bf16 %v804_v61, %v800_v58 }
 0x205   : > { %4999 = vmatprep.subr.bf16.mxu0 %v4998_v4 }
 0x206   : > { %5001 = vmatpush1.bf16.msra.mxu0 %v5000_v60 }
 0x207   : > { %v808_v11 = vpop.f32.mrb[28].mxu1 }
 0x208   : > { %v810_v18 = vpop.f32.mrb[29].mxu1 }
 0x209   : > { %v812_v20 = vpop.f32.mrb[30].mxu1 }
 0x20a   : > { %v5004_v21 = vpack.c.bf16 %v812_v20, %v808_v11  ;;  %v814_v22 = vpop.f32.mrb[31].mxu1 }
 0x20b   : > { %v5002_v23 = vpack.c.bf16 %v814_v22, %v810_v18 }
 0x20d   : > { %5003 = vmatprep.subr.bf16.mxu0 %v5002_v23 }
 0x20e   : > { %5005 = vmatpush1.bf16.msra.mxu0 %v5004_v21 }
 0x20f   : > { %v818_v24 = vpop.f32.mrb[32].mxu1 }
 0x210   : > { %v820_v25 = vpop.f32.mrb[33].mxu1 }
 0x211   : > { %v822_v26 = vpop.f32.mrb[34].mxu1 }
 0x212   : > { %v5008_v27 = vpack.c.bf16 %v822_v26, %v818_v24  ;;  %v824_v28 = vpop.f32.mrb[35].mxu1 }
 0x213   : > { %v5006_v29 = vpack.c.bf16 %v824_v28, %v820_v25 }
 0x215   : > { %5007 = vmatprep.subr.bf16.mxu0 %v5006_v29 }
 0x216   : > { %5009 = vmatpush1.bf16.msra.mxu0 %v5008_v27 }
 0x217   : > { %v828_v30 = vpop.f32.mrb[36].mxu1 }
 0x218   : > { %v830_v31 = vpop.f32.mrb[37].mxu1 }
 0x219   : > { %v832_v32 = vpop.f32.mrb[38].mxu1 }
 0x21a   : > { %v5012_v33 = vpack.c.bf16 %v832_v32, %v828_v30  ;;  %v834_v34 = vpop.f32.mrb[39].mxu1 }
 0x21b   : > { %v5010_v35 = vpack.c.bf16 %v834_v34, %v830_v31  ;;  %v967_v34 = vld [vmem:[%s7913_s3 + $0x18] sm:$0xff] }
 0x21d   : > { %5011 = vmatprep.subr.bf16.mxu0 %v5010_v35  ;;  %v966_v35 = vld [vmem:[%s7913_s3 + $0x10] sm:$0xff] }
 0x21e   : > { %5013 = vmatpush1.bf16.msra.mxu0 %v5012_v33  ;;  %v964_v33 = vld [vmem:[%s7913_s3] sm:$0xff] }
 0x21f   : > { %v838_v36 = vpop.f32.mrb[40].mxu1 }
 0x220   : > { %v840_v37 = vpop.f32.mrb[41].mxu1 }
 0x221   : > { %v842_v38 = vpop.f32.mrb[42].mxu1 }
 0x222   : > { %v5016_v39 = vpack.c.bf16 %v842_v38, %v838_v36  ;;  %v844_v40 = vpop.f32.mrb[43].mxu1  ;;  %v969_v36 = vld [vmem:[%s7913_s3 + $0x28] sm:$0xff]  ;;  %v971_v38 = vld [vmem:[%s7913_s3 + $0x38] sm:$0xff] }
 0x223   : > { %v5014_v41 = vpack.c.bf16 %v844_v40, %v840_v37  ;;  %v968_v37 = vld [vmem:[%s7913_s3 + $0x20] sm:$0xff]  ;;  %v973_v40 = vld [vmem:[%s7913_s3 + $0x48] sm:$0xff] }
 0x225   : > { %5015 = vmatprep.subr.bf16.mxu0 %v5014_v41  ;;  %v972_v41 = vld [vmem:[%s7913_s3 + $0x40] sm:$0xff] }
 0x226   : > { %5017 = vmatpush1.bf16.msra.mxu0 %v5016_v39  ;;  %v970_v39 = vld [vmem:[%s7913_s3 + $0x30] sm:$0xff] }
 0x227   : > { %v848_v42 = vpop.f32.mrb[44].mxu1 }
 0x228   : > { %v850_v43 = vpop.f32.mrb[45].mxu1 }
 0x229   : > { %v852_v44 = vpop.f32.mrb[46].mxu1 }
 0x22a   : > { %v5020_v45 = vpack.c.bf16 %v852_v44, %v848_v42  ;;  %v854_v46 = vpop.f32.mrb[47].mxu1  ;;  %v975_v42 = vld [vmem:[%s7913_s3 + $0x58] sm:$0xff]  ;;  %v977_v44 = vld [vmem:[%s7913_s3 + $0x68] sm:$0xff] }
 0x22b   : > { %v5018_v47 = vpack.c.bf16 %v854_v46, %v850_v43  ;;  %v974_v43 = vld [vmem:[%s7913_s3 + $0x50] sm:$0xff]  ;;  %v979_v46 = vld [vmem:[%s7913_s3 + $0x78] sm:$0xff] }
 0x22d   : > { %5019 = vmatprep.subr.bf16.mxu0 %v5018_v47  ;;  %v978_v47 = vld [vmem:[%s7913_s3 + $0x70] sm:$0xff] }
 0x22e   : > { %5021 = vmatpush1.bf16.msra.mxu0 %v5020_v45  ;;  %v976_v45 = vld [vmem:[%s7913_s3 + $0x60] sm:$0xff] }
 0x22f   : > { %v858_v48 = vpop.f32.mrb[48].mxu1 }
 0x230   : > { %v860_v49 = vpop.f32.mrb[49].mxu1 }
 0x231   : > { %v862_v50 = vpop.f32.mrb[50].mxu1 }
 0x232   : > { %v5024_v51 = vpack.c.bf16 %v862_v50, %v858_v48  ;;  %v864_v52 = vpop.f32.mrb[51].mxu1  ;;  %v981_v48 = vld [vmem:[%s7913_s3 + $0x88] sm:$0xff]  ;;  %v983_v50 = vld [vmem:[%s7913_s3 + $0x98] sm:$0xff] }
 0x233   : > { %v5022_v53 = vpack.c.bf16 %v864_v52, %v860_v49  ;;  %v980_v49 = vld [vmem:[%s7913_s3 + $0x80] sm:$0xff]  ;;  %v985_v52 = vld [vmem:[%s7913_s3 + $0xa8] sm:$0xff] }
 0x235   : > { %5023 = vmatprep.subr.bf16.mxu0 %v5022_v53  ;;  %v984_v53 = vld [vmem:[%s7913_s3 + $0xa0] sm:$0xff] }
 0x236   : > { %5025 = vmatpush1.bf16.msra.mxu0 %v5024_v51  ;;  %v982_v51 = vld [vmem:[%s7913_s3 + $0x90] sm:$0xff] }
 0x237   : > { %v868_v54 = vpop.f32.mrb[52].mxu1 }
 0x238   : > { %v870_v55 = vpop.f32.mrb[53].mxu1 }
 0x239   : > { %v872_v56 = vpop.f32.mrb[54].mxu1 }
 0x23a   : > { %v5028_v57 = vpack.c.bf16 %v872_v56, %v868_v54  ;;  %v874_v58 = vpop.f32.mrb[55].mxu1  ;;  %v987_v54 = vld [vmem:[%s7913_s3 + $0xb8] sm:$0xff]  ;;  %v986_v56 = vld [vmem:[%s7913_s3 + $0xb0] sm:$0xff] }
 0x23b   : > { %v5026_v59 = vpack.c.bf16 %v874_v58, %v870_v55  ;;  %v5649_v55 = vpop.f32.mrb[16].mxu0  ;;  %v989_v58 = vld [vmem:[%s7913_s3 + $0xc8] sm:$0xff] }
 0x23d   : > { %5027 = vmatprep.subr.bf16.mxu0 %v5026_v59 }
 0x23e   : > { %5029 = vmatpush1.bf16.msra.mxu0 %v5028_v57  ;;  %v5655_v57 = vpop.f32.mrb[17].mxu0 }
 0x23f   : > { %v878_v60 = vpop.f32.mrb[56].mxu1  ;;  %v5660_v59 = vpop.f32.mrb[18].mxu0 }
 0x240   : > { %v880_v61 = vpop.f32.mrb[57].mxu1 }
 0x241   : > { %v882_v4 = vpop.f32.mrb[58].mxu1 }
 0x242   : > { %v5032_v11 = vpack.c.bf16 %v882_v4, %v878_v60  ;;  %v884_v18 = vpop.f32.mrb[59].mxu1  ;;  %v562_v60 = vpack.c.bf16 %v5660_v59, %v5649_v55  ;;  %v1641_v55 = vld [vmem:[%s7915_s5 + $0x20] sm:$0xff] }
 0x243   : > { %v5030_v20 = vpack.c.bf16 %v884_v18, %v880_v61  ;;  %v5664_v61 = vpop.f32.mrb[19].mxu0  ;;  %v991_v18 = vld [vmem:[%s7913_s3 + $0xd8] sm:$0xff] }
 0x244   : > { %v563_v4 = vpack.c.bf16 %v5664_v61, %v5655_v57  ;;  %v1642_v57 = vld [vmem:[%s7915_s5 + $0x28] sm:$0xff] }
 0x245   : > { %5031 = vmatprep.subr.bf16.mxu0 %v5030_v20  ;;  %v5675_v20 = vpop.f32.mrb[20].mxu0 }
 0x246   : > { %5033 = vmatpush1.bf16.msra.mxu0 %v5032_v11  ;;  %v988_v11 = vld [vmem:[%s7913_s3 + $0xc0] sm:$0xff] }
 0x247   : > { %v888_v21 = vpop.f32.mrb[60].mxu1 }
 0x248   : > { %v890_v22 = vpop.f32.mrb[61].mxu1 }
 0x249   : > { %v892_v23 = vpop.f32.mrb[62].mxu1 }
 0x24a   : > { %v5036_v24 = vpack.c.bf16 %v892_v23, %v888_v21  ;;  %v894_v25 = vpop.f32.mrb[63].mxu1  ;;  %v990_v21 = vld [vmem:[%s7913_s3 + $0xd0] sm:$0xff]  ;;  %v993_v23 = vld [vmem:[%s7913_s3 + $0xe8] sm:$0xff] }
 0x24b   : > { %v5034_v26 = vpack.c.bf16 %v894_v25, %v890_v22  ;;  %v5681_v22 = vpop.f32.mrb[21].mxu0 }
 0x24d   : > { %5035 = vmatprep.subr.bf16.mxu0 %v5034_v26 }
 0x24e   : > { %5037 = vmatpush1.bf16.msra.mxu0 %v5036_v24  ;;  %v5686_v24 = vpop.f32.mrb[22].mxu0 }
 0x24f   : > { %v898_v27 = vpop.f32.mrb[64].mxu1  ;;  %v5690_v26 = vpop.f32.mrb[23].mxu0  ;;  %v7935_v61 = vpack.c.bf16 %v5686_v24, %v5675_v20  ;;  %v1643_v20 = vld [vmem:[%s7915_s5 + $0x30] sm:$0xff]  ;;  %v1646_v24 = vld [vmem:[%s7915_s5 + $0x48] sm:$0xff] }
 0x250   : > { %v900_v28 = vpop.f32.mrb[65].mxu1 }
 0x251   : > { %v902_v29 = vpop.f32.mrb[66].mxu1 }
 0x252   : > { %v5040_v30 = vpack.c.bf16 %v902_v29, %v898_v27  ;;  %v904_v31 = vpop.f32.mrb[67].mxu1  ;;  %v565_v27 = vpack.c.bf16 %v5690_v26, %v5681_v22  ;;  %v995_v29 = vld [vmem:[%s7913_s3 + $0xf8] sm:$0xff] }
 0x253   : > { %v5038_v32 = vpack.c.bf16 %v904_v31, %v900_v28  ;;  %v992_v28 = vld [vmem:[%s7913_s3 + $0xe0] sm:$0xff]  ;;  %v994_v31 = vld [vmem:[%s7913_s3 + $0xf0] sm:$0xff] }
 0x255   : > { %5039 = vmatprep.subr.bf16.mxu0 %v5038_v32 }
 0x256   : > { %5041 = vmatpush1.bf16.msra.mxu0 %v5040_v30  ;;  %v5701_v30 = vpop.f32.mrb[24].mxu0 }
 0x257   : > { %v5707_v32 = vpop.f32.mrb[25].mxu0 }
 0x259   : > { %1189 = vmatmul.mubr.f32.vlgmr.msra.gmra.mrb[36].mxu0 %v964_v33  ;;  %v997_v33 = vld [vmem:[%s7913_s3 + $0x108] sm:$0xff] }
 0x25a   : > { %4528 = vmatprep.mubr.msk.f32.mxu0 %vm908_vm1, %v967_v34  ;;  %v5712_v34 = vpop.f32.mrb[26].mxu0 }
 0x25d   : > { %1195 = vmatmul.mubr.f32.gmra.mrb[38].mxu0 %v966_v35 }
 0x25e   : > { %4529 = vmatprep.mubr.msk.f32.mxu0 %vm908_vm1, %v969_v36  ;;  %v5716_v36 = vpop.f32.mrb[27].mxu0 }
 0x25f   : > { %v7936_v59 = vpack.c.bf16 %v5716_v36, %v5707_v32  ;;  %v1647_v32 = vld [vmem:[%s7915_s5 + $0x50] sm:$0xff]  ;;  %v1649_v36 = vld [vmem:[%s7915_s5 + $0x60] sm:$0xff] }
 0x261   : > { %1201 = vmatmul.mubr.f32.gmra.mrb[40].mxu0 %v968_v37 }
 0x262   : > { %4530 = vmatprep.mubr.msk.f32.mxu0 %vm908_vm1, %v971_v38  ;;  %v996_v38 = vld [vmem:[%s7913_s3 + $0x100] sm:$0xff] }
 0x265   : > { %1207 = vmatmul.mubr.f32.gmra.mrb[42].mxu0 %v970_v39  ;;  %v999_v39 = vld [vmem:[%s7913_s3 + $0x118] sm:$0xff] }
 0x266   : > { %4531 = vmatprep.mubr.msk.f32.mxu0 %vm908_vm1, %v973_v40  ;;  %v5727_v40 = vpop.f32.mrb[28].mxu0 }
 0x269   : > { %1213 = vmatmul.mubr.f32.gmra.mrb[44].mxu0 %v972_v41  ;;  %v998_v41 = vld [vmem:[%s7913_s3 + $0x110] sm:$0xff] }
 0x26a   : > { %4532 = vmatprep.mubr.msk.f32.mxu0 %vm908_vm1, %v975_v42  ;;  %v5733_v42 = vpop.f32.mrb[29].mxu0 }
 0x26d   : > { %1219 = vmatmul.mubr.f32.gmra.mrb[46].mxu0 %v974_v43  ;;  %v1001_v43 = vld [vmem:[%s7913_s3 + $0x128] sm:$0xff] }
 0x26e   : > { %4533 = vmatprep.mubr.msk.f32.mxu0 %vm908_vm1, %v977_v44  ;;  %v5738_v44 = vpop.f32.mrb[30].mxu0 }
 0x26f   : > { %v7939_v26 = vpack.c.bf16 %v5738_v44, %v5727_v40  ;;  %v1652_v40 = vld [vmem:[%s7915_s5 + $0x78] sm:$0xff]  ;;  %v1654_v44 = vld [vmem:[%s7915_s5 + $0x88] sm:$0xff] }
 0x271   : > { %1225 = vmatmul.mubr.f32.gmra.mrb[48].mxu0 %v976_v45 }
 0x272   : > { %4534 = vmatprep.mubr.msk.f32.mxu0 %vm908_vm1, %v979_v46  ;;  %v5742_v46 = vpop.f32.mrb[31].mxu0 }
 0x273   : > { %v7938_v22 = vpack.c.bf16 %v5742_v46, %v5733_v42  ;;  %v1651_v42 = vld [vmem:[%s7915_s5 + $0x70] sm:$0xff]  ;;  %v1653_v46 = vld [vmem:[%s7915_s5 + $0x80] sm:$0xff] }
 0x275   : > { %1231 = vmatmul.mubr.f32.gmra.mrb[50].mxu0 %v978_v47 }
 0x276   : > { %4535 = vmatprep.mubr.msk.f32.mxu0 %vm908_vm1, %v981_v48  ;;  %v1000_v48 = vld [vmem:[%s7913_s3 + $0x120] sm:$0xff] }
 0x279   : > { %1237 = vmatmul.mubr.f32.gmra.mrb[52].mxu0 %v980_v49  ;;  %v1003_v49 = vld [vmem:[%s7913_s3 + $0x138] sm:$0xff] }
 0x27a   : > { %4536 = vmatprep.mubr.msk.f32.mxu0 %vm908_vm1, %v983_v50  ;;  %v5753_v50 = vpop.f32.mrb[32].mxu0 }
 0x27d   : > { %1243 = vmatmul.mubr.f32.gmra.mrb[54].mxu0 %v982_v51  ;;  %v1002_v51 = vld [vmem:[%s7913_s3 + $0x130] sm:$0xff] }
 0x27e   : > { %4537 = vmatprep.mubr.msk.f32.mxu0 %vm908_vm1, %v985_v52  ;;  %v5759_v52 = vpop.f32.mrb[33].mxu0 }
 0x281   : > { %1249 = vmatmul.mubr.f32.gmra.mrb[56].mxu0 %v984_v53  ;;  %v1005_v53 = vld [vmem:[%s7913_s3 + $0x148] sm:$0xff] }
 0x282   : > { %4538 = vmatprep.mubr.msk.f32.mxu0 %vm908_vm1, %v987_v54  ;;  %v5764_v54 = vpop.f32.mrb[34].mxu0 }
 0x285   : > { %1255 = vmatmul.mubr.f32.gmra.mrb[58].mxu0 %v986_v56 }
 0x286   : > { %4539 = vmatprep.mubr.msk.f32.mxu0 %vm908_vm1, %v989_v58  ;;  %v5768_v58 = vpop.f32.mrb[35].mxu0 }
 0x289   : > { %1261 = vmatmul.mubr.f32.gmra.mrb[60].mxu0 %v988_v11 }
 0x28a   : > { %4540 = vmatprep.mubr.msk.f32.mxu0 %vm908_vm1, %v991_v18  ;;  %v1004_v18 = vld [vmem:[%s7913_s3 + $0x140] sm:$0xff] }
 0x28d   : > { %1267 = vmatmul.mubr.f32.gmra.mrb[62].mxu0 %v990_v21  ;;  %v1007_v21 = vld [vmem:[%s7913_s3 + $0x158] sm:$0xff] }
 0x28e   : > { %4541 = vmatprep.mubr.msk.f32.mxu0 %vm908_vm1, %v993_v23  ;;  %v1006_v23 = vld [vmem:[%s7913_s3 + $0x150] sm:$0xff] }
 0x291   : > { %1273 = vmatmul.mubr.f32.gmra.mrb[64].mxu0 %v992_v28  ;;  %v1009_v28 = vld [vmem:[%s7913_s3 + $0x168] sm:$0xff] }
 0x292   : > { %4542 = vmatprep.mubr.msk.f32.mxu0 %vm908_vm1, %v995_v29  ;;  %v1008_v29 = vld [vmem:[%s7913_s3 + $0x160] sm:$0xff] }
 0x295   : > { %1279 = vmatmul.mubr.f32.gmra.mrb[66].mxu0 %v994_v31  ;;  %v1011_v31 = vld [vmem:[%s7913_s3 + $0x178] sm:$0xff] }
 0x296   : > { %4543 = vmatprep.mubr.msk.f32.mxu0 %vm908_vm1, %v997_v33  ;;  %v1010_v33 = vld [vmem:[%s7913_s3 + $0x170] sm:$0xff] }
 0x299   : > { %1285 = vmatmul.mubr.f32.gmra.mrb[68].mxu0 %v996_v38  ;;  %v1013_v38 = vld [vmem:[%s7913_s3 + $0x188] sm:$0xff] }
 0x29a   : > { %4544 = vmatprep.mubr.msk.f32.mxu0 %vm908_vm1, %v999_v39  ;;  %v1012_v39 = vld [vmem:[%s7913_s3 + $0x180] sm:$0xff] }
 0x29d   : > { %1291 = vmatmul.mubr.f32.gmra.mrb[70].mxu0 %v998_v41  ;;  %v1015_v41 = vld [vmem:[%s7913_s3 + $0x198] sm:$0xff] }
 0x29e   : > { %4545 = vmatprep.mubr.msk.f32.mxu0 %vm908_vm1, %v1001_v43  ;;  %v1014_v43 = vld [vmem:[%s7913_s3 + $0x190] sm:$0xff] }
 0x2a1   : > { %1297 = vmatmul.mubr.f32.gmra.mrb[72].mxu0 %v1000_v48  ;;  %v1017_v48 = vld [vmem:[%s7913_s3 + $0x1a8] sm:$0xff] }
 0x2a2   : > { %4546 = vmatprep.mubr.msk.f32.mxu0 %vm908_vm1, %v1003_v49  ;;  %v1016_v49 = vld [vmem:[%s7913_s3 + $0x1a0] sm:$0xff] }
 0x2a5   : > { %1303 = vmatmul.mubr.f32.gmra.mrb[74].mxu0 %v1002_v51  ;;  %v1019_v51 = vld [vmem:[%s7913_s3 + $0x1b8] sm:$0xff] }
 0x2a6   : > { %4547 = vmatprep.mubr.msk.f32.mxu0 %vm908_vm1, %v1005_v53  ;;  %v1018_v53 = vld [vmem:[%s7913_s3 + $0x1b0] sm:$0xff] }
 0x2a9   : > { %1309 = vmatmul.mubr.f32.gmra.mrb[76].mxu0 %v1004_v18  ;;  %v1021_v18 = vld [vmem:[%s7913_s3 + $0x1c8] sm:$0xff] }
 0x2aa   : > { %4548 = vmatprep.mubr.msk.f32.mxu0 %vm908_vm1, %v1007_v21  ;;  %v1020_v21 = vld [vmem:[%s7913_s3 + $0x1c0] sm:$0xff] }
 0x2ad   : > { %1315 = vmatmul.mubr.f32.gmra.mrb[78].mxu0 %v1006_v23  ;;  %v1023_v23 = vld [vmem:[%s7913_s3 + $0x1d8] sm:$0xff] }
 0x2ae   : > { %4549 = vmatprep.mubr.msk.f32.mxu0 %vm908_vm1, %v1009_v28  ;;  %v1022_v28 = vld [vmem:[%s7913_s3 + $0x1d0] sm:$0xff] }
 0x2b1   : > { %1321 = vmatmul.mubr.f32.gmra.mrb[80].mxu0 %v1008_v29  ;;  %v1025_v29 = vld [vmem:[%s7913_s3 + $0x1e8] sm:$0xff] }
 0x2b2   : > { %4550 = vmatprep.mubr.msk.f32.mxu0 %vm908_vm1, %v1011_v31  ;;  %v1024_v31 = vld [vmem:[%s7913_s3 + $0x1e0] sm:$0xff] }
 0x2b5   : > { %1327 = vmatmul.mubr.f32.gmra.mrb[82].mxu0 %v1010_v33  ;;  %v1027_v33 = vld [vmem:[%s7913_s3 + $0x1f8] sm:$0xff] }
 0x2b6   : > { %4551 = vmatprep.mubr.msk.f32.mxu0 %vm908_vm1, %v1013_v38  ;;  %v1026_v38 = vld [vmem:[%s7913_s3 + $0x1f0] sm:$0xff] }
 0x2b9   : > { %1333 = vmatmul.mubr.f32.gmra.mrb[84].mxu0 %v1012_v39  ;;  %v1382_v39 = vld [vmem:[%s7914_s4 + $0x8] sm:$0xff] }
 0x2ba   : > { %4552 = vmatprep.mubr.msk.f32.mxu0 %vm908_vm1, %v1015_v41 }
 0x2bd   : > { %1339 = vmatmul.mubr.f32.gmra.mrb[86].mxu0 %v1014_v43  ;;  %v1381_v43 = vld [vmem:[%s7914_s4] sm:$0xff] }
 0x2be   : > { %4553 = vmatprep.mubr.msk.f32.mxu0 %vm908_vm1, %v1017_v48 }
 0x2c1   : > { %1345 = vmatmul.mubr.f32.gmra.mrb[88].mxu0 %v1016_v49 }
 0x2c2   : > { %4554 = vmatprep.mubr.msk.f32.mxu0 %vm908_vm1, %v1019_v51 }
 0x2c5   : > { %1351 = vmatmul.mubr.f32.gmra.mrb[90].mxu0 %v1018_v53  ;;  %v1384_v53 = vld [vmem:[%s7914_s4 + $0x18] sm:$0xff] }
 0x2c6   : > { %4555 = vmatprep.mubr.msk.f32.mxu0 %vm908_vm1, %v1021_v18 }
 0x2c9   : > { %1357 = vmatmul.mubr.f32.gmra.mrb[92].mxu0 %v1020_v21  ;;  %v1383_v21 = vld [vmem:[%s7914_s4 + $0x10] sm:$0xff] }
 0x2ca   : > { %4556 = vmatprep.mubr.msk.f32.mxu0 %vm908_vm1, %v1023_v23 }
 0x2cd   : > { %1363 = vmatmul.mubr.f32.gmra.mrb[94].mxu0 %v1022_v28 }
 0x2ce   : > { %4557 = vmatprep.mubr.msk.f32.mxu0 %vm908_vm1, %v1025_v29 }
 0x2d1   : > { %1369 = vmatmul.mubr.f32.gmra.mrb[96].mxu0 %v1024_v31 }
 0x2d2   : > { %4558 = vmatprep.mubr.msk.f32.mxu0 %vm908_vm1, %v1027_v33 }
 0x2d5   : > { %1375 = vmatmul.mubr.f32.gmra.mrb[98].mxu0 %v1026_v38  ;;  %v1386_v38 = vld [vmem:[%s7914_s4 + $0x28] sm:$0xff] }
 0x32c   : > { %v1190_v41 = vpop.f32.mrb[36].mxu0 }
 0x32d   : > { %v1192_v48 = vpop.f32.mrb[37].mxu0  ;;  %v1445_v51 = vmul.f32 %v1381_v43, %v1190_v41  ;;  %v1385_v41 = vld [vmem:[%s7914_s4 + $0x20] sm:$0xff] }
 0x32e   : > { %v1446_v49 = vmul.f32 %v1382_v39, %v1192_v48 }
 0x330   : > { %v1196_v18 = vpop.f32.mrb[38].mxu0  ;;  %v1509_v23 = vsel %vm908_vm1, %v1446_v49, 0.0 }
 0x331   : > { %v1198_v28 = vpop.f32.mrb[39].mxu0  ;;  %v1510_v29 = vadd.f32 %v1509_v23, %v1445_v51  ;;  %v1447_v33 = vmul.f32 %v1383_v21, %v1196_v18  ;;  %v1388_v51 = vld [vmem:[%s7914_s4 + $0x38] sm:$0xff]  ;;  %v1387_v18 = vld [vmem:[%s7914_s4 + $0x30] sm:$0xff] }
 0x332   : > { %v1448_v31 = vmul.f32 %v1384_v53, %v1198_v28 }
 0x333   : > { %1511 = vadd.xlane.f32.xlu1 %v1510_v29 }
 0x334   : > { %v1202_v39 = vpop.f32.mrb[40].mxu0  ;;  %v1513_v43 = vsel %vm908_vm1, %v1448_v31, 0.0 }
 0x335   : > { %v1204_v48 = vpop.f32.mrb[41].mxu0  ;;  %v1514_v16 = vadd.f32 %v1513_v43, %v1447_v33  ;;  %v1449_v49 = vmul.f32 %v1385_v41, %v1202_v39 }
 0x336   : > { %v1450_v19 = vmul.f32 %v1386_v38, %v1204_v48  ;;  %v1389_v38 = vld [vmem:[%s7914_s4 + $0x40] sm:$0xff] }
 0x337   : > { %1515 = vadd.xlane.f32.xlu1 %v1514_v16  ;;  %v1390_v16 = vld [vmem:[%s7914_s4 + $0x48] sm:$0xff] }
 0x338   : > { %v1208_v53 = vpop.f32.mrb[42].mxu0  ;;  %v1517_v21 = vsel %vm908_vm1, %v1450_v19, 0.0 }
 0x339   : > { %v1210_v23 = vpop.f32.mrb[43].mxu0  ;;  %v1518_v28 = vadd.f32 %v1517_v21, %v1449_v49  ;;  %v1451_v31 = vmul.f32 %v1387_v18, %v1208_v53  ;;  %v1392_v49 = vld [vmem:[%s7914_s4 + $0x58] sm:$0xff]  ;;  %v1391_v53 = vld [vmem:[%s7914_s4 + $0x50] sm:$0xff] }
 0x33a   : > { %v1452_v29 = vmul.f32 %v1388_v51, %v1210_v23 }
 0x33b   : > { %1519 = vadd.xlane.f32.xlu0 %v1518_v28 }
 0x33c   : > { %v1214_v33 = vpop.f32.mrb[44].mxu0  ;;  %v1521_v39 = vsel %vm908_vm1, %v1452_v29, 0.0 }
 0x33d   : > { %v1216_v41 = vpop.f32.mrb[45].mxu0  ;;  %v1522_v43 = vadd.f32 %v1521_v39, %v1451_v31  ;;  %v1453_v19 = vmul.f32 %v1389_v38, %v1214_v33  ;;  %v1394_v31 = vld [vmem:[%s7914_s4 + $0x68] sm:$0xff]  ;;  %v1393_v33 = vld [vmem:[%s7914_s4 + $0x60] sm:$0xff] }
 0x33e   : > { %v1454_v48 = vmul.f32 %v1390_v16, %v1216_v41 }
 0x33f   : > { %1523 = vadd.xlane.f32.xlu1 %v1522_v43 }
 0x340   : > { %v1220_v51 = vpop.f32.mrb[46].mxu0  ;;  %v1525_v18 = vsel %vm908_vm1, %v1454_v48, 0.0 }
 0x341   : > { %v1222_v21 = vpop.f32.mrb[47].mxu0  ;;  %v1526_v23 = vadd.f32 %v1525_v18, %v1453_v19  ;;  %v1455_v29 = vmul.f32 %v1391_v53, %v1220_v51  ;;  %v1396_v19 = vld [vmem:[%s7914_s4 + $0x78] sm:$0xff]  ;;  %v1395_v51 = vld [vmem:[%s7914_s4 + $0x70] sm:$0xff] }
 0x342   : > { %v1456_v28 = vmul.f32 %v1392_v49, %v1222_v21 }
 0x343   : > { %1527 = vadd.xlane.f32.xlu0 %v1526_v23 }
 0x344   : > { %v1226_v16 = vpop.f32.mrb[48].mxu0  ;;  %v1529_v38 = vsel %vm908_vm1, %v1456_v28, 0.0 }
 0x345   : > { %v1228_v39 = vpop.f32.mrb[49].mxu0  ;;  %v1530_v41 = vadd.f32 %v1529_v38, %v1455_v29  ;;  %v1457_v48 = vmul.f32 %v1393_v33, %v1226_v16  ;;  %v1398_v29 = vld [vmem:[%s7914_s4 + $0x88] sm:$0xff]  ;;  %v1397_v16 = vld [vmem:[%s7914_s4 + $0x80] sm:$0xff] }
 0x346   : > { %v1458_v43 = vmul.f32 %v1394_v31, %v1228_v39 }
 0x347   : > { %1531 = vadd.xlane.f32.xlu1 %v1530_v41 }
 0x348   : > { %v1232_v49 = vpop.f32.mrb[50].mxu0  ;;  %v1533_v53 = vsel %vm908_vm1, %v1458_v43, 0.0 }
 0x349   : > { %v1234_v18 = vpop.f32.mrb[51].mxu0  ;;  %v1534_v21 = vadd.f32 %v1533_v53, %v1457_v48  ;;  %v1459_v28 = vmul.f32 %v1395_v51, %v1232_v49  ;;  %v1400_v48 = vld [vmem:[%s7914_s4 + $0x98] sm:$0xff]  ;;  %v1399_v49 = vld [vmem:[%s7914_s4 + $0x90] sm:$0xff] }
 0x34a   : > { %v1460_v23 = vmul.f32 %v1396_v19, %v1234_v18 }
 0x34b   : > { %1535 = vadd.xlane.f32.xlu0 %v1534_v21 }
 0x34c   : > { %v1238_v31 = vpop.f32.mrb[52].mxu0  ;;  %v1537_v33 = vsel %vm908_vm1, %v1460_v23, 0.0 }
 0x34d   : > { %v1240_v38 = vpop.f32.mrb[53].mxu0  ;;  %v1538_v39 = vadd.f32 %v1537_v33, %v1459_v28  ;;  %v1461_v43 = vmul.f32 %v1397_v16, %v1238_v31  ;;  %v1402_v28 = vld [vmem:[%s7914_s4 + $0xa8] sm:$0xff]  ;;  %v1401_v31 = vld [vmem:[%s7914_s4 + $0xa0] sm:$0xff] }
 0x34e   : > { %v1462_v41 = vmul.f32 %v1398_v29, %v1240_v38 }
 0x34f   : > { %1539 = vadd.xlane.f32.xlu1 %v1538_v39 }
 0x350   : > { %v1244_v19 = vpop.f32.mrb[54].mxu0  ;;  %v1541_v51 = vsel %vm908_vm1, %v1462_v41, 0.0 }
 0x351   : > { %v1246_v53 = vpop.f32.mrb[55].mxu0  ;;  %v1542_v18 = vadd.f32 %v1541_v51, %v1461_v43  ;;  %v1463_v23 = vmul.f32 %v1399_v49, %v1244_v19  ;;  %v1404_v43 = vld [vmem:[%s7914_s4 + $0xb8] sm:$0xff]  ;;  %v1403_v19 = vld [vmem:[%s7914_s4 + $0xb0] sm:$0xff] }
 0x352   : > { %v1464_v21 = vmul.f32 %v1400_v48, %v1246_v53 }
 0x353   : > { %1543 = vadd.xlane.f32.xlu0 %v1542_v18 }
 0x354   : > { %v1250_v29 = vpop.f32.mrb[56].mxu0  ;;  %v1545_v16 = vsel %vm908_vm1, %v1464_v21, 0.0 }
 0x355   : > { %v1252_v33 = vpop.f32.mrb[57].mxu0  ;;  %v1546_v38 = vadd.f32 %v1545_v16, %v1463_v23  ;;  %v1465_v41 = vmul.f32 %v1401_v31, %v1250_v29  ;;  %v1406_v23 = vld [vmem:[%s7914_s4 + $0xc8] sm:$0xff]  ;;  %v1405_v29 = vld [vmem:[%s7914_s4 + $0xc0] sm:$0xff] }
 0x356   : > { %v1466_v39 = vmul.f32 %v1402_v28, %v1252_v33 }
 0x357   : > { %1547 = vadd.xlane.f32.xlu1 %v1546_v38 }
 0x358   : > { %v1256_v48 = vpop.f32.mrb[58].mxu0  ;;  %v1549_v49 = vsel %vm908_vm1, %v1466_v39, 0.0 }
 0x359   : > { %v1258_v51 = vpop.f32.mrb[59].mxu0  ;;  %v1550_v53 = vadd.f32 %v1549_v49, %v1465_v41  ;;  %v1467_v21 = vmul.f32 %v1403_v19, %v1256_v48  ;;  %v1408_v41 = vld [vmem:[%s7914_s4 + $0xd8] sm:$0xff]  ;;  %v1407_v48 = vld [vmem:[%s7914_s4 + $0xd0] sm:$0xff] }
 0x35a   : > { %v1468_v18 = vmul.f32 %v1404_v43, %v1258_v51 }
 0x35b   : > { %1551 = vadd.xlane.f32.xlu0 %v1550_v53 }
 0x35c   : > { %v1262_v28 = vpop.f32.mrb[60].mxu0  ;;  %v1553_v31 = vsel %vm908_vm1, %v1468_v18, 0.0 }
 0x35d   : > { %v1264_v16 = vpop.f32.mrb[61].mxu0  ;;  %v1554_v33 = vadd.f32 %v1553_v31, %v1467_v21  ;;  %v1469_v39 = vmul.f32 %v1405_v29, %v1262_v28  ;;  %v1410_v21 = vld [vmem:[%s7914_s4 + $0xe8] sm:$0xff]  ;;  %v1409_v28 = vld [vmem:[%s7914_s4 + $0xe0] sm:$0xff] }
 0x35e   : > { %v1470_v38 = vmul.f32 %v1406_v23, %v1264_v16 }
 0x35f   : > { %1555 = vadd.xlane.f32.xlu1 %v1554_v33 }
 0x360   : > { %v1268_v43 = vpop.f32.mrb[62].mxu0  ;;  %v1557_v19 = vsel %vm908_vm1, %v1470_v38, 0.0 }
 0x361   : > { %v1270_v49 = vpop.f32.mrb[63].mxu0  ;;  %v1558_v51 = vadd.f32 %v1557_v19, %v1469_v39  ;;  %v1471_v18 = vmul.f32 %v1407_v48, %v1268_v43  ;;  %v1412_v39 = vld [vmem:[%s7914_s4 + $0xf8] sm:$0xff]  ;;  %v1411_v43 = vld [vmem:[%s7914_s4 + $0xf0] sm:$0xff] }
 0x362   : > { %v1472_v53 = vmul.f32 %v1408_v41, %v1270_v49 }
 0x363   : > { %1559 = vadd.xlane.f32.xlu0 %v1558_v51 }
 0x364   : > { %v1274_v23 = vpop.f32.mrb[64].mxu0  ;;  %v1561_v29 = vsel %vm908_vm1, %v1472_v53, 0.0 }
 0x365   : > { %v1276_v31 = vpop.f32.mrb[65].mxu0  ;;  %v1562_v16 = vadd.f32 %v1561_v29, %v1471_v18  ;;  %v1473_v38 = vmul.f32 %v1409_v28, %v1274_v23  ;;  %v1414_v18 = vld [vmem:[%s7914_s4 + $0x108] sm:$0xff]  ;;  %v1413_v23 = vld [vmem:[%s7914_s4 + $0x100] sm:$0xff] }
 0x366   : > { %v1474_v33 = vmul.f32 %v1410_v21, %v1276_v31 }
 0x367   : > { %1563 = vadd.xlane.f32.xlu1 %v1562_v16 }
 0x368   : > { %v1280_v41 = vpop.f32.mrb[66].mxu0  ;;  %v1565_v48 = vsel %vm908_vm1, %v1474_v33, 0.0 }
 0x369   : > { %v1282_v19 = vpop.f32.mrb[67].mxu0  ;;  %v5964_v49 = vadd.f32 %v1565_v48, %v1473_v38  ;;  %v1475_v53 = vmul.f32 %v1411_v43, %v1280_v41  ;;  %v1416_v38 = vld [vmem:[%s7914_s4 + $0x118] sm:$0xff]  ;;  %v1415_v41 = vld [vmem:[%s7914_s4 + $0x110] sm:$0xff] }
 0x36a   : > { %v1476_v51 = vmul.f32 %v1412_v39, %v1282_v19 }
 0x36c   : > { %v1286_v21 = vpop.f32.mrb[68].mxu0  ;;  %v1569_v28 = vsel %vm908_vm1, %v1476_v51, 0.0 }
 0x36d   : > { %v1288_v29 = vpop.f32.mrb[69].mxu0  ;;  %v5973_v31 = vadd.f32 %v1569_v28, %v1475_v53  ;;  %v1477_v33 = vmul.f32 %v1413_v23, %v1286_v21  ;;  %v1418_v53 = vld [vmem:[%s7914_s4 + $0x128] sm:$0xff]  ;;  %v1417_v21 = vld [vmem:[%s7914_s4 + $0x120] sm:$0xff] }
 0x36e   : > { %v1478_v16 = vmul.f32 %v1414_v18, %v1288_v29 }
 0x370   : > { %v1292_v39 = vpop.f32.mrb[70].mxu0  ;;  %v1573_v43 = vsel %vm908_vm1, %v1478_v16, 0.0 }
 0x371   : > { %v1294_v48 = vpop.f32.mrb[71].mxu0  ;;  %v1574_v19 = vadd.f32 %v1573_v43, %v1477_v33  ;;  %v1479_v51 = vmul.f32 %v1415_v41, %v1292_v39  ;;  %v1420_v33 = vld [vmem:[%s7914_s4 + $0x138] sm:$0xff]  ;;  %v1419_v39 = vld [vmem:[%s7914_s4 + $0x130] sm:$0xff] }
 0x372   : > { %v1480_v9 = vmul.f32 %v1416_v38, %v1294_v48 }
 0x373   : > { %1575 = vadd.xlane.f32.xlu0 %v1574_v19 }
 0x374   : > { %v1298_v18 = vpop.f32.mrb[72].mxu0  ;;  %v1577_v23 = vsel %vm908_vm1, %v1480_v9, 0.0 }
 0x375   : > { %v1300_v28 = vpop.f32.mrb[73].mxu0  ;;  %v1578_v29 = vadd.f32 %v1577_v23, %v1479_v51  ;;  %v1481_v16 = vmul.f32 %v1417_v21, %v1298_v18  ;;  %v1422_v51 = vld [vmem:[%s7914_s4 + $0x148] sm:$0xff]  ;;  %v1421_v18 = vld [vmem:[%s7914_s4 + $0x140] sm:$0xff] }
 0x376   : > { %v1482_v12 = vmul.f32 %v1418_v53, %v1300_v28 }
 0x377   : > { %1579 = vadd.xlane.f32.xlu0 %v1578_v29 }
 0x378   : > { %v1304_v38 = vpop.f32.mrb[74].mxu0  ;;  %v1581_v41 = vsel %vm908_vm1, %v1482_v12, 0.0 }
 0x379   : > { %v1306_v43 = vpop.f32.mrb[75].mxu0  ;;  %v1582_v48 = vadd.f32 %v1581_v41, %v1481_v16  ;;  %v1483_v9 = vmul.f32 %v1419_v39, %v1304_v38  ;;  %v1424_v16 = vld [vmem:[%s7914_s4 + $0x158] sm:$0xff]  ;;  %v1423_v38 = vld [vmem:[%s7914_s4 + $0x150] sm:$0xff] }
 0x37a   : > { %v1484_v19 = vmul.f32 %v1420_v33, %v1306_v43 }
 0x37b   : > { %1583 = vadd.xlane.f32.xlu0 %v1582_v48 }
 0x37c   : > { %v1310_v53 = vpop.f32.mrb[76].mxu0  ;;  %v1585_v21 = vsel %vm908_vm1, %v1484_v19, 0.0 }
 0x37d   : > { %v1312_v23 = vpop.f32.mrb[77].mxu0  ;;  %v1586_v28 = vadd.f32 %v1585_v21, %v1483_v9  ;;  %v1485_v12 = vmul.f32 %v1421_v18, %v1310_v53  ;;  %v1426_v9 = vld [vmem:[%s7914_s4 + $0x168] sm:$0xff]  ;;  %v1425_v53 = vld [vmem:[%s7914_s4 + $0x160] sm:$0xff] }
 0x37e   : > { %v1486_v29 = vmul.f32 %v1422_v51, %v1312_v23 }
 0x37f   : > { %1587 = vadd.xlane.f32.xlu1 %v1586_v28 }
 0x380   : > { %v1316_v33 = vpop.f32.mrb[78].mxu0  ;;  %v1589_v39 = vsel %vm908_vm1, %v1486_v29, 0.0 }
 0x381   : > { %v1318_v41 = vpop.f32.mrb[79].mxu0  ;;  %v1590_v43 = vadd.f32 %v1589_v39, %v1485_v12  ;;  %v1487_v19 = vmul.f32 %v1423_v38, %v1316_v33  ;;  %v1428_v12 = vld [vmem:[%s7914_s4 + $0x178] sm:$0xff]  ;;  %v1427_v33 = vld [vmem:[%s7914_s4 + $0x170] sm:$0xff] }
 0x382   : > { %v1488_v48 = vmul.f32 %v1424_v16, %v1318_v41 }
 0x383   : > { %1591 = vadd.xlane.f32.xlu0 %v1590_v43 }
 0x384   : > { %v1322_v51 = vpop.f32.mrb[80].mxu0  ;;  %v1593_v18 = vsel %vm908_vm1, %v1488_v48, 0.0 }
 0x385   : > { %v1324_v21 = vpop.f32.mrb[81].mxu0  ;;  %v1594_v23 = vadd.f32 %v1593_v18, %v1487_v19  ;;  %v1489_v29 = vmul.f32 %v1425_v53, %v1322_v51  ;;  %v1430_v19 = vld [vmem:[%s7914_s4 + $0x188] sm:$0xff]  ;;  %v1429_v51 = vld [vmem:[%s7914_s4 + $0x180] sm:$0xff] }
 0x386   : > { %v1490_v28 = vmul.f32 %v1426_v9, %v1324_v21 }
 0x387   : > { %1595 = vadd.xlane.f32.xlu1 %v1594_v23 }
 0x388   : > { %v1328_v16 = vpop.f32.mrb[82].mxu0  ;;  %v1597_v38 = vsel %vm908_vm1, %v1490_v28, 0.0 }
 0x389   : > { %v1330_v39 = vpop.f32.mrb[83].mxu0  ;;  %v1598_v41 = vadd.f32 %v1597_v38, %v1489_v29  ;;  %v1491_v48 = vmul.f32 %v1427_v33, %v1328_v16  ;;  %v1432_v29 = vld [vmem:[%s7914_s4 + $0x198] sm:$0xff]  ;;  %v1431_v16 = vld [vmem:[%s7914_s4 + $0x190] sm:$0xff] }
 0x38a   : > { %v1492_v43 = vmul.f32 %v1428_v12, %v1330_v39 }
 0x38b   : > { %1599 = vadd.xlane.f32.xlu0 %v1598_v41 }
 0x38c   : > { %v1334_v9 = vpop.f32.mrb[84].mxu0  ;;  %v1601_v53 = vsel %vm908_vm1, %v1492_v43, 0.0 }
 0x38d   : > { %v1336_v18 = vpop.f32.mrb[85].mxu0  ;;  %v1602_v21 = vadd.f32 %v1601_v53, %v1491_v48  ;;  %v1493_v28 = vmul.f32 %v1429_v51, %v1334_v9  ;;  %v1434_v48 = vld [vmem:[%s7914_s4 + $0x1a8] sm:$0xff]  ;;  %v1433_v9 = vld [vmem:[%s7914_s4 + $0x1a0] sm:$0xff] }
 0x38e   : > { %v1494_v23 = vmul.f32 %v1430_v19, %v1336_v18 }
 0x38f   : > { %1603 = vadd.xlane.f32.xlu1 %v1602_v21 }
 0x390   : > { %v1340_v12 = vpop.f32.mrb[86].mxu0  ;;  %v1605_v33 = vsel %vm908_vm1, %v1494_v23, 0.0 }
 0x391   : > { %v1342_v38 = vpop.f32.mrb[87].mxu0  ;;  %v1606_v39 = vadd.f32 %v1605_v33, %v1493_v28  ;;  %v1495_v43 = vmul.f32 %v1431_v16, %v1340_v12  ;;  %v1436_v28 = vld [vmem:[%s7914_s4 + $0x1b8] sm:$0xff]  ;;  %v1435_v12 = vld [vmem:[%s7914_s4 + $0x1b0] sm:$0xff] }
 0x392   : > { %v1496_v41 = vmul.f32 %v1432_v29, %v1342_v38 }
 0x393   : > { %1607 = vadd.xlane.f32.xlu0 %v1606_v39 }
 0x394   : > { %v1346_v19 = vpop.f32.mrb[88].mxu0  ;;  %v1609_v51 = vsel %vm908_vm1, %v1496_v41, 0.0 }
 0x395   : > { %v1348_v53 = vpop.f32.mrb[89].mxu0  ;;  %v1610_v18 = vadd.f32 %v1609_v51, %v1495_v43  ;;  %v1497_v23 = vmul.f32 %v1433_v9, %v1346_v19  ;;  %v1438_v43 = vld [vmem:[%s7914_s4 + $0x1c8] sm:$0xff]  ;;  %v1437_v19 = vld [vmem:[%s7914_s4 + $0x1c0] sm:$0xff] }
 0x396   : > { %v1498_v21 = vmul.f32 %v1434_v48, %v1348_v53 }
 0x397   : > { %1611 = vadd.xlane.f32.xlu1 %v1610_v18 }
 0x398   : > { %v1352_v29 = vpop.f32.mrb[90].mxu0  ;;  %v1613_v16 = vsel %vm908_vm1, %v1498_v21, 0.0 }
 0x399   : > { %v1354_v33 = vpop.f32.mrb[91].mxu0  ;;  %v1614_v38 = vadd.f32 %v1613_v16, %v1497_v23  ;;  %v1499_v41 = vmul.f32 %v1435_v12, %v1352_v29  ;;  %v1440_v23 = vld [vmem:[%s7914_s4 + $0x1d8] sm:$0xff]  ;;  %v1439_v29 = vld [vmem:[%s7914_s4 + $0x1d0] sm:$0xff] }
 0x39a   : > { %v1500_v39 = vmul.f32 %v1436_v28, %v1354_v33 }
 0x39b   : > { %1615 = vadd.xlane.f32.xlu0 %v1614_v38 }
 0x39c   : > { %v1358_v48 = vpop.f32.mrb[92].mxu0  ;;  %v1617_v9 = vsel %vm908_vm1, %v1500_v39, 0.0 }
 0x39d   : > { %v1360_v51 = vpop.f32.mrb[93].mxu0  ;;  %v1618_v53 = vadd.f32 %v1617_v9, %v1499_v41  ;;  %v1501_v21 = vmul.f32 %v1437_v19, %v1358_v48  ;;  %v1442_v41 = vld [vmem:[%s7914_s4 + $0x1e8] sm:$0xff]  ;;  %v1441_v48 = vld [vmem:[%s7914_s4 + $0x1e0] sm:$0xff] }
 0x39e   : > { %v1502_v18 = vmul.f32 %v1438_v43, %v1360_v51 }
 0x39f   : > { %1619 = vadd.xlane.f32.xlu1 %v1618_v53 }
 0x3a0   : > { %v1364_v28 = vpop.f32.mrb[94].mxu0  ;;  %v1621_v12 = vsel %vm908_vm1, %v1502_v18, 0.0 }
 0x3a1   : > { %v1366_v16 = vpop.f32.mrb[95].mxu0  ;;  %v1622_v33 = vadd.f32 %v1621_v12, %v1501_v21  ;;  %v1503_v39 = vmul.f32 %v1439_v29, %v1364_v28  ;;  %v1444_v21 = vld [vmem:[%s7914_s4 + $0x1f8] sm:$0xff]  ;;  %v1443_v28 = vld [vmem:[%s7914_s4 + $0x1f0] sm:$0xff] }
 0x3a2   : > { %v1504_v38 = vmul.f32 %v1440_v23, %v1366_v16 }
 0x3a3   : > { %1623 = vadd.xlane.f32.xlu0 %v1622_v33 }
 0x3a4   : > { %v1370_v43 = vpop.f32.mrb[96].mxu0  ;;  %v1625_v19 = vsel %vm908_vm1, %v1504_v38, 0.0 }
 0x3a5   : > { %v1372_v9 = vpop.f32.mrb[97].mxu0  ;;  %v1626_v51 = vadd.f32 %v1625_v19, %v1503_v39  ;;  %v1505_v18 = vmul.f32 %v1441_v48, %v1370_v43  ;;  %v1638_v43 = vld [vmem:[%s7915_s5 + $0x8] sm:$0xff] }
 0x3a6   : > { %v1506_v53 = vmul.f32 %v1442_v41, %v1372_v9  ;;  %1733 = vmatprep.mubr.f32.mxu1 %v1638_v43 }
 0x3a7   : > { %1627 = vadd.xlane.f32.xlu1 %v1626_v51 }
 0x3a8   : > { %v1376_v23 = vpop.f32.mrb[98].mxu0  ;;  %v1629_v29 = vsel %vm908_vm1, %v1506_v53, 0.0 }
 0x3a9   : > { %v1378_v12 = vpop.f32.mrb[99].mxu0  ;;  %v1630_v16 = vadd.f32 %v1629_v29, %v1505_v18  ;;  %v1507_v38 = vmul.f32 %v1443_v28, %v1376_v23 }
 0x3aa   : > { %v1508_v33 = vmul.f32 %v1444_v21, %v1378_v12 }
 0x3ab   : > { %1631 = vadd.xlane.f32.xlu0 %v1630_v16 }
 0x3ac   : > { %v1633_v39 = vsel %vm908_vm1, %v1508_v33, 0.0 }
 0x3ad   : > { %v1634_v41 = vadd.f32 %v1633_v39, %v1507_v38 }
 0x3af   : > { %1567 = vadd.xlane.f32.xlu0 %v5964_v49  ;;  %1635 = vadd.xlane.f32.xlu1 %v1634_v41 }
 0x3b3   : > { %1571 = vadd.xlane.f32.xlu1 %v5973_v31 }
 0x3c0   : > { %v1512_v19 = vpop.xlane.xlu1 %1511 }
 0x3c4   : > { %v1516_v51 = vpop.xlane.xlu1 %1515 }
 0x3c5   : > { %v5044_v39 = vpack.c.bf16 %v1516_v51, %v1512_v19 }
 0x3c8   : > { %v1520_v48 = vpop.xlane.xlu0 %1519 }
 0x3cc   : > { %v1524_v18 = vpop.xlane.xlu1 %1523 }
 0x3cd   : > { %v5048_v56 = vpack.c.bf16 %v1524_v18, %v1520_v48 }
 0x3d0   : > { %v1528_v9 = vpop.xlane.xlu0 %1527 }
 0x3d4   : > { %v1532_v23 = vpop.xlane.xlu1 %1531 }
 0x3d5   : > { %v5052_v47 = vpack.c.bf16 %v1532_v23, %v1528_v9  ;;  %v1640_v23 = vld [vmem:[%s7915_s5 + $0x18] sm:$0xff] }
 0x3d8   : > { %v1536_v53 = vpop.xlane.xlu0 %1535 }
 0x3dc   : > { %v1540_v29 = vpop.xlane.xlu1 %1539 }
 0x3e0   : > { %v1544_v21 = vpop.xlane.xlu0 %1543 }
 0x3e4   : > { %v1548_v49 = vpop.xlane.xlu1 %1547 }
 0x3e8   : > { %v1552_v28 = vpop.xlane.xlu0 %1551 }
 0x3ec   : > { %v1556_v33 = vpop.xlane.xlu1 %1555 }
 0x3ed   : > { %v5064_v48 = vpack.c.bf16 %v1556_v33, %v1552_v28  ;;  %v1639_v28 = vld [vmem:[%s7915_s5 + $0x10] sm:$0xff]  ;;  %v1657_v33 = vld [vmem:[%s7915_s5 + $0xa0] sm:$0xff] }
 0x3f0   : > { %v1560_v12 = vpop.xlane.xlu0 %1559 }
 0x3f4   : > { %v1564_v41 = vpop.xlane.xlu1 %1563 }
 0x400   : > { %v1576_v16 = vpop.xlane.xlu0 %1575 }
 0x404   : > { %v1580_v31 = vpop.xlane.xlu0 %1579 }
 0x405   : > { %v5042_v38 = vpack.c.bf16 %v1580_v31, %v1576_v16  ;;  %v5056_v16 = vpack.c.bf16 %v1540_v29, %v1536_v53  ;;  %v1656_v29 = vld [vmem:[%s7915_s5 + $0x98] sm:$0xff] }
 0x407   : > { %5043 = vmatprep.subr.bf16.mxu1 %v5042_v38  ;;  %v5060_v38 = vpack.c.bf16 %v1548_v49, %v1544_v21  ;;  %v1637_v21 = vld [vmem:[%s7915_s5] sm:$0xff]  ;;  %v1658_v49 = vld [vmem:[%s7915_s5 + $0xa8] sm:$0xff] }
 0x408   : > { %5045 = vmatpush3.bf16.msra.mxu1 %v5044_v39  ;;  %v1584_v43 = vpop.xlane.xlu0 %1583  ;;  %v1660_v39 = vld [vmem:[%s7915_s5 + $0xb8] sm:$0xff] }
 0x40c   : > { %v1588_v1 = vpop.xlane.xlu1 %1587 }
 0x40d   : > { %v5046_v5 = vpack.c.bf16 %v1588_v1, %v1584_v43  ;;  %v1662_v43 = vld [vmem:[%s7915_s5 + $0xc8] sm:$0xff] }
 0x40f   : > { %5047 = vmatprep.subr.bf16.mxu1 %v5046_v5 }
 0x410   : > { %5049 = vmatpush3.bf16.msra.mxu1 %v5048_v56  ;;  %v1592_v11 = vpop.xlane.xlu0 %1591 }
 0x414   : > { %v1596_v2 = vpop.xlane.xlu1 %1595 }
 0x415   : > { %v5050_v45 = vpack.c.bf16 %v1596_v2, %v1592_v11  ;;  %v5068_v11 = vpack.c.bf16 %v1564_v41, %v1560_v12  ;;  %v1655_v12 = vld [vmem:[%s7915_s5 + $0x90] sm:$0xff] }
 0x416   : > { %v1659_v41 = vld [vmem:[%s7915_s5 + $0xb0] sm:$0xff] }
 0x417   : > { %5051 = vmatprep.subr.bf16.mxu1 %v5050_v45 }
 0x418   : > { %5053 = vmatpush3.bf16.msra.mxu1 %v5052_v47  ;;  %v1600_v35 = vpop.xlane.xlu0 %1599 }
 0x41c   : > { %v1604_v37 = vpop.xlane.xlu1 %1603 }
 0x41d   : > { %v5054_v25 = vpack.c.bf16 %v1604_v37, %v1600_v35 }
 0x41f   : > { %5055 = vmatprep.subr.bf16.mxu1 %v5054_v25 }
 0x420   : > { %5057 = vmatpush3.bf16.msra.mxu1 %v5056_v16  ;;  %v1608_v19 = vpop.xlane.xlu0 %1607  ;;  %v1661_v16 = vld [vmem:[%s7915_s5 + $0xc0] sm:$0xff] }
 0x424   : > { %v1612_v51 = vpop.xlane.xlu1 %1611 }
 0x425   : > { %v5058_v31 = vpack.c.bf16 %v1612_v51, %v1608_v19  ;;  %v1664_v19 = vld [vmem:[%s7915_s5 + $0xd8] sm:$0xff]  ;;  %v1663_v51 = vld [vmem:[%s7915_s5 + $0xd0] sm:$0xff] }
 0x427   : > { %5059 = vmatprep.subr.bf16.mxu1 %v5058_v31  ;;  %v1666_v31 = vld [vmem:[%s7915_s5 + $0xe8] sm:$0xff] }
 0x428   : > { %5061 = vmatpush3.bf16.msra.mxu1 %v5060_v38  ;;  %v1616_v1 = vpop.xlane.xlu0 %1615  ;;  %v1665_v38 = vld [vmem:[%s7915_s5 + $0xe0] sm:$0xff] }
 0x42c   : > { %v1620_v5 = vpop.xlane.xlu1 %1619 }
 0x42d   : > { %v5062_v56 = vpack.c.bf16 %v1620_v5, %v1616_v1  ;;  %v1668_v1 = vld [vmem:[%s7915_s5 + $0xf8] sm:$0xff]  ;;  %v1667_v5 = vld [vmem:[%s7915_s5 + $0xf0] sm:$0xff] }
 0x42f   : > { %5063 = vmatprep.subr.bf16.mxu1 %v5062_v56  ;;  %v5296_v56 = vld [vmem:[%s7911_s1] sm:$0xff]  }
 0x430   : > { %5065 = vmatpush3.bf16.msra.mxu1 %v5064_v48  ;;  %v1624_v2 = vpop.xlane.xlu0 %1623  ;;  %v7940_v48 = vmov 0  }
 0x434   : > { %v1628_v45 = vpop.xlane.xlu1 %1627 }
 0x435   : > { %v5066_v47 = vpack.c.bf16 %v1628_v45, %v1624_v2  ;;  %v5297_v2 = vld [vmem:[%s7911_s1 + $0x8] sm:$0xff]   ;;  %v5298_v45 = vld [vmem:[%s7911_s1 + $0x10] sm:$0xff]  }
 0x437   : > { %5067 = vmatprep.subr.bf16.mxu1 %v5066_v47  ;;  %v5299_v47 = vld [vmem:[%s7911_s1 + $0x18] sm:$0xff]  }
 0x438   : > { %5069 = vmatpush3.bf16.msra.mxu1 %v5068_v11  ;;  %v1632_v25 = vpop.xlane.xlu0 %1631  ;;  %v5300_v11 = vld [vmem:[%s7911_s1 + $0x20] sm:$0xff]  }
 0x43c   : > { %v1636_v35 = vpop.xlane.xlu1 %1635  ;;  %v1568_v9 = vpop.xlane.xlu0 %1567 }
 0x43d   : > { %v5070_v37 = vpack.c.bf16 %v1636_v35, %v1632_v25  ;;  %v5301_v25 = vld [vmem:[%s7911_s1 + $0x28] sm:$0xff]   ;;  %v5302_v35 = vld [vmem:[%s7911_s1 + $0x30] sm:$0xff]  }
 0x43f   : > { %5071 = vmatprep.subr.bf16.mxu1 %v5070_v37  ;;  %v5303_v37 = vld [vmem:[%s7911_s1 + $0x38] sm:$0xff]  }
 0x440   : > { %v1572_v53 = vpop.xlane.xlu1 %1571 }
 0x441   : > { %v5072_v18 = vpack.c.bf16 %v1572_v53, %v1568_v9  ;;  %v5304_v9 = vld [vmem:[%s7911_s1 + $0x40] sm:$0xff]   ;;  %v5305_v53 = vld [vmem:[%s7911_s1 + $0x48] sm:$0xff]  }
 0x443   : > { %5073 = vmatpush3.bf16.msra.mxu1 %v5072_v18  ;;  %v5306_v18 = vld [vmem:[%s7911_s1 + $0x50] sm:$0xff]  }
 0x444   : > { %1970 = vmatprep.subr.bf16.mxu1 %v563_v4  ;;  %v7937_v4 = vpack.c.bf16 %v5712_v34, %v5701_v30  ;;  %v1648_v30 = vld [vmem:[%s7915_s5 + $0x58] sm:$0xff]  ;;  %v1650_v34 = vld [vmem:[%s7915_s5 + $0x68] sm:$0xff] }
 0x446   : > { %1734 = vmatmul.mubr.f32.vlgmr.msra.gmra.mrb[68].mxu1 %v1637_v21  ;;  %v5307_v21 = vld [vmem:[%s7911_s1 + $0x58] sm:$0xff]  }
 0x447   : > { %1971 = vmatpush1.bf16.msra.mxu1 %v562_v60  ;;  %1738 = vmatprep.mubr.f32.mxu1 %v1640_v23  ;;  %v1644_v60 = vld [vmem:[%s7915_s5 + $0x38] sm:$0xff]  ;;  %v5308_v23 = vld [vmem:[%s7911_s1 + $0x60] sm:$0xff]  }
 0x448   : > { %1972 = vmatprep.subr.bf16.mxu1 %v565_v27  ;;  %v1645_v27 = vld [vmem:[%s7915_s5 + $0x40] sm:$0xff] }
 0x44a   : > { %1739 = vmatmul.mubr.f32.gmra.mrb[70].mxu1 %v1639_v28  ;;  %v5309_v28 = vld [vmem:[%s7911_s1 + $0x68] sm:$0xff]  }
 0x44b   : > { %1973 = vmatpush1.bf16.msra.mxu1 %v7935_v61  ;;  %1743 = vmatprep.mubr.f32.mxu1 %v1642_v57 }
 0x44c   : > { %1974 = vmatprep.subr.bf16.mxu1 %v7936_v59 }
 0x44e   : > { %1744 = vmatmul.mubr.f32.gmra.mrb[72].mxu1 %v1641_v55 }
 0x44f   : > { %1975 = vmatpush1.bf16.msra.mxu1 %v7937_v4  ;;  %1748 = vmatprep.mubr.f32.mxu1 %v1644_v60 }
 0x450   : > { %1976 = vmatprep.subr.bf16.mxu1 %v7938_v22 }
 0x452   : > { %1749 = vmatmul.mubr.f32.gmra.mrb[74].mxu1 %v1643_v20 }
 0x453   : > { %1977 = vmatpush1.bf16.msra.mxu1 %v7939_v26  ;;  %1753 = vmatprep.mubr.f32.mxu1 %v1646_v24 }
 0x456   : > { %1754 = vmatmul.mubr.f32.gmra.mrb[76].mxu1 %v1645_v27 }
 0x457   : > { %1758 = vmatprep.mubr.f32.mxu1 %v1648_v30 }
 0x45a   : > { %1759 = vmatmul.mubr.f32.gmra.mrb[78].mxu1 %v1647_v32 }
 0x45b   : > { %1763 = vmatprep.mubr.f32.mxu1 %v1650_v34 }
 0x45e   : > { %1764 = vmatmul.mubr.f32.gmra.mrb[80].mxu1 %v1649_v36 }
 0x45f   : > { %1768 = vmatprep.mubr.f32.mxu1 %v1652_v40 }
 0x462   : > { %1769 = vmatmul.mubr.f32.gmra.mrb[82].mxu1 %v1651_v42 }
 0x463   : > { %1773 = vmatprep.mubr.f32.mxu1 %v1654_v44 }
 0x466   : > { %1774 = vmatmul.mubr.f32.gmra.mrb[84].mxu1 %v1653_v46 }
 0x467   : > { %1778 = vmatprep.mubr.f32.mxu1 %v1656_v29 }
 0x46a   : > { %1779 = vmatmul.mubr.f32.gmra.mrb[86].mxu1 %v1655_v12 }
 0x46b   : > { %1783 = vmatprep.mubr.f32.mxu1 %v1658_v49 }
 0x46e   : > { %1784 = vmatmul.mubr.f32.gmra.mrb[88].mxu1 %v1657_v33 }
 0x46f   : > { %1788 = vmatprep.mubr.f32.mxu1 %v1660_v39 }
 0x472   : > { %1789 = vmatmul.mubr.f32.gmra.mrb[90].mxu1 %v1659_v41 }
 0x473   : > { %1793 = vmatprep.mubr.f32.mxu1 %v1662_v43 }
 0x476   : > { %1794 = vmatmul.mubr.f32.gmra.mrb[92].mxu1 %v1661_v16 }
 0x477   : > { %1798 = vmatprep.mubr.f32.mxu1 %v1664_v19 }
 0x47a   : > { %1799 = vmatmul.mubr.f32.gmra.mrb[94].mxu1 %v1663_v51 }
 0x47b   : > { %1803 = vmatprep.mubr.f32.mxu1 %v1666_v31 }
 0x47e   : > { %1804 = vmatmul.mubr.f32.gmra.mrb[96].mxu1 %v1665_v38 }
 0x47f   : > { %1808 = vmatprep.mubr.f32.mxu1 %v1668_v1 }
 0x482   : > { %1809 = vmatmul.mubr.f32.gmra.mrb[98].mxu1 %v1667_v5 }
 0x483   : > { %2002 = vmatprep.mubr.bf16.mxu1 %v7940_v48 }
 0x486   : > { %4573 = vmatmul.mubr.msk.bf16.vlgmr.msra.gmra.mrb[100].mxu1 %vm364_vm0, %v5296_v56 }
 0x487   : > { %2012 = vmatprep.mubr.bf16.mxu1 %v7940_v48 }
 0x48e   : > { %4574 = vmatmul.mubr.msk.bf16.gmra.mrb[104].mxu1 %vm364_vm0, %v5297_v2 }
 0x48f   : > { %2022 = vmatprep.mubr.bf16.mxu1 %v7940_v48 }
 0x496   : > { %4575 = vmatmul.mubr.msk.bf16.gmra.mrb[108].mxu1 %vm364_vm0, %v5298_v45 }
 0x497   : > { %2032 = vmatprep.mubr.bf16.mxu1 %v7940_v48 }
 0x49e   : > { %4576 = vmatmul.mubr.msk.bf16.gmra.mrb[112].mxu1 %vm364_vm0, %v5299_v47 }
 0x49f   : > { %2042 = vmatprep.mubr.bf16.mxu1 %v7940_v48 }
 0x4a6   : > { %4577 = vmatmul.mubr.msk.bf16.gmra.mrb[116].mxu1 %vm364_vm0, %v5300_v11  ;;  %v2201_v11 = vld [vmem:[%s7913_s3 + $0x8] sm:$0xff] }
 0x4a7   : > { %2052 = vmatprep.mubr.bf16.mxu1 %v7940_v48  ;;  %4587 = vmatprep.mubr.msk.f32.mxu0 %vm908_vm1, %v2201_v11 }
 0x4ae   : > { %4578 = vmatmul.mubr.msk.bf16.gmra.mrb[120].mxu1 %vm364_vm0, %v5301_v25 }
 0x4af   : > { %2062 = vmatprep.mubr.bf16.mxu1 %v7940_v48 }
 0x4b6   : > { %4579 = vmatmul.mubr.msk.bf16.gmra.mrb[124].mxu1 %vm364_vm0, %v5302_v35 }
 0x4b7   : > { %2072 = vmatprep.mubr.bf16.mxu1 %v7940_v48 }
 0x4be   : > { %4580 = vmatmul.mubr.msk.bf16.gmra.mrb[128].mxu1 %vm364_vm0, %v5303_v37 }
 0x4bf   : > { %2082 = vmatprep.mubr.bf16.mxu1 %v7940_v48 }
 0x4c6   : > { %4581 = vmatmul.mubr.msk.bf16.gmra.mrb[132].mxu1 %vm364_vm0, %v5304_v9 }
 0x4c7   : > { %2092 = vmatprep.mubr.bf16.mxu1 %v7940_v48 }
 0x4ce   : > { %4582 = vmatmul.mubr.msk.bf16.gmra.mrb[136].mxu1 %vm364_vm0, %v5305_v53 }
 0x4cf   : > { %2102 = vmatprep.mubr.bf16.mxu1 %v7940_v48 }
 0x4d6   : > { %4583 = vmatmul.mubr.msk.bf16.gmra.mrb[140].mxu1 %vm364_vm0, %v5306_v18 }
 0x4d7   : > { %2112 = vmatprep.mubr.bf16.mxu1 %v7940_v48 }
 0x4de   : > { %4584 = vmatmul.mubr.msk.bf16.gmra.mrb[144].mxu1 %vm364_vm0, %v5307_v21 }
 0x4df   : > { %2122 = vmatprep.mubr.bf16.mxu1 %v7940_v48 }
 0x4e6   : > { %4585 = vmatmul.mubr.msk.bf16.gmra.mrb[148].mxu1 %vm364_vm0, %v5308_v23 }
 0x4e7   : > { %2132 = vmatprep.mubr.bf16.mxu1 %v7940_v48 }
 0x4ee   : > { %4586 = vmatmul.mubr.msk.bf16.gmra.mrb[152].mxu1 %vm364_vm0, %v5309_v28 }
 0x519   : > { %v4778_v57 = vpop.f32.mrb[68].mxu1 }
 0x51a   : > { %v4779_v61 = vpop.f32.mrb[69].mxu1 }
 0x51b   : > { %v6273_v55 = vadd.f32 %v4779_v61, %v4778_v57 }
 0x51d   : > { %7941 = vst [vmem:[#allocation3_spill] sm:$0xff] %v6273_v55  ;;  %v4781_v59 = vpop.f32.mrb[70].mxu1 }
 0x51e   : > { %v4782_v60 = vpop.f32.mrb[71].mxu1 }
 0x51f   : > { %v6275_v4 = vadd.f32 %v4782_v60, %v4781_v59 }
 0x521   : > { %7942 = vst [vmem:[#allocation4_spill] sm:$0xff] %v6275_v4  ;;  %v4784_v20 = vpop.f32.mrb[72].mxu1 }
 0x522   : > { %v4785_v22 = vpop.f32.mrb[73].mxu1 }
 0x523   : > { %v6277_v24 = vadd.f32 %v4785_v22, %v4784_v20 }
 0x525   : > { %7943 = vst [vmem:[#allocation5_spill] sm:$0xff] %v6277_v24  ;;  %v4787_v26 = vpop.f32.mrb[74].mxu1 }
 0x526   : > { %v4788_v27 = vpop.f32.mrb[75].mxu1 }
 0x527   : > { %v6279_v30 = vadd.f32 %v4788_v27, %v4787_v26 }
 0x529   : > { %7944 = vst [vmem:[#allocation6_spill] sm:$0xff] %v6279_v30  ;;  %v4790_v32 = vpop.f32.mrb[76].mxu1 }
 0x52a   : > { %v4791_v34 = vpop.f32.mrb[77].mxu1 }
 0x52b   : > { %v6281_v36 = vadd.f32 %v4791_v34, %v4790_v32 }
 0x52d   : > { %7945 = vst [vmem:[#allocation7_spill] sm:$0xff] %v6281_v36  ;;  %v4793_v40 = vpop.f32.mrb[78].mxu1 }
 0x52e   : > { %v4794_v42 = vpop.f32.mrb[79].mxu1 }
 0x52f   : > { %v6283_v44 = vadd.f32 %v4794_v42, %v4793_v40 }
 0x531   : > { %7946 = vst [vmem:[#allocation8_spill] sm:$0xff] %v6283_v44  ;;  %v4796_v46 = vpop.f32.mrb[80].mxu1 }
 0x532   : > { %v4797_v29 = vpop.f32.mrb[81].mxu1 }
 0x533   : > { %v6285_v12 = vadd.f32 %v4797_v29, %v4796_v46 }
 0x535   : > { %7947 = vst [vmem:[#allocation9_spill] sm:$0xff] %v6285_v12  ;;  %v4799_v49 = vpop.f32.mrb[82].mxu1 }
 0x536   : > { %v4800_v33 = vpop.f32.mrb[83].mxu1 }
 0x537   : > { %v6287_v39 = vadd.f32 %v4800_v33, %v4799_v49 }
 0x539   : > { %7948 = vst [vmem:[#allocation10_spill] sm:$0xff] %v6287_v39  ;;  %v4802_v41 = vpop.f32.mrb[84].mxu1 }
 0x53a   : > { %v4803_v43 = vpop.f32.mrb[85].mxu1 }
 0x53b   : > { %v6289_v16 = vadd.f32 %v4803_v43, %v4802_v41 }
 0x53d   : > { %7949 = vst [vmem:[#allocation11_spill] sm:$0xff] %v6289_v16  ;;  %v4805_v19 = vpop.f32.mrb[86].mxu1 }
 0x53e   : > { %v4806_v51 = vpop.f32.mrb[87].mxu1 }
 0x53f   : > { %v6291_v31 = vadd.f32 %v4806_v51, %v4805_v19 }
 0x541   : > { %7950 = vst [vmem:[#allocation12_spill] sm:$0xff] %v6291_v31  ;;  %v4808_v38 = vpop.f32.mrb[88].mxu1 }
 0x542   : > { %v4809_v1 = vpop.f32.mrb[89].mxu1 }
 0x543   : > { %v6293_v5 = vadd.f32 %v4809_v1, %v4808_v38 }
 0x545   : > { %7951 = vst [vmem:[#allocation13_spill] sm:$0xff] %v6293_v5  ;;  %v4811_v56 = vpop.f32.mrb[90].mxu1 }
 0x546   : > { %v4812_v2 = vpop.f32.mrb[91].mxu1 }
 0x547   : > { %v6295_v45 = vadd.f32 %v4812_v2, %v4811_v56 }
 0x549   : > { %7952 = vst [vmem:[#allocation14_spill] sm:$0xff] %v6295_v45  ;;  %v4814_v47 = vpop.f32.mrb[92].mxu1 }
 0x54a   : > { %v4815_v25 = vpop.f32.mrb[93].mxu1 }
 0x54b   : > { %v6301_v35 = vadd.f32 %v4815_v25, %v4814_v47 }
 0x54d   : > { %7953 = vst [vmem:[#allocation15_spill] sm:$0xff] %v6301_v35  ;;  %v4817_v37 = vpop.f32.mrb[94].mxu1 }
 0x54e   : > { %v4818_v9 = vpop.f32.mrb[95].mxu1 }
 0x54f   : > { %v6303_v53 = vadd.f32 %v4818_v9, %v4817_v37 }
 0x551   : > { %7954 = vst [vmem:[#allocation16_spill] sm:$0xff] %v6303_v53  ;;  %v4820_v18 = vpop.f32.mrb[96].mxu1 }
 0x552   : > { %v4821_v21 = vpop.f32.mrb[97].mxu1 }
 0x553   : > { %v6305_v23 = vadd.f32 %v4821_v21, %v4820_v18 }
 0x555   : > { %7955 = vst [vmem:[#allocation17_spill] sm:$0xff] %v6305_v23  ;;  %v4823_v28 = vpop.f32.mrb[98].mxu1 }
 0x556   : > { %v4824_v57 = vpop.f32.mrb[99].mxu1 }
 0x557   : > { %v6307_v61 = vadd.f32 %v4824_v57, %v4823_v28 }
 0x559   : > { %7956 = vst [vmem:[#allocation18_spill] sm:$0xff] %v6307_v61  ;;  %v2004_v59 = vpop.f32.mrb[100].mxu1 }
 0x55a   : > { %v2006_v60 = vpop.f32.mrb[101].mxu1 }
 0x55b   : > { %v2008_v20 = vpop.f32.mrb[102].mxu1 }
 0x55c   : > { %v5076_v22 = vpack.c.bf16 %v2008_v20, %v2004_v59  ;;  %v2010_v26 = vpop.f32.mrb[103].mxu1 }
 0x55d   : > { %v5074_v27 = vpack.c.bf16 %v2010_v26, %v2006_v60 }
 0x55f   : > { %5075 = vmatprep.subr.bf16.mxu0 %v5074_v27 }
 0x560   : > { %5077 = vmatpush1.bf16.msra.mxu0 %v5076_v22 }
 0x561   : > { %v2014_v32 = vpop.f32.mrb[104].mxu1 }
 0x562   : > { %v2016_v34 = vpop.f32.mrb[105].mxu1 }
 0x563   : > { %v2018_v40 = vpop.f32.mrb[106].mxu1 }
 0x564   : > { %v5080_v42 = vpack.c.bf16 %v2018_v40, %v2014_v32  ;;  %v2020_v46 = vpop.f32.mrb[107].mxu1 }
 0x565   : > { %v5078_v29 = vpack.c.bf16 %v2020_v46, %v2016_v34 }
 0x567   : > { %5079 = vmatprep.subr.bf16.mxu0 %v5078_v29 }
 0x568   : > { %5081 = vmatpush1.bf16.msra.mxu0 %v5080_v42 }
 0x569   : > { %v2024_v49 = vpop.f32.mrb[108].mxu1 }
 0x56a   : > { %v2026_v33 = vpop.f32.mrb[109].mxu1 }
 0x56b   : > { %v2028_v41 = vpop.f32.mrb[110].mxu1 }
 0x56c   : > { %v5084_v43 = vpack.c.bf16 %v2028_v41, %v2024_v49  ;;  %v2030_v19 = vpop.f32.mrb[111].mxu1 }
 0x56d   : > { %v5082_v51 = vpack.c.bf16 %v2030_v19, %v2026_v33 }
 0x56f   : > { %5083 = vmatprep.subr.bf16.mxu0 %v5082_v51 }
 0x570   : > { %5085 = vmatpush1.bf16.msra.mxu0 %v5084_v43 }
 0x571   : > { %v2034_v38 = vpop.f32.mrb[112].mxu1 }
 0x572   : > { %v2036_v1 = vpop.f32.mrb[113].mxu1 }
 0x573   : > { %v2038_v56 = vpop.f32.mrb[114].mxu1 }
 0x574   : > { %v5088_v2 = vpack.c.bf16 %v2038_v56, %v2034_v38  ;;  %v2040_v47 = vpop.f32.mrb[115].mxu1 }
 0x575   : > { %v5086_v11 = vpack.c.bf16 %v2040_v47, %v2036_v1 }
 0x577   : > { %5087 = vmatprep.subr.bf16.mxu0 %v5086_v11 }
 0x578   : > { %5089 = vmatpush1.bf16.msra.mxu0 %v5088_v2 }
 0x579   : > { %v2044_v25 = vpop.f32.mrb[116].mxu1 }
 0x57a   : > { %v2046_v37 = vpop.f32.mrb[117].mxu1 }
 0x57b   : > { %v2048_v9 = vpop.f32.mrb[118].mxu1 }
 0x57c   : > { %v5092_v18 = vpack.c.bf16 %v2048_v9, %v2044_v25  ;;  %v2050_v21 = vpop.f32.mrb[119].mxu1 }
 0x57d   : > { %v5090_v28 = vpack.c.bf16 %v2050_v21, %v2046_v37 }
 0x57f   : > { %5091 = vmatprep.subr.bf16.mxu0 %v5090_v28 }
 0x580   : > { %5093 = vmatpush1.bf16.msra.mxu0 %v5092_v18 }
 0x581   : > { %v2054_v57 = vpop.f32.mrb[120].mxu1 }
 0x582   : > { %v2056_v59 = vpop.f32.mrb[121].mxu1 }
 0x583   : > { %v2058_v60 = vpop.f32.mrb[122].mxu1 }
 0x584   : > { %v5096_v20 = vpack.c.bf16 %v2058_v60, %v2054_v57  ;;  %v2060_v22 = vpop.f32.mrb[123].mxu1 }
 0x585   : > { %v5094_v26 = vpack.c.bf16 %v2060_v22, %v2056_v59 }
 0x587   : > { %5095 = vmatprep.subr.bf16.mxu0 %v5094_v26 }
 0x588   : > { %5097 = vmatpush1.bf16.msra.mxu0 %v5096_v20 }
 0x589   : > { %v2064_v27 = vpop.f32.mrb[124].mxu1 }
 0x58a   : > { %v2066_v32 = vpop.f32.mrb[125].mxu1 }
 0x58b   : > { %v2068_v34 = vpop.f32.mrb[126].mxu1 }
 0x58c   : > { %v5100_v40 = vpack.c.bf16 %v2068_v34, %v2064_v27  ;;  %v2070_v42 = vpop.f32.mrb[127].mxu1 }
 0x58d   : > { %v5098_v46 = vpack.c.bf16 %v2070_v42, %v2066_v32 }
 0x58f   : > { %5099 = vmatprep.subr.bf16.mxu0 %v5098_v46 }
 0x590   : > { %5101 = vmatpush1.bf16.msra.mxu0 %v5100_v40 }
 0x591   : > { %v2074_v29 = vpop.f32.mrb[128].mxu1 }
 0x592   : > { %v2076_v49 = vpop.f32.mrb[129].mxu1 }
 0x593   : > { %v2078_v33 = vpop.f32.mrb[130].mxu1 }
 0x594   : > { %v5104_v41 = vpack.c.bf16 %v2078_v33, %v2074_v29  ;;  %v2080_v43 = vpop.f32.mrb[131].mxu1 }
 0x595   : > { %v5102_v19 = vpack.c.bf16 %v2080_v43, %v2076_v49 }
 0x597   : > { %5103 = vmatprep.subr.bf16.mxu0 %v5102_v19 }
 0x598   : > { %5105 = vmatpush1.bf16.msra.mxu0 %v5104_v41 }
 0x599   : > { %v2084_v51 = vpop.f32.mrb[132].mxu1 }
 0x59a   : > { %v2086_v38 = vpop.f32.mrb[133].mxu1 }
 0x59b   : > { %v2088_v1 = vpop.f32.mrb[134].mxu1 }
 0x59c   : > { %v5108_v56 = vpack.c.bf16 %v2088_v1, %v2084_v51  ;;  %v2090_v2 = vpop.f32.mrb[135].mxu1 }
 0x59d   : > { %v5106_v47 = vpack.c.bf16 %v2090_v2, %v2086_v38 }
 0x59f   : > { %5107 = vmatprep.subr.bf16.mxu0 %v5106_v47  ;;  %v2200_v47 = vld [vmem:[%s7913_s3] sm:$0xff] }
 0x5a0   : > { %5109 = vmatpush1.bf16.msra.mxu0 %v5108_v56 }
 0x5a1   : > { %v2094_v11 = vpop.f32.mrb[136].mxu1 }
 0x5a2   : > { %v2096_v25 = vpop.f32.mrb[137].mxu1 }
 0x5a3   : > { %v2098_v37 = vpop.f32.mrb[138].mxu1 }
 0x5a4   : > { %v5112_v9 = vpack.c.bf16 %v2098_v37, %v2094_v11  ;;  %v2100_v18 = vpop.f32.mrb[139].mxu1  ;;  %v7957_v11 = vpack.c.bf16 %v5768_v58, %v5759_v52  ;;  %v7958_v37 = vpack.c.bf16 %v5764_v54, %v5753_v50  ;;  %v2205_v52 = vld [vmem:[%s7913_s3 + $0x28] sm:$0xff]  ;;  %v7960_v58 = vpack.c.bf16 %v5489_v0, %v5484_v62  ;;  %v2204_v50 = vld [vmem:[%s7913_s3 + $0x20] sm:$0xff]  ;;  %v2206_v62 = vld [vmem:[%s7913_s3 + $0x30] sm:$0xff] }
 0x5a5   : > { %v5110_v21 = vpack.c.bf16 %v2100_v18, %v2096_v25  ;;  %v2203_v25 = vld [vmem:[%s7913_s3 + $0x18] sm:$0xff]  ;;  %v7959_v18 = vpack.c.bf16 %v5493_v3, %v5487_v63  ;;  %v7961_v54 = vpack.c.bf16 %v5510_v10, %v5504_v7  ;;  %v7962_v3 = vpack.c.bf16 %v5506_v8, %v5501_v6  ;;  %v2209_v7 = vld [vmem:[%s7913_s3 + $0x48] sm:$0xff]  ;;  %v2208_v6 = vld [vmem:[%s7913_s3 + $0x40] sm:$0xff] }
 0x5a6   : > { %v2207_v63 = vld [vmem:[%s7913_s3 + $0x38] sm:$0xff]  ;;  %v7963_v0 = vpack.c.bf16 %v5527_v17, %v5521_v14  ;;  %v7964_v10 = vpack.c.bf16 %v5523_v15, %v5518_v13  ;;  %v2210_v14 = vld [vmem:[%s7913_s3 + $0x50] sm:$0xff]  ;;  %v2213_v13 = vld [vmem:[%s7913_s3 + $0x68] sm:$0xff] }
 0x5a7   : > { %5111 = vmatprep.subr.bf16.mxu0 %v5110_v21  ;;  %v2211_v8 = vld [vmem:[%s7913_s3 + $0x58] sm:$0xff]  ;;  %v2212_v15 = vld [vmem:[%s7913_s3 + $0x60] sm:$0xff]  ;;  %v2214_v21 = vld [vmem:[%s7913_s3 + $0x70] sm:$0xff] }
 0x5a8   : > { %5113 = vmatpush1.bf16.msra.mxu0 %v5112_v9  ;;  %v2202_v9 = vld [vmem:[%s7913_s3 + $0x10] sm:$0xff]  ;;  %v2215_v17 = vld [vmem:[%s7913_s3 + $0x78] sm:$0xff] }
 0x5a9   : > { %v2104_v28 = vpop.f32.mrb[140].mxu1 }
 0x5aa   : > { %v2106_v57 = vpop.f32.mrb[141].mxu1 }
 0x5ab   : > { %v2108_v59 = vpop.f32.mrb[142].mxu1 }
 0x5ac   : > { %v5116_v60 = vpack.c.bf16 %v2108_v59, %v2104_v28  ;;  %v2110_v20 = vpop.f32.mrb[143].mxu1  ;;  %v2217_v28 = vld [vmem:[%s7913_s3 + $0x88] sm:$0xff]  ;;  %v2219_v59 = vld [vmem:[%s7913_s3 + $0x98] sm:$0xff] }
 0x5ad   : > { %v5114_v22 = vpack.c.bf16 %v2110_v20, %v2106_v57  ;;  %v2216_v57 = vld [vmem:[%s7913_s3 + $0x80] sm:$0xff]  ;;  %v2221_v20 = vld [vmem:[%s7913_s3 + $0xa8] sm:$0xff] }
 0x5af   : > { %5115 = vmatprep.subr.bf16.mxu0 %v5114_v22  ;;  %v2220_v22 = vld [vmem:[%s7913_s3 + $0xa0] sm:$0xff] }
 0x5b0   : > { %5117 = vmatpush1.bf16.msra.mxu0 %v5116_v60  ;;  %v2218_v60 = vld [vmem:[%s7913_s3 + $0x90] sm:$0xff] }
 0x5b1   : > { %v2114_v26 = vpop.f32.mrb[144].mxu1 }
 0x5b2   : > { %v2116_v27 = vpop.f32.mrb[145].mxu1 }
 0x5b3   : > { %v2118_v32 = vpop.f32.mrb[146].mxu1 }
 0x5b4   : > { %v5120_v34 = vpack.c.bf16 %v2118_v32, %v2114_v26  ;;  %v2120_v40 = vpop.f32.mrb[147].mxu1  ;;  %v2223_v26 = vld [vmem:[%s7913_s3 + $0xb8] sm:$0xff]  ;;  %v2225_v32 = vld [vmem:[%s7913_s3 + $0xc8] sm:$0xff] }
 0x5b5   : > { %v5118_v42 = vpack.c.bf16 %v2120_v40, %v2116_v27  ;;  %v2222_v27 = vld [vmem:[%s7913_s3 + $0xb0] sm:$0xff]  ;;  %v2227_v40 = vld [vmem:[%s7913_s3 + $0xd8] sm:$0xff] }
 0x5b7   : > { %5119 = vmatprep.subr.bf16.mxu0 %v5118_v42  ;;  %v2226_v42 = vld [vmem:[%s7913_s3 + $0xd0] sm:$0xff] }
 0x5b8   : > { %5121 = vmatpush1.bf16.msra.mxu0 %v5120_v34  ;;  %v2224_v34 = vld [vmem:[%s7913_s3 + $0xc0] sm:$0xff] }
 0x5b9   : > { %v2124_v46 = vpop.f32.mrb[148].mxu1 }
 0x5ba   : > { %v2126_v29 = vpop.f32.mrb[149].mxu1 }
 0x5bb   : > { %v2128_v49 = vpop.f32.mrb[150].mxu1 }
 0x5bc   : > { %v5124_v33 = vpack.c.bf16 %v2128_v49, %v2124_v46  ;;  %v2130_v41 = vpop.f32.mrb[151].mxu1  ;;  %v2229_v46 = vld [vmem:[%s7913_s3 + $0xe8] sm:$0xff]  ;;  %v2231_v49 = vld [vmem:[%s7913_s3 + $0xf8] sm:$0xff] }
 0x5bd   : > { %v5122_v43 = vpack.c.bf16 %v2130_v41, %v2126_v29  ;;  %v2228_v29 = vld [vmem:[%s7913_s3 + $0xe0] sm:$0xff]  ;;  %v2233_v41 = vld [vmem:[%s7913_s3 + $0x108] sm:$0xff] }
 0x5bf   : > { %5123 = vmatprep.subr.bf16.mxu0 %v5122_v43  ;;  %v2232_v43 = vld [vmem:[%s7913_s3 + $0x100] sm:$0xff] }
 0x5c0   : > { %5125 = vmatpush1.bf16.msra.mxu0 %v5124_v33  ;;  %v2230_v33 = vld [vmem:[%s7913_s3 + $0xf0] sm:$0xff] }
 0x5c1   : > { %v2134_v19 = vpop.f32.mrb[152].mxu1 }
 0x5c2   : > { %v2136_v51 = vpop.f32.mrb[153].mxu1 }
 0x5c3   : > { %v2138_v38 = vpop.f32.mrb[154].mxu1 }
 0x5c4   : > { %v5128_v1 = vpack.c.bf16 %v2138_v38, %v2134_v19  ;;  %v2140_v56 = vpop.f32.mrb[155].mxu1  ;;  %v2235_v19 = vld [vmem:[%s7913_s3 + $0x118] sm:$0xff]  ;;  %v2237_v38 = vld [vmem:[%s7913_s3 + $0x128] sm:$0xff] }
 0x5c5   : > { %v5126_v2 = vpack.c.bf16 %v2140_v56, %v2136_v51  ;;  %v2234_v51 = vld [vmem:[%s7913_s3 + $0x110] sm:$0xff]  ;;  %v2239_v56 = vld [vmem:[%s7913_s3 + $0x138] sm:$0xff] }
 0x5c7   : > { %5127 = vmatprep.subr.bf16.mxu0 %v5126_v2  ;;  %v2238_v2 = vld [vmem:[%s7913_s3 + $0x130] sm:$0xff] }
 0x5c8   : > { %5129 = vmatpush1.bf16.msra.mxu0 %v5128_v1  ;;  %v2236_v1 = vld [vmem:[%s7913_s3 + $0x120] sm:$0xff] }
 0x5c9   : > { %3207 = vmatprep.subr.bf16.mxu0 %v7957_v11  ;;  %v2240_v11 = vld [vmem:[%s7913_s3 + $0x140] sm:$0xff] }
 0x5cb   : > { %2425 = vmatmul.mubr.f32.vlgmr.msra.gmra.mrb[100].mxu0 %v2200_v47  ;;  %v2241_v47 = vld [vmem:[%s7913_s3 + $0x148] sm:$0xff] }
 0x5cc   : > { %3208 = vmatpush1.bf16.msra.mxu0 %v7958_v37  ;;  %4588 = vmatprep.mubr.msk.f32.mxu0 %vm908_vm1, %v2203_v25  ;;  %v2243_v25 = vld [vmem:[%s7913_s3 + $0x158] sm:$0xff]  ;;  %v2242_v37 = vld [vmem:[%s7913_s3 + $0x150] sm:$0xff] }
 0x5cd   : > { %3209 = vmatprep.subr.bf16.mxu0 %v7959_v18  ;;  %v2244_v18 = vld [vmem:[%s7913_s3 + $0x160] sm:$0xff] }
 0x5cf   : > { %2431 = vmatmul.mubr.f32.gmra.mrb[102].mxu0 %v2202_v9  ;;  %v2245_v9 = vld [vmem:[%s7913_s3 + $0x168] sm:$0xff] }
 0x5d0   : > { %3210 = vmatpush1.bf16.msra.mxu0 %v7960_v58  ;;  %4589 = vmatprep.mubr.msk.f32.mxu0 %vm908_vm1, %v2205_v52  ;;  %v2247_v52 = vld [vmem:[%s7913_s3 + $0x178] sm:$0xff]  ;;  %v2246_v58 = vld [vmem:[%s7913_s3 + $0x170] sm:$0xff] }
 0x5d1   : > { %3211 = vmatprep.subr.bf16.mxu0 %v7961_v54  ;;  %v2248_v54 = vld [vmem:[%s7913_s3 + $0x180] sm:$0xff] }
 0x5d3   : > { %2437 = vmatmul.mubr.f32.gmra.mrb[104].mxu0 %v2204_v50  ;;  %v2249_v50 = vld [vmem:[%s7913_s3 + $0x188] sm:$0xff] }
 0x5d4   : > { %3212 = vmatpush1.bf16.msra.mxu0 %v7962_v3  ;;  %4590 = vmatprep.mubr.msk.f32.mxu0 %vm908_vm1, %v2207_v63  ;;  %v2251_v63 = vld [vmem:[%s7913_s3 + $0x198] sm:$0xff]  ;;  %v2250_v3 = vld [vmem:[%s7913_s3 + $0x190] sm:$0xff] }
 0x5d5   : > { %3213 = vmatprep.subr.bf16.mxu0 %v7963_v0  ;;  %v2252_v0 = vld [vmem:[%s7913_s3 + $0x1a0] sm:$0xff] }
 0x5d7   : > { %2443 = vmatmul.mubr.f32.gmra.mrb[106].mxu0 %v2206_v62  ;;  %v2253_v62 = vld [vmem:[%s7913_s3 + $0x1a8] sm:$0xff] }
 0x5d8   : > { %3214 = vmatpush1.bf16.msra.mxu0 %v7964_v10  ;;  %4591 = vmatprep.mubr.msk.f32.mxu0 %vm908_vm1, %v2209_v7  ;;  %v2255_v7 = vld [vmem:[%s7913_s3 + $0x1b8] sm:$0xff]  ;;  %v2254_v10 = vld [vmem:[%s7913_s3 + $0x1b0] sm:$0xff] }
 0x5db   : > { %2449 = vmatmul.mubr.f32.gmra.mrb[108].mxu0 %v2208_v6  ;;  %v2257_v6 = vld [vmem:[%s7913_s3 + $0x1c8] sm:$0xff] }
 0x5dc   : > { %4592 = vmatprep.mubr.msk.f32.mxu0 %vm908_vm1, %v2211_v8  ;;  %v2256_v8 = vld [vmem:[%s7913_s3 + $0x1c0] sm:$0xff] }
 0x5df   : > { %2455 = vmatmul.mubr.f32.gmra.mrb[110].mxu0 %v2210_v14  ;;  %v2259_v14 = vld [vmem:[%s7913_s3 + $0x1d8] sm:$0xff] }
 0x5e0   : > { %4593 = vmatprep.mubr.msk.f32.mxu0 %vm908_vm1, %v2213_v13  ;;  %v2258_v13 = vld [vmem:[%s7913_s3 + $0x1d0] sm:$0xff] }
 0x5e3   : > { %2461 = vmatmul.mubr.f32.gmra.mrb[112].mxu0 %v2212_v15  ;;  %v2261_v15 = vld [vmem:[%s7913_s3 + $0x1e8] sm:$0xff] }
 0x5e4   : > { %4594 = vmatprep.mubr.msk.f32.mxu0 %vm908_vm1, %v2215_v17  ;;  %v2260_v17 = vld [vmem:[%s7913_s3 + $0x1e0] sm:$0xff] }
 0x5e7   : > { %2467 = vmatmul.mubr.f32.gmra.mrb[114].mxu0 %v2214_v21  ;;  %v2263_v21 = vld [vmem:[%s7913_s3 + $0x1f8] sm:$0xff] }
 0x5e8   : > { %4595 = vmatprep.mubr.msk.f32.mxu0 %vm908_vm1, %v2217_v28  ;;  %v2262_v28 = vld [vmem:[%s7913_s3 + $0x1f0] sm:$0xff] }
 0x5eb   : > { %2473 = vmatmul.mubr.f32.gmra.mrb[116].mxu0 %v2216_v57  ;;  %v5310_v57 = vld [vmem:[%s7911_s1] sm:$0xff]  }
 0x5ec   : > { %4596 = vmatprep.mubr.msk.f32.mxu0 %vm908_vm1, %v2219_v59  ;;  %v5311_v59 = vld [vmem:[%s7911_s1 + $0x8] sm:$0xff]  }
 0x5ef   : > { %2479 = vmatmul.mubr.f32.gmra.mrb[118].mxu0 %v2218_v60  ;;  %v5312_v60 = vld [vmem:[%s7911_s1 + $0x10] sm:$0xff]  }
 0x5f0   : > { %4597 = vmatprep.mubr.msk.f32.mxu0 %vm908_vm1, %v2221_v20  ;;  %v5313_v20 = vld [vmem:[%s7911_s1 + $0x18] sm:$0xff]  }
 0x5f3   : > { %2485 = vmatmul.mubr.f32.gmra.mrb[120].mxu0 %v2220_v22  ;;  %v5314_v22 = vld [vmem:[%s7911_s1 + $0x20] sm:$0xff]  }
 0x5f4   : > { %4598 = vmatprep.mubr.msk.f32.mxu0 %vm908_vm1, %v2223_v26  ;;  %v5315_v26 = vld [vmem:[%s7911_s1 + $0x28] sm:$0xff]  }
 0x5f7   : > { %2491 = vmatmul.mubr.f32.gmra.mrb[122].mxu0 %v2222_v27  ;;  %v5316_v27 = vld [vmem:[%s7911_s1 + $0x30] sm:$0xff]  }
 0x5f8   : > { %4599 = vmatprep.mubr.msk.f32.mxu0 %vm908_vm1, %v2225_v32  ;;  %v5317_v32 = vld [vmem:[%s7911_s1 + $0x38] sm:$0xff]  }
 0x5fb   : > { %2497 = vmatmul.mubr.f32.gmra.mrb[124].mxu0 %v2224_v34  ;;  %v5318_v34 = vld [vmem:[%s7911_s1 + $0x40] sm:$0xff]  }
 0x5fc   : > { %4600 = vmatprep.mubr.msk.f32.mxu0 %vm908_vm1, %v2227_v40  ;;  %v5319_v40 = vld [vmem:[%s7911_s1 + $0x48] sm:$0xff]  }
 0x5ff   : > { %2503 = vmatmul.mubr.f32.gmra.mrb[126].mxu0 %v2226_v42  ;;  %v5320_v42 = vld [vmem:[%s7911_s1 + $0x50] sm:$0xff]  }
 0x600   : > { %4601 = vmatprep.mubr.msk.f32.mxu0 %vm908_vm1, %v2229_v46  ;;  %v2618_v46 = vld [vmem:[%s7914_s4 + $0x8] sm:$0xff] }
 0x603   : > { %2509 = vmatmul.mubr.f32.gmra.mrb[128].mxu0 %v2228_v29 }
 0x604   : > { %4602 = vmatprep.mubr.msk.f32.mxu0 %vm908_vm1, %v2231_v49  ;;  %v2617_v49 = vld [vmem:[%s7914_s4] sm:$0xff] }
 0x607   : > { %2515 = vmatmul.mubr.f32.gmra.mrb[130].mxu0 %v2230_v33 }
 0x608   : > { %4603 = vmatprep.mubr.msk.f32.mxu0 %vm908_vm1, %v2233_v41  ;;  %v5321_v41 = vld [vmem:[%s7911_s1 + $0x58] sm:$0xff]  }
 0x60b   : > { %2521 = vmatmul.mubr.f32.gmra.mrb[132].mxu0 %v2232_v43 }
 0x60c   : > { %4604 = vmatprep.mubr.msk.f32.mxu0 %vm908_vm1, %v2235_v19 }
 0x60f   : > { %2527 = vmatmul.mubr.f32.gmra.mrb[134].mxu0 %v2234_v51  ;;  %v2620_v51 = vld [vmem:[%s7914_s4 + $0x18] sm:$0xff] }
 0x610   : > { %4605 = vmatprep.mubr.msk.f32.mxu0 %vm908_vm1, %v2237_v38 }
 0x613   : > { %2533 = vmatmul.mubr.f32.gmra.mrb[136].mxu0 %v2236_v1  ;;  %v2619_v1 = vld [vmem:[%s7914_s4 + $0x10] sm:$0xff] }
 0x614   : > { %4606 = vmatprep.mubr.msk.f32.mxu0 %vm908_vm1, %v2239_v56 }
 0x617   : > { %2539 = vmatmul.mubr.f32.gmra.mrb[138].mxu0 %v2238_v2 }
 0x618   : > { %4607 = vmatprep.mubr.msk.f32.mxu0 %vm908_vm1, %v2241_v47 }
 0x61b   : > { %2545 = vmatmul.mubr.f32.gmra.mrb[140].mxu0 %v2240_v11 }
 0x61c   : > { %4608 = vmatprep.mubr.msk.f32.mxu0 %vm908_vm1, %v2243_v25 }
 0x61f   : > { %2551 = vmatmul.mubr.f32.gmra.mrb[142].mxu0 %v2242_v37  ;;  %v2622_v37 = vld [vmem:[%s7914_s4 + $0x28] sm:$0xff] }
 0x620   : > { %4609 = vmatprep.mubr.msk.f32.mxu0 %vm908_vm1, %v2245_v9 }
 0x623   : > { %2557 = vmatmul.mubr.f32.gmra.mrb[144].mxu0 %v2244_v18  ;;  %v2621_v18 = vld [vmem:[%s7914_s4 + $0x20] sm:$0xff] }
 0x624   : > { %4610 = vmatprep.mubr.msk.f32.mxu0 %vm908_vm1, %v2247_v52 }
 0x627   : > { %2563 = vmatmul.mubr.f32.gmra.mrb[146].mxu0 %v2246_v58 }
 0x628   : > { %4611 = vmatprep.mubr.msk.f32.mxu0 %vm908_vm1, %v2249_v50 }
 0x62b   : > { %2569 = vmatmul.mubr.f32.gmra.mrb[148].mxu0 %v2248_v54  ;;  %v5322_v54 = vld [vmem:[%s7911_s1 + $0x60] sm:$0xff]  }
 0x62c   : > { %4612 = vmatprep.mubr.msk.f32.mxu0 %vm908_vm1, %v2251_v63 }
 0x62f   : > { %2575 = vmatmul.mubr.f32.gmra.mrb[150].mxu0 %v2250_v3 }
 0x630   : > { %4613 = vmatprep.mubr.msk.f32.mxu0 %vm908_vm1, %v2253_v62  ;;  %v2624_v62 = vld [vmem:[%s7914_s4 + $0x38] sm:$0xff] }
 0x633   : > { %2581 = vmatmul.mubr.f32.gmra.mrb[152].mxu0 %v2252_v0 }
 0x634   : > { %4614 = vmatprep.mubr.msk.f32.mxu0 %vm908_vm1, %v2255_v7  ;;  %v2623_v7 = vld [vmem:[%s7914_s4 + $0x30] sm:$0xff] }
 0x637   : > { %2587 = vmatmul.mubr.f32.gmra.mrb[154].mxu0 %v2254_v10 }
 0x638   : > { %4615 = vmatprep.mubr.msk.f32.mxu0 %vm908_vm1, %v2257_v6 }
 0x63b   : > { %2593 = vmatmul.mubr.f32.gmra.mrb[156].mxu0 %v2256_v8 }
 0x63c   : > { %4616 = vmatprep.mubr.msk.f32.mxu0 %vm908_vm1, %v2259_v14 }
 0x63f   : > { %2599 = vmatmul.mubr.f32.gmra.mrb[158].mxu0 %v2258_v13 }
 0x640   : > { %4617 = vmatprep.mubr.msk.f32.mxu0 %vm908_vm1, %v2261_v15  ;;  %v2626_v15 = vld [vmem:[%s7914_s4 + $0x48] sm:$0xff] }
 0x643   : > { %2605 = vmatmul.mubr.f32.gmra.mrb[160].mxu0 %v2260_v17 }
 0x644   : > { %4618 = vmatprep.mubr.msk.f32.mxu0 %vm908_vm1, %v2263_v21  ;;  %v2625_v21 = vld [vmem:[%s7914_s4 + $0x40] sm:$0xff] }
 0x647   : > { %2611 = vmatmul.mubr.f32.gmra.mrb[162].mxu0 %v2262_v28 }
 0x648   : > { %3239 = vmatprep.mubr.bf16.mxu0 %v7940_v48 }
 0x64b   : > { %4665 = vmatmul.mubr.msk.bf16.vlgmr.msra.gmra.mrb[164].mxu0 %vm364_vm0, %v5310_v57 }
 0x64c   : > { %3249 = vmatprep.mubr.bf16.mxu0 %v7940_v48 }
 0x653   : > { %4666 = vmatmul.mubr.msk.bf16.gmra.mrb[168].mxu0 %vm364_vm0, %v5311_v59 }
 0x654   : > { %3259 = vmatprep.mubr.bf16.mxu0 %v7940_v48 }
 0x65b   : > { %4667 = vmatmul.mubr.msk.bf16.gmra.mrb[172].mxu0 %vm364_vm0, %v5312_v60  ;;  %v5323_v60 = vld [vmem:[%s7911_s1 + $0x68] sm:$0xff]  }
 0x65c   : > { %3269 = vmatprep.mubr.bf16.mxu0 %v7940_v48 }
 0x663   : > { %4668 = vmatmul.mubr.msk.bf16.gmra.mrb[176].mxu0 %vm364_vm0, %v5313_v20 }
 0x664   : > { %3279 = vmatprep.mubr.bf16.mxu0 %v7940_v48 }
 0x66b   : > { %4669 = vmatmul.mubr.msk.bf16.gmra.mrb[180].mxu0 %vm364_vm0, %v5314_v22  ;;  %v2628_v22 = vld [vmem:[%s7914_s4 + $0x58] sm:$0xff] }
 0x66c   : > { %3289 = vmatprep.mubr.bf16.mxu0 %v7940_v48 }
 0x673   : > { %4670 = vmatmul.mubr.msk.bf16.gmra.mrb[184].mxu0 %vm364_vm0, %v5315_v26 }
 0x674   : > { %3299 = vmatprep.mubr.bf16.mxu0 %v7940_v48 }
 0x67b   : > { %4671 = vmatmul.mubr.msk.bf16.gmra.mrb[188].mxu0 %vm364_vm0, %v5316_v27  ;;  %v2627_v27 = vld [vmem:[%s7914_s4 + $0x50] sm:$0xff] }
 0x67c   : > { %3309 = vmatprep.mubr.bf16.mxu0 %v7940_v48 }
 0x683   : > { %4672 = vmatmul.mubr.msk.bf16.gmra.mrb[192].mxu0 %vm364_vm0, %v5317_v32 }
 0x684   : > { %3319 = vmatprep.mubr.bf16.mxu0 %v7940_v48 }
 0x68b   : > { %4673 = vmatmul.mubr.msk.bf16.gmra.mrb[196].mxu0 %vm364_vm0, %v5318_v34 }
 0x68c   : > { %3329 = vmatprep.mubr.bf16.mxu0 %v7940_v48 }
 0x693   : > { %4674 = vmatmul.mubr.msk.bf16.gmra.mrb[200].mxu0 %vm364_vm0, %v5319_v40 }
 0x694   : > { %3339 = vmatprep.mubr.bf16.mxu0 %v7940_v48 }
 0x69b   : > { %4675 = vmatmul.mubr.msk.bf16.gmra.mrb[204].mxu0 %vm364_vm0, %v5320_v42 }
 0x69c   : > { %3349 = vmatprep.mubr.bf16.mxu0 %v7940_v48 }
 0x69e   : > { %v2426_v29 = vpop.f32.mrb[100].mxu0 }
 0x69f   : > { %v2428_v33 = vpop.f32.mrb[101].mxu0  ;;  %v2681_v19 = vmul.f32 %v2617_v49, %v2426_v29  ;;  %v2630_v29 = vld [vmem:[%s7914_s4 + $0x68] sm:$0xff] }
 0x6a0   : > { %v2682_v43 = vmul.f32 %v2618_v46, %v2428_v33  ;;  %v2629_v33 = vld [vmem:[%s7914_s4 + $0x60] sm:$0xff] }
 0x6a2   : > { %v2432_v38 = vpop.f32.mrb[102].mxu0  ;;  %v2745_v56 = vsel %vm908_vm1, %v2682_v43, 0.0 }
 0x6a3   : > { %v2434_v2 = vpop.f32.mrb[103].mxu0  ;;  %v2746_v47 = vadd.f32 %v2745_v56, %v2681_v19  ;;  %4676 = vmatmul.mubr.msk.bf16.gmra.mrb[208].mxu0 %vm364_vm0, %v5321_v41  ;;  %v2683_v25 = vmul.f32 %v2619_v1, %v2432_v38  ;;  %v2632_v1 = vld [vmem:[%s7914_s4 + $0x78] sm:$0xff] }
 0x6a4   : > { %v2684_v11 = vmul.f32 %v2620_v51, %v2434_v2  ;;  %3359 = vmatprep.mubr.bf16.mxu0 %v7940_v48  ;;  %v2631_v2 = vld [vmem:[%s7914_s4 + $0x70] sm:$0xff] }
 0x6a5   : > { %2747 = vadd.xlane.f32.xlu0 %v2746_v47 }
 0x6a6   : > { %v2438_v9 = vpop.f32.mrb[104].mxu0  ;;  %v2749_v52 = vsel %vm908_vm1, %v2684_v11, 0.0 }
 0x6a7   : > { %v2440_v58 = vpop.f32.mrb[105].mxu0  ;;  %v2750_v50 = vadd.f32 %v2749_v52, %v2683_v25  ;;  %v2685_v3 = vmul.f32 %v2621_v18, %v2438_v9  ;;  %v2634_v18 = vld [vmem:[%s7914_s4 + $0x88] sm:$0xff] }
 0x6a8   : > { %v2686_v63 = vmul.f32 %v2622_v37, %v2440_v58  ;;  %v2633_v58 = vld [vmem:[%s7914_s4 + $0x80] sm:$0xff] }
 0x6a9   : > { %2751 = vadd.xlane.f32.xlu1 %v2750_v50 }
 0x6aa   : > { %v2444_v0 = vpop.f32.mrb[106].mxu0  ;;  %v2753_v10 = vsel %vm908_vm1, %v2686_v63, 0.0 }
 0x6ab   : > { %v2446_v6 = vpop.f32.mrb[107].mxu0  ;;  %v2754_v8 = vadd.f32 %v2753_v10, %v2685_v3  ;;  %4677 = vmatmul.mubr.msk.bf16.gmra.mrb[212].mxu0 %vm364_vm0, %v5322_v54  ;;  %v2687_v13 = vmul.f32 %v2623_v7, %v2444_v0  ;;  %v2636_v0 = vld [vmem:[%s7914_s4 + $0x98] sm:$0xff]  ;;  %v2635_v10 = vld [vmem:[%s7914_s4 + $0x90] sm:$0xff] }
 0x6ac   : > { %v2688_v14 = vmul.f32 %v2624_v62, %v2446_v6  ;;  %3369 = vmatprep.mubr.bf16.mxu0 %v7940_v48 }
 0x6ad   : > { %2755 = vadd.xlane.f32.xlu0 %v2754_v8 }
 0x6ae   : > { %v2450_v17 = vpop.f32.mrb[108].mxu0  ;;  %v2757_v28 = vsel %vm908_vm1, %v2688_v14, 0.0 }
 0x6af   : > { %v2452_v57 = vpop.f32.mrb[109].mxu0  ;;  %v2758_v59 = vadd.f32 %v2757_v28, %v2687_v13  ;;  %v2689_v20 = vmul.f32 %v2625_v21, %v2450_v17  ;;  %v2638_v17 = vld [vmem:[%s7914_s4 + $0xa8] sm:$0xff]  ;;  %v2637_v28 = vld [vmem:[%s7914_s4 + $0xa0] sm:$0xff] }
 0x6b0   : > { %v2690_v48 = vmul.f32 %v2626_v15, %v2452_v57 }
 0x6b1   : > { %2759 = vadd.xlane.f32.xlu1 %v2758_v59 }
 0x6b2   : > { %v2456_v26 = vpop.f32.mrb[110].mxu0  ;;  %v2761_v32 = vsel %vm908_vm1, %v2690_v48, 0.0 }
 0x6b3   : > { %v2458_v34 = vpop.f32.mrb[111].mxu0  ;;  %v2762_v40 = vadd.f32 %v2761_v32, %v2689_v20  ;;  %4678 = vmatmul.mubr.msk.bf16.gmra.mrb[216].mxu0 %vm364_vm0, %v5323_v60  ;;  %v2691_v46 = vmul.f32 %v2627_v27, %v2456_v26  ;;  %v2639_v27 = vld [vmem:[%s7914_s4 + $0xb0] sm:$0xff] }
 0x6b4   : > { %v2692_v42 = vmul.f32 %v2628_v22, %v2458_v34  ;;  %v2640_v22 = vld [vmem:[%s7914_s4 + $0xb8] sm:$0xff] }
 0x6b5   : > { %2763 = vadd.xlane.f32.xlu0 %v2762_v40 }
 0x6b6   : > { %v2462_v49 = vpop.f32.mrb[112].mxu0  ;;  %v2765_v41 = vsel %vm908_vm1, %v2692_v42, 0.0 }
 0x6b7   : > { %v2464_v43 = vpop.f32.mrb[113].mxu0  ;;  %v2766_v19 = vadd.f32 %v2765_v41, %v2691_v46  ;;  %v2693_v38 = vmul.f32 %v2629_v33, %v2462_v49  ;;  %v2641_v33 = vld [vmem:[%s7914_s4 + $0xc0] sm:$0xff] }
 0x6b8   : > { %v2694_v51 = vmul.f32 %v2630_v29, %v2464_v43  ;;  %v2642_v29 = vld [vmem:[%s7914_s4 + $0xc8] sm:$0xff] }
 0x6b9   : > { %2767 = vadd.xlane.f32.xlu1 %v2766_v19 }
 0x6ba   : > { %v2468_v56 = vpop.f32.mrb[114].mxu0  ;;  %v2769_v47 = vsel %vm908_vm1, %v2694_v51, 0.0 }
 0x6bb   : > { %v2470_v11 = vpop.f32.mrb[115].mxu0  ;;  %v2770_v25 = vadd.f32 %v2769_v47, %v2693_v38  ;;  %v2695_v9 = vmul.f32 %v2631_v2, %v2468_v56  ;;  %v2643_v2 = vld [vmem:[%s7914_s4 + $0xd0] sm:$0xff] }
 0x6bc   : > { %v2696_v37 = vmul.f32 %v2632_v1, %v2470_v11  ;;  %v2644_v1 = vld [vmem:[%s7914_s4 + $0xd8] sm:$0xff] }
 0x6bd   : > { %2771 = vadd.xlane.f32.xlu0 %v2770_v25 }
 0x6be   : > { %v2474_v52 = vpop.f32.mrb[116].mxu0  ;;  %v2773_v50 = vsel %vm908_vm1, %v2696_v37, 0.0 }
 0x6bf   : > { %v2476_v54 = vpop.f32.mrb[117].mxu0  ;;  %v2774_v63 = vadd.f32 %v2773_v50, %v2695_v9  ;;  %v2697_v62 = vmul.f32 %v2633_v58, %v2474_v52  ;;  %v2645_v58 = vld [vmem:[%s7914_s4 + $0xe0] sm:$0xff] }
 0x6c0   : > { %v2698_v3 = vmul.f32 %v2634_v18, %v2476_v54  ;;  %v2646_v18 = vld [vmem:[%s7914_s4 + $0xe8] sm:$0xff] }
 0x6c1   : > { %2775 = vadd.xlane.f32.xlu1 %v2774_v63 }
 0x6c2   : > { %v2480_v7 = vpop.f32.mrb[118].mxu0  ;;  %v2777_v6 = vsel %vm908_vm1, %v2698_v3, 0.0 }
 0x6c3   : > { %v2482_v8 = vpop.f32.mrb[119].mxu0  ;;  %v2778_v14 = vadd.f32 %v2777_v6, %v2697_v62  ;;  %v2699_v15 = vmul.f32 %v2635_v10, %v2480_v7  ;;  %v2647_v10 = vld [vmem:[%s7914_s4 + $0xf0] sm:$0xff] }
 0x6c4   : > { %v2700_v13 = vmul.f32 %v2636_v0, %v2482_v8  ;;  %v2648_v0 = vld [vmem:[%s7914_s4 + $0xf8] sm:$0xff] }
 0x6c5   : > { %2779 = vadd.xlane.f32.xlu0 %v2778_v14 }
 0x6c6   : > { %v2486_v21 = vpop.f32.mrb[120].mxu0  ;;  %v2781_v57 = vsel %vm908_vm1, %v2700_v13, 0.0 }
 0x6c7   : > { %v2488_v59 = vpop.f32.mrb[121].mxu0  ;;  %v2782_v60 = vadd.f32 %v2781_v57, %v2699_v15  ;;  %v2701_v20 = vmul.f32 %v2637_v28, %v2486_v21  ;;  %v2649_v28 = vld [vmem:[%s7914_s4 + $0x100] sm:$0xff] }
 0x6c8   : > { %v2702_v48 = vmul.f32 %v2638_v17, %v2488_v59  ;;  %v2650_v17 = vld [vmem:[%s7914_s4 + $0x108] sm:$0xff] }
 0x6c9   : > { %2783 = vadd.xlane.f32.xlu1 %v2782_v60 }
 0x6ca   : > { %v2492_v26 = vpop.f32.mrb[122].mxu0  ;;  %v2785_v32 = vsel %vm908_vm1, %v2702_v48, 0.0 }
 0x6cb   : > { %v2494_v34 = vpop.f32.mrb[123].mxu0  ;;  %v2786_v40 = vadd.f32 %v2785_v32, %v2701_v20  ;;  %v2703_v46 = vmul.f32 %v2639_v27, %v2492_v26  ;;  %v2651_v27 = vld [vmem:[%s7914_s4 + $0x110] sm:$0xff] }
 0x6cc   : > { %v2704_v42 = vmul.f32 %v2640_v22, %v2494_v34  ;;  %v2652_v22 = vld [vmem:[%s7914_s4 + $0x118] sm:$0xff] }
 0x6cd   : > { %2787 = vadd.xlane.f32.xlu0 %v2786_v40 }
 0x6ce   : > { %v2498_v49 = vpop.f32.mrb[124].mxu0  ;;  %v2789_v41 = vsel %vm908_vm1, %v2704_v42, 0.0 }
 0x6cf   : > { %v2500_v43 = vpop.f32.mrb[125].mxu0  ;;  %v2790_v19 = vadd.f32 %v2789_v41, %v2703_v46  ;;  %v2705_v38 = vmul.f32 %v2641_v33, %v2498_v49  ;;  %v2653_v33 = vld [vmem:[%s7914_s4 + $0x120] sm:$0xff] }
 0x6d0   : > { %v2706_v51 = vmul.f32 %v2642_v29, %v2500_v43  ;;  %v2654_v29 = vld [vmem:[%s7914_s4 + $0x128] sm:$0xff] }
 0x6d1   : > { %2791 = vadd.xlane.f32.xlu1 %v2790_v19 }
 0x6d2   : > { %v2504_v56 = vpop.f32.mrb[126].mxu0  ;;  %v2793_v47 = vsel %vm908_vm1, %v2706_v51, 0.0 }
 0x6d3   : > { %v2506_v11 = vpop.f32.mrb[127].mxu0  ;;  %v2794_v25 = vadd.f32 %v2793_v47, %v2705_v38  ;;  %v2707_v9 = vmul.f32 %v2643_v2, %v2504_v56  ;;  %v2655_v2 = vld [vmem:[%s7914_s4 + $0x130] sm:$0xff] }
 0x6d4   : > { %v2708_v37 = vmul.f32 %v2644_v1, %v2506_v11  ;;  %v2656_v1 = vld [vmem:[%s7914_s4 + $0x138] sm:$0xff] }
 0x6d5   : > { %2795 = vadd.xlane.f32.xlu0 %v2794_v25 }
 0x6d6   : > { %v2510_v52 = vpop.f32.mrb[128].mxu0  ;;  %v2797_v50 = vsel %vm908_vm1, %v2708_v37, 0.0 }
 0x6d7   : > { %v2512_v54 = vpop.f32.mrb[129].mxu0  ;;  %v2798_v63 = vadd.f32 %v2797_v50, %v2707_v9  ;;  %v2709_v62 = vmul.f32 %v2645_v58, %v2510_v52  ;;  %v2657_v58 = vld [vmem:[%s7914_s4 + $0x140] sm:$0xff] }
 0x6d8   : > { %v2710_v3 = vmul.f32 %v2646_v18, %v2512_v54  ;;  %v2658_v18 = vld [vmem:[%s7914_s4 + $0x148] sm:$0xff] }
 0x6d9   : > { %2799 = vadd.xlane.f32.xlu1 %v2798_v63 }
 0x6da   : > { %v2516_v7 = vpop.f32.mrb[130].mxu0  ;;  %v2801_v6 = vsel %vm908_vm1, %v2710_v3, 0.0 }
 0x6db   : > { %v2518_v8 = vpop.f32.mrb[131].mxu0  ;;  %v6734_v14 = vadd.f32 %v2801_v6, %v2709_v62  ;;  %v2711_v15 = vmul.f32 %v2647_v10, %v2516_v7  ;;  %v2659_v10 = vld [vmem:[%s7914_s4 + $0x150] sm:$0xff] }
 0x6dc   : > { %v2712_v13 = vmul.f32 %v2648_v0, %v2518_v8  ;;  %v2660_v0 = vld [vmem:[%s7914_s4 + $0x158] sm:$0xff] }
 0x6de   : > { %v2522_v21 = vpop.f32.mrb[132].mxu0  ;;  %v2805_v57 = vsel %vm908_vm1, %v2712_v13, 0.0 }
 0x6df   : > { %v2524_v59 = vpop.f32.mrb[133].mxu0  ;;  %v6743_v60 = vadd.f32 %v2805_v57, %v2711_v15  ;;  %v2713_v20 = vmul.f32 %v2649_v28, %v2522_v21  ;;  %v2662_v21 = vld [vmem:[%s7914_s4 + $0x168] sm:$0xff]  ;;  %v2661_v57 = vld [vmem:[%s7914_s4 + $0x160] sm:$0xff] }
 0x6e0   : > { %v2714_v48 = vmul.f32 %v2650_v17, %v2524_v59 }
 0x6e2   : > { %v2528_v26 = vpop.f32.mrb[134].mxu0  ;;  %v2809_v32 = vsel %vm908_vm1, %v2714_v48, 0.0 }
 0x6e3   : > { %v2530_v34 = vpop.f32.mrb[135].mxu0  ;;  %v2810_v40 = vadd.f32 %v2809_v32, %v2713_v20  ;;  %v2715_v46 = vmul.f32 %v2651_v27, %v2528_v26  ;;  %v2664_v27 = vld [vmem:[%s7914_s4 + $0x178] sm:$0xff] }
 0x6e4   : > { %v2716_v42 = vmul.f32 %v2652_v22, %v2530_v34  ;;  %v2663_v34 = vld [vmem:[%s7914_s4 + $0x170] sm:$0xff] }
 0x6e5   : > { %2811 = vadd.xlane.f32.xlu0 %v2810_v40 }
 0x6e6   : > { %v2534_v49 = vpop.f32.mrb[136].mxu0  ;;  %v2813_v41 = vsel %vm908_vm1, %v2716_v42, 0.0 }
 0x6e7   : > { %v2536_v43 = vpop.f32.mrb[137].mxu0  ;;  %v2814_v19 = vadd.f32 %v2813_v41, %v2715_v46  ;;  %v2717_v38 = vmul.f32 %v2653_v33, %v2534_v49  ;;  %v2666_v33 = vld [vmem:[%s7914_s4 + $0x188] sm:$0xff] }
 0x6e8   : > { %v2718_v51 = vmul.f32 %v2654_v29, %v2536_v43  ;;  %v2665_v43 = vld [vmem:[%s7914_s4 + $0x180] sm:$0xff] }
 0x6e9   : > { %2815 = vadd.xlane.f32.xlu1 %v2814_v19 }
 0x6ea   : > { %v2540_v56 = vpop.f32.mrb[138].mxu0  ;;  %v2817_v47 = vsel %vm908_vm1, %v2718_v51, 0.0 }
 0x6eb   : > { %v2542_v11 = vpop.f32.mrb[139].mxu0  ;;  %v2818_v25 = vadd.f32 %v2817_v47, %v2717_v38  ;;  %v2719_v9 = vmul.f32 %v2655_v2, %v2540_v56  ;;  %v2668_v2 = vld [vmem:[%s7914_s4 + $0x198] sm:$0xff] }
 0x6ec   : > { %v2720_v37 = vmul.f32 %v2656_v1, %v2542_v11  ;;  %v2667_v11 = vld [vmem:[%s7914_s4 + $0x190] sm:$0xff] }
 0x6ed   : > { %2819 = vadd.xlane.f32.xlu0 %v2818_v25 }
 0x6ee   : > { %v2546_v52 = vpop.f32.mrb[140].mxu0  ;;  %v2821_v50 = vsel %vm908_vm1, %v2720_v37, 0.0 }
 0x6ef   : > { %v2548_v54 = vpop.f32.mrb[141].mxu0  ;;  %v2822_v63 = vadd.f32 %v2821_v50, %v2719_v9  ;;  %v2721_v62 = vmul.f32 %v2657_v58, %v2546_v52  ;;  %v2670_v58 = vld [vmem:[%s7914_s4 + $0x1a8] sm:$0xff] }
 0x6f0   : > { %v2722_v3 = vmul.f32 %v2658_v18, %v2548_v54  ;;  %v2669_v54 = vld [vmem:[%s7914_s4 + $0x1a0] sm:$0xff] }
 0x6f1   : > { %2823 = vadd.xlane.f32.xlu1 %v2822_v63 }
 0x6f2   : > { %v2552_v7 = vpop.f32.mrb[142].mxu0  ;;  %v2825_v6 = vsel %vm908_vm1, %v2722_v3, 0.0 }
 0x6f3   : > { %v2554_v8 = vpop.f32.mrb[143].mxu0  ;;  %v2826_v13 = vadd.f32 %v2825_v6, %v2721_v62  ;;  %v2723_v17 = vmul.f32 %v2659_v10, %v2552_v7  ;;  %v2672_v10 = vld [vmem:[%s7914_s4 + $0x1b8] sm:$0xff] }
 0x6f4   : > { %v2724_v15 = vmul.f32 %v2660_v0, %v2554_v8  ;;  %v2671_v8 = vld [vmem:[%s7914_s4 + $0x1b0] sm:$0xff] }
 0x6f5   : > { %2827 = vadd.xlane.f32.xlu0 %v2826_v13 }
 0x6f6   : > { %v2558_v28 = vpop.f32.mrb[144].mxu0  ;;  %v2829_v59 = vsel %vm908_vm1, %v2724_v15, 0.0 }
 0x6f7   : > { %v2560_v48 = vpop.f32.mrb[145].mxu0  ;;  %v2830_v20 = vadd.f32 %v2829_v59, %v2723_v17  ;;  %v2725_v26 = vmul.f32 %v2661_v57, %v2558_v28  ;;  %v2674_v57 = vld [vmem:[%s7914_s4 + $0x1c8] sm:$0xff] }
 0x6f8   : > { %v2726_v22 = vmul.f32 %v2662_v21, %v2560_v48  ;;  %v2673_v48 = vld [vmem:[%s7914_s4 + $0x1c0] sm:$0xff] }
 0x6f9   : > { %2831 = vadd.xlane.f32.xlu1 %v2830_v20 }
 0x6fa   : > { %v2564_v32 = vpop.f32.mrb[146].mxu0  ;;  %v2833_v40 = vsel %vm908_vm1, %v2726_v22, 0.0 }
 0x6fb   : > { %v2566_v42 = vpop.f32.mrb[147].mxu0  ;;  %v2834_v46 = vadd.f32 %v2833_v40, %v2725_v26  ;;  %v2727_v49 = vmul.f32 %v2663_v34, %v2564_v32  ;;  %v2676_v34 = vld [vmem:[%s7914_s4 + $0x1d8] sm:$0xff] }
 0x6fc   : > { %v2728_v29 = vmul.f32 %v2664_v27, %v2566_v42  ;;  %v2675_v42 = vld [vmem:[%s7914_s4 + $0x1d0] sm:$0xff] }
 0x6fd   : > { %2835 = vadd.xlane.f32.xlu0 %v2834_v46 }
 0x6fe   : > { %v2570_v41 = vpop.f32.mrb[148].mxu0  ;;  %v2837_v19 = vsel %vm908_vm1, %v2728_v29, 0.0 }
 0x6ff   : > { %v2572_v51 = vpop.f32.mrb[149].mxu0  ;;  %v2838_v38 = vadd.f32 %v2837_v19, %v2727_v49  ;;  %v2729_v56 = vmul.f32 %v2665_v43, %v2570_v41  ;;  %v2678_v43 = vld [vmem:[%s7914_s4 + $0x1e8] sm:$0xff] }
 0x700   : > { %v2730_v1 = vmul.f32 %v2666_v33, %v2572_v51  ;;  %v2677_v51 = vld [vmem:[%s7914_s4 + $0x1e0] sm:$0xff] }
 0x701   : > { %2839 = vadd.xlane.f32.xlu1 %v2838_v38 }
 0x702   : > { %v2576_v47 = vpop.f32.mrb[150].mxu0  ;;  %v2841_v25 = vsel %vm908_vm1, %v2730_v1, 0.0 }
 0x703   : > { %v2578_v37 = vpop.f32.mrb[151].mxu0  ;;  %v2842_v9 = vadd.f32 %v2841_v25, %v2729_v56  ;;  %v2731_v52 = vmul.f32 %v2667_v11, %v2576_v47  ;;  %v2680_v11 = vld [vmem:[%s7914_s4 + $0x1f8] sm:$0xff] }
 0x704   : > { %v2732_v18 = vmul.f32 %v2668_v2, %v2578_v37  ;;  %v2679_v37 = vld [vmem:[%s7914_s4 + $0x1f0] sm:$0xff] }
 0x705   : > { %2843 = vadd.xlane.f32.xlu0 %v2842_v9 }
 0x706   : > { %v2582_v50 = vpop.f32.mrb[152].mxu0  ;;  %v2845_v63 = vsel %vm908_vm1, %v2732_v18, 0.0 }
 0x707   : > { %v2584_v3 = vpop.f32.mrb[153].mxu0  ;;  %v2846_v62 = vadd.f32 %v2845_v63, %v2731_v52  ;;  %v2733_v7 = vmul.f32 %v2669_v54, %v2582_v50 }
 0x708   : > { %v2734_v0 = vmul.f32 %v2670_v58, %v2584_v3 }
 0x709   : > { %2847 = vadd.xlane.f32.xlu1 %v2846_v62 }
 0x70a   : > { %v2588_v6 = vpop.f32.mrb[154].mxu0  ;;  %v2849_v13 = vsel %vm908_vm1, %v2734_v0, 0.0 }
 0x70b   : > { %v2590_v15 = vpop.f32.mrb[155].mxu0  ;;  %v2850_v17 = vadd.f32 %v2849_v13, %v2733_v7  ;;  %v2735_v28 = vmul.f32 %v2671_v8, %v2588_v6 }
 0x70c   : > { %v2736_v21 = vmul.f32 %v2672_v10, %v2590_v15 }
 0x70d   : > { %2851 = vadd.xlane.f32.xlu0 %v2850_v17 }
 0x70e   : > { %v2594_v59 = vpop.f32.mrb[156].mxu0  ;;  %v2853_v20 = vsel %vm908_vm1, %v2736_v21, 0.0 }
 0x70f   : > { %v2596_v22 = vpop.f32.mrb[157].mxu0  ;;  %v2854_v26 = vadd.f32 %v2853_v20, %v2735_v28  ;;  %v2737_v32 = vmul.f32 %v2673_v48, %v2594_v59 }
 0x710   : > { %v2738_v27 = vmul.f32 %v2674_v57, %v2596_v22 }
 0x711   : > { %2855 = vadd.xlane.f32.xlu1 %v2854_v26  ;;  %v4620_v26 = vld [vmem:[%s7915_s5 + $0x108] sm:$0xff] }
 0x712   : > { %v2600_v40 = vpop.f32.mrb[158].mxu0  ;;  %v2857_v46 = vsel %vm908_vm1, %v2738_v27, 0.0  ;;  %2970 = vmatprep.mubr.f32.mxu1 %v4620_v26 }
 0x713   : > { %v2602_v29 = vpop.f32.mrb[159].mxu0  ;;  %v2858_v49 = vadd.f32 %v2857_v46, %v2737_v32  ;;  %v2739_v41 = vmul.f32 %v2675_v42, %v2600_v40 }
 0x714   : > { %v2740_v33 = vmul.f32 %v2676_v34, %v2602_v29 }
 0x715   : > { %2859 = vadd.xlane.f32.xlu0 %v2858_v49 }
 0x716   : > { %v2606_v19 = vpop.f32.mrb[160].mxu0  ;;  %v2861_v38 = vsel %vm908_vm1, %v2740_v33, 0.0 }
 0x717   : > { %v2608_v1 = vpop.f32.mrb[161].mxu0  ;;  %v2862_v56 = vadd.f32 %v2861_v38, %v2739_v41  ;;  %v2741_v47 = vmul.f32 %v2677_v51, %v2606_v19 }
 0x718   : > { %v2742_v2 = vmul.f32 %v2678_v43, %v2608_v1 }
 0x719   : > { %2863 = vadd.xlane.f32.xlu1 %v2862_v56 }
 0x71a   : > { %v2612_v25 = vpop.f32.mrb[162].mxu0  ;;  %v2865_v9 = vsel %vm908_vm1, %v2742_v2, 0.0 }
 0x71b   : > { %v2614_v18 = vpop.f32.mrb[163].mxu0  ;;  %v2866_v52 = vadd.f32 %v2865_v9, %v2741_v47  ;;  %v2743_v50 = vmul.f32 %v2679_v37, %v2612_v25 }
 0x71c   : > { %v2744_v58 = vmul.f32 %v2680_v11, %v2614_v18 }
 0x71d   : > { %2867 = vadd.xlane.f32.xlu0 %v2866_v52 }
 0x71e   : > { %v2869_v54 = vsel %vm908_vm1, %v2744_v58, 0.0  ;;  %v6851_v63 = vpop.f32.mrb[164].mxu0 }
 0x71f   : > { %v2870_v3 = vadd.f32 %v2869_v54, %v2743_v50  ;;  %v6853_v62 = vpop.f32.mrb[165].mxu0 }
 0x720   : > { %v6855_v0 = vpop.f32.mrb[166].mxu0 }
 0x721   : > { %2803 = vadd.xlane.f32.xlu0 %v6734_v14  ;;  %2871 = vadd.xlane.f32.xlu1 %v2870_v3  ;;  %v6860_v10 = vpop.f32.mrb[167].mxu0 }
 0x725   : > { %2807 = vadd.xlane.f32.xlu1 %v6743_v60 }
 0x726   : > { %v6865_v8 = vpop.f32.mrb[168].mxu0 }
 0x727   : > { %v6867_v13 = vpop.f32.mrb[169].mxu0 }
 0x728   : > { %v6869_v15 = vpop.f32.mrb[170].mxu0 }
 0x729   : > { %v6873_v17 = vpop.f32.mrb[171].mxu0 }
 0x72e   : > { %v6877_v28 = vpop.f32.mrb[172].mxu0 }
 0x72f   : > { %v6879_v57 = vpop.f32.mrb[173].mxu0 }
 0x730   : > { %v6881_v59 = vpop.f32.mrb[174].mxu0 }
 0x731   : > { %v6885_v48 = vpop.f32.mrb[175].mxu0 }
 0x732   : > { %v2748_v54 = vpop.xlane.xlu0 %2747 }
 0x736   : > { %v6889_v22 = vpop.f32.mrb[176].mxu0  ;;  %v2752_v1 = vpop.xlane.xlu1 %2751 }
 0x737   : > { %v6894_v27 = vpop.f32.mrb[177].mxu0 }
 0x738   : > { %v6896_v32 = vpop.f32.mrb[178].mxu0 }
 0x739   : > { %v6900_v40 = vpop.f32.mrb[179].mxu0 }
 0x73a   : > { %v2756_v2 = vpop.xlane.xlu0 %2755 }
 0x73e   : > { %v6904_v46 = vpop.f32.mrb[180].mxu0  ;;  %v2760_v33 = vpop.xlane.xlu1 %2759 }
 0x73f   : > { %v6906_v29 = vpop.f32.mrb[181].mxu0 }
 0x740   : > { %v6908_v49 = vpop.f32.mrb[182].mxu0 }
 0x741   : > { %v6912_v41 = vpop.f32.mrb[183].mxu0 }
 0x742   : > { %v2764_v42 = vpop.xlane.xlu0 %2763 }
 0x746   : > { %v6916_v19 = vpop.f32.mrb[184].mxu0  ;;  %v2768_v3 = vpop.xlane.xlu1 %2767 }
 0x747   : > { %v6918_v51 = vpop.f32.mrb[185].mxu0 }
 0x748   : > { %v6920_v38 = vpop.f32.mrb[186].mxu0 }
 0x749   : > { %v6924_v56 = vpop.f32.mrb[187].mxu0 }
 0x74a   : > { %v2772_v21 = vpop.xlane.xlu0 %2771 }
 0x74e   : > { %v6928_v47 = vpop.f32.mrb[188].mxu0  ;;  %v2776_v37 = vpop.xlane.xlu1 %2775 }
 0x74f   : > { %v6930_v11 = vpop.f32.mrb[189].mxu0 }
 0x750   : > { %v6932_v25 = vpop.f32.mrb[190].mxu0 }
 0x751   : > { %v6936_v9 = vpop.f32.mrb[191].mxu0 }
 0x752   : > { %v2780_v23 = vpop.xlane.xlu0 %2779 }
 0x756   : > { %v6940_v52 = vpop.f32.mrb[192].mxu0  ;;  %v2784_v60 = vpop.xlane.xlu1 %2783 }
 0x757   : > { %v6942_v58 = vpop.f32.mrb[193].mxu0 }
 0x758   : > { %v6944_v50 = vpop.f32.mrb[194].mxu0 }
 0x759   : > { %v6948_v26 = vpop.f32.mrb[195].mxu0 }
 0x75a   : > { %v6976_v5 = vpop.xlane.xlu0 %2787 }
 0x75e   : > { %v6952_v43 = vpop.f32.mrb[196].mxu0  ;;  %v2792_v14 = vpop.xlane.xlu1 %2791 }
 0x75f   : > { %v6954_v18 = vpop.f32.mrb[197].mxu0 }
 0x760   : > { %v6956_v34 = vpop.f32.mrb[198].mxu0 }
 0x761   : > { %v6960_v20 = vpop.f32.mrb[199].mxu0 }
 0x762   : > { %v6984_v12 = vpop.xlane.xlu0 %2795 }
 0x766   : > { %v6964_v7 = vpop.f32.mrb[200].mxu0  ;;  %v2800_v36 = vpop.xlane.xlu1 %2799 }
 0x767   : > { %7965 = vst [vmem:[#allocation19_spill] sm:$0xff] %v6964_v7  ;;  %v6966_v6 = vpop.f32.mrb[201].mxu0 }
 0x768   : > { %7966 = vst [vmem:[#allocation20_spill] sm:$0xff] %v6966_v6  ;;  %v6968_v61 = vpop.f32.mrb[202].mxu0 }
 0x769   : > { %7967 = vst [vmem:[#allocation21_spill] sm:$0xff] %v6968_v61  ;;  %v6972_v35 = vpop.f32.mrb[203].mxu0  ;;  %v5132_v61 = vpack.c.bf16 %v2752_v1, %v2748_v54  ;;  %v5136_v1 = vpack.c.bf16 %v2760_v33, %v2756_v2  ;;  %v5140_v33 = vpack.c.bf16 %v2768_v3, %v2764_v42  ;;  %v5148_v3 = vpack.c.bf16 %v2784_v60, %v2780_v23 }
 0x76e   : > { %v6978_v31 = vpop.f32.mrb[204].mxu0 }
 0x76f   : > { %7968 = vst [vmem:[#allocation22_spill] sm:$0xff] %v6978_v31  ;;  %v6980_v16 = vpop.f32.mrb[205].mxu0 }
 0x770   : > { %7969 = vst [vmem:[#allocation23_spill] sm:$0xff] %v6980_v16  ;;  %v6982_v39 = vpop.f32.mrb[206].mxu0 }
 0x771   : > { %7970 = vst [vmem:[#allocation24_spill] sm:$0xff] %v6982_v39  ;;  %v6988_v44 = vpop.f32.mrb[207].mxu0 }
 0x772   : > { %7971 = vst [vmem:[#allocation25_spill] sm:$0xff] %v6988_v44  ;;  %v2812_v30 = vpop.xlane.xlu0 %2811 }
 0x776   : > { %v2816_v24 = vpop.xlane.xlu1 %2815  ;;  %v6992_v4 = vpop.f32.mrb[208].mxu0 }
 0x777   : > { %7972 = vst [vmem:[#allocation26_spill] sm:$0xff] %v6992_v4  ;;  %v5130_v55 = vpack.c.bf16 %v2816_v24, %v2812_v30  ;;  %v6994_v7 = vpop.f32.mrb[209].mxu0 }
 0x778   : > { %v6996_v6 = vpop.f32.mrb[210].mxu0 }
 0x779   : > { %7973 = vst [vmem:[#allocation27_spill] sm:$0xff] %v6996_v6  ;;  %5131 = vmatprep.subr.bf16.mxu1 %v5130_v55  ;;  %v7000_v31 = vpop.f32.mrb[211].mxu0 }
 0x77a   : > { %5133 = vmatpush3.bf16.msra.mxu1 %v5132_v61  ;;  %v2820_v39 = vpop.xlane.xlu0 %2819 }
 0x77e   : > { %v2824_v16 = vpop.xlane.xlu1 %2823  ;;  %v7004_v44 = vpop.f32.mrb[212].mxu0 }
 0x77f   : > { %7974 = vst [vmem:[#allocation28_spill] sm:$0xff] %v7004_v44  ;;  %v5134_v24 = vpack.c.bf16 %v2824_v16, %v2820_v39  ;;  %v7006_v30 = vpop.f32.mrb[213].mxu0 }
 0x780   : > { %7975 = vst [vmem:[#allocation29_spill] sm:$0xff] %v7006_v30  ;;  %v7008_v54 = vpop.f32.mrb[214].mxu0  ;;  %v5144_v30 = vpack.c.bf16 %v2776_v37, %v2772_v21 }
 0x781   : > { %7976 = vst [vmem:[#allocation30_spill] sm:$0xff] %v7008_v54  ;;  %5135 = vmatprep.subr.bf16.mxu1 %v5134_v24  ;;  %v7012_v53 = vpop.f32.mrb[215].mxu0 }
 0x782   : > { %5137 = vmatpush3.bf16.msra.mxu1 %v5136_v1  ;;  %v2828_v45 = vpop.xlane.xlu0 %2827 }
 0x786   : > { %v2832_v4 = vpop.xlane.xlu1 %2831  ;;  %v7016_v6 = vpop.f32.mrb[216].mxu0 }
 0x787   : > { %7977 = vst [vmem:[#allocation31_spill] sm:$0xff] %v7016_v6  ;;  %v5138_v39 = vpack.c.bf16 %v2832_v4, %v2828_v45  ;;  %v7018_v16 = vpop.f32.mrb[217].mxu0 }
 0x788   : > { %7978 = vst [vmem:[#allocation32_spill] sm:$0xff] %v7018_v16  ;;  %v7020_v2 = vpop.f32.mrb[218].mxu0 }
 0x789   : > { %7979 = vst [vmem:[#allocation33_spill] sm:$0xff] %v7020_v2  ;;  %5139 = vmatprep.subr.bf16.mxu1 %v5138_v39  ;;  %v7024_v55 = vpop.f32.mrb[219].mxu0 }
 0x78a   : > { %5141 = vmatpush3.bf16.msra.mxu1 %v5140_v33  ;;  %v2836_v61 = vpop.xlane.xlu0 %2835  ;;  %v5152_v33 = vpack.c.bf16 %v2792_v14, %v6976_v5  ;;  %v4619_v5 = vld [vmem:[%s7915_s5 + $0x100] sm:$0xff]  ;;  %v4621_v14 = vld [vmem:[%s7915_s5 + $0x110] sm:$0xff] }
 0x78e   : > { %v2840_v44 = vpop.xlane.xlu1 %2839 }
 0x78f   : > { %v5142_v54 = vpack.c.bf16 %v2840_v44, %v2836_v61  ;;  %v5156_v44 = vpack.c.bf16 %v2800_v36, %v6984_v12  ;;  %v4622_v36 = vld [vmem:[%s7915_s5 + $0x118] sm:$0xff]  ;;  %v7981_v12 = vpack.c.bf16 %v6855_v0, %v6851_v63  ;;  %v7982_v61 = vpack.c.bf16 %v6873_v17, %v6867_v13  ;;  %v4623_v63 = vld [vmem:[%s7915_s5 + $0x120] sm:$0xff] }
 0x790   : > { %v7984_v0 = vpack.c.bf16 %v6885_v48, %v6879_v57  ;;  %v4626_v13 = vld [vmem:[%s7915_s5 + $0x138] sm:$0xff]  ;;  %v7985_v17 = vpack.c.bf16 %v6881_v59, %v6877_v28  ;;  %v4628_v57 = vld [vmem:[%s7915_s5 + $0x148] sm:$0xff]  ;;  %v7987_v48 = vpack.c.bf16 %v6896_v32, %v6889_v22  ;;  %v4627_v28 = vld [vmem:[%s7915_s5 + $0x140] sm:$0xff]  ;;  %v7988_v59 = vpack.c.bf16 %v6912_v41, %v6906_v29 }
 0x791   : > { %5143 = vmatprep.subr.bf16.mxu1 %v5142_v54  ;;  %v4629_v22 = vld [vmem:[%s7915_s5 + $0x150] sm:$0xff]  ;;  %v7990_v32 = vpack.c.bf16 %v6924_v56, %v6918_v51  ;;  %v4632_v29 = vld [vmem:[%s7915_s5 + $0x168] sm:$0xff]  ;;  %v7991_v41 = vpack.c.bf16 %v6920_v38, %v6916_v19  ;;  %v4634_v51 = vld [vmem:[%s7915_s5 + $0x178] sm:$0xff]  ;;  %v7993_v56 = vpack.c.bf16 %v6932_v25, %v6928_v47  ;;  %v7994_v38 = vpack.c.bf16 %v6948_v26, %v6942_v58 }
 0x792   : > { %5145 = vmatpush3.bf16.msra.mxu1 %v5144_v30  ;;  %v2844_v4 = vpop.xlane.xlu0 %2843  ;;  %v4633_v19 = vld [vmem:[%s7915_s5 + $0x170] sm:$0xff]  ;;  %v4635_v47 = vld [vmem:[%s7915_s5 + $0x180] sm:$0xff]  ;;  %v7996_v25 = vpack.c.bf16 %v6960_v20, %v6954_v18  ;;  %v4638_v58 = vld [vmem:[%s7915_s5 + $0x198] sm:$0xff]  ;;  %v7997_v26 = vpack.c.bf16 %v6956_v34, %v6952_v43 }
 0x793   : > { %v4640_v20 = vld [vmem:[%s7915_s5 + $0x1a8] sm:$0xff]  ;;  %v8000_v18 = vld [vmem:[#allocation21_spill] sm:$0xff]  ;;  %v4639_v34 = vld [vmem:[%s7915_s5 + $0x1a0] sm:$0xff] }
 0x794   : > { %v8003_v43 = vld [vmem:[#allocation25_spill] sm:$0xff] }
 0x796   : > { %v2848_v45 = vpop.xlane.xlu1 %2847 }
 0x797   : > { %v5146_v42 = vpack.c.bf16 %v2848_v45, %v2844_v4  ;;  %v8006_v45 = vld [vmem:[#allocation24_spill] sm:$0xff] }
 0x799   : > { %5147 = vmatprep.subr.bf16.mxu1 %v5146_v42  ;;  %v8007_v42 = vld [vmem:[#allocation22_spill] sm:$0xff] }
 0x79a   : > { %5149 = vmatpush3.bf16.msra.mxu1 %v5148_v3  ;;  %v2852_v39 = vpop.xlane.xlu0 %2851  ;;  %v8008_v3 = vpack.c.bf16 %v8006_v45, %v8007_v42  ;;  %v3476_v45 = vld [vmem:[%s7913_s3 + $0x138] sm:$0xff]  ;;  %v3475_v42 = vld [vmem:[%s7913_s3 + $0x130] sm:$0xff] }
 0x79e   : > { %v2856_v24 = vpop.xlane.xlu1 %2855 }
 0x79f   : > { %v5150_v6 = vpack.c.bf16 %v2856_v24, %v2852_v39  ;;  %v4641_v39 = vld [vmem:[%s7915_s5 + $0x1b0] sm:$0xff] }
 0x7a1   : > { %5151 = vmatprep.subr.bf16.mxu1 %v5150_v6  ;;  %v7980_v6 = vpack.c.bf16 %v6860_v10, %v6853_v62  ;;  %v4624_v62 = vld [vmem:[%s7915_s5 + $0x128] sm:$0xff]  ;;  %v7983_v10 = vpack.c.bf16 %v6869_v15, %v6865_v8  ;;  %v4625_v8 = vld [vmem:[%s7915_s5 + $0x130] sm:$0xff]  ;;  %v7986_v15 = vpack.c.bf16 %v6900_v40, %v6894_v27  ;;  %v4630_v27 = vld [vmem:[%s7915_s5 + $0x158] sm:$0xff]  ;;  %v7989_v40 = vpack.c.bf16 %v6908_v49, %v6904_v46 }
 0x7a2   : > { %5153 = vmatpush3.bf16.msra.mxu1 %v5152_v33  ;;  %v2860_v1 = vpop.xlane.xlu0 %2859  ;;  %v4631_v46 = vld [vmem:[%s7915_s5 + $0x160] sm:$0xff]  ;;  %v7992_v49 = vpack.c.bf16 %v6936_v9, %v6930_v11  ;;  %v4636_v11 = vld [vmem:[%s7915_s5 + $0x188] sm:$0xff]  ;;  %v7995_v9 = vpack.c.bf16 %v6944_v50, %v6940_v52  ;;  %v4637_v52 = vld [vmem:[%s7915_s5 + $0x190] sm:$0xff]  ;;  %v8009_v33 = vpack.c.bf16 %v7000_v31, %v6994_v7 }
 0x7a3   : > { %v7998_v50 = vld [vmem:[#allocation20_spill] sm:$0xff]  ;;  %v4646_v31 = vld [vmem:[%s7915_s5 + $0x1d8] sm:$0xff] }
 0x7a4   : > { %v8015_v7 = vld [vmem:[#allocation30_spill] sm:$0xff] }
 0x7a6   : > { %v2864_v2 = vpop.xlane.xlu1 %2863 }
 0x7a7   : > { %v5154_v16 = vpack.c.bf16 %v2864_v2, %v2860_v1  ;;  %v8001_v2 = vld [vmem:[#allocation19_spill] sm:$0xff] }
 0x7a8   : > { %v8002_v24 = vpack.c.bf16 %v8000_v18, %v8001_v2  ;;  %v8004_v1 = vld [vmem:[#allocation23_spill] sm:$0xff]  ;;  %v3468_v18 = vld [vmem:[%s7913_s3 + $0xf8] sm:$0xff]  ;;  %v3467_v2 = vld [vmem:[%s7913_s3 + $0xf0] sm:$0xff] }
 0x7a9   : > { %5155 = vmatprep.subr.bf16.mxu1 %v5154_v16  ;;  %v7999_v16 = vpack.c.bf16 %v6972_v35, %v7998_v50  ;;  %v8005_v4 = vpack.c.bf16 %v8003_v43, %v8004_v1  ;;  %v4642_v35 = vld [vmem:[%s7915_s5 + $0x1b8] sm:$0xff]  ;;  %v3463_v50 = vld [vmem:[%s7913_s3 + $0xd0] sm:$0xff] }
 0x7aa   : > { %5157 = vmatpush3.bf16.msra.mxu1 %v5156_v44  ;;  %v2868_v21 = vpop.xlane.xlu0 %2867  ;;  %v4644_v44 = vld [vmem:[%s7915_s5 + $0x1c8] sm:$0xff]  ;;  %v3472_v43 = vld [vmem:[%s7913_s3 + $0x118] sm:$0xff]  ;;  %v3471_v1 = vld [vmem:[%s7913_s3 + $0x110] sm:$0xff] }
 0x7ae   : > { %v2872_v37 = vpop.xlane.xlu1 %2871  ;;  %v2804_v23 = vpop.xlane.xlu0 %2803 }
 0x7af   : > { %v5158_v30 = vpack.c.bf16 %v2872_v37, %v2868_v21  ;;  %v8010_v21 = vld [vmem:[#allocation27_spill] sm:$0xff]  ;;  %v8011_v37 = vld [vmem:[#allocation26_spill] sm:$0xff] }
 0x7b1   : > { %5159 = vmatprep.subr.bf16.mxu1 %v5158_v30  ;;  %v8012_v30 = vpack.c.bf16 %v8010_v21, %v8011_v37  ;;  %v3482_v21 = vld [vmem:[%s7913_s3 + $0x168] sm:$0xff]  ;;  %v3481_v37 = vld [vmem:[%s7913_s3 + $0x160] sm:$0xff] }
 0x7b2   : > { %v2808_v60 = vpop.xlane.xlu1 %2807 }
 0x7b3   : > { %v5160_v54 = vpack.c.bf16 %v2808_v60, %v2804_v23  ;;  %v4643_v23 = vld [vmem:[%s7915_s5 + $0x1c0] sm:$0xff]  ;;  %v8013_v60 = vld [vmem:[#allocation29_spill] sm:$0xff] }
 0x7b5   : > { %5161 = vmatpush3.bf16.msra.mxu1 %v5160_v54  ;;  %v8014_v54 = vpack.c.bf16 %v7012_v53, %v8013_v60  ;;  %v8018_v53 = vld [vmem:[#allocation32_spill] sm:$0xff] }
 0x7b6   : > { %5163 = vmatprep.subr.bf16.mxu1 %v7980_v6  ;;  %v3486_v60 = vld [vmem:[%s7913_s3 + $0x188] sm:$0xff] }
 0x7b8   : > { %2971 = vmatmul.mubr.f32.vlgmr.msra.gmra.mrb[156].mxu1 %v4619_v5  ;;  %v8016_v5 = vld [vmem:[#allocation28_spill] sm:$0xff] }
 0x7b9   : > { %5165 = vmatpush1.bf16.msra.mxu1 %v7981_v12  ;;  %2975 = vmatprep.mubr.f32.mxu1 %v4622_v36  ;;  %v8017_v6 = vpack.c.bf16 %v8015_v7, %v8016_v5  ;;  %v4645_v36 = vld [vmem:[%s7915_s5 + $0x1d0] sm:$0xff]  ;;  %v4648_v12 = vld [vmem:[%s7915_s5 + $0x1e8] sm:$0xff] }
 0x7ba   : > { %5167 = vmatprep.subr.bf16.mxu1 %v7982_v61  ;;  %v4647_v61 = vld [vmem:[%s7915_s5 + $0x1e0] sm:$0xff]  ;;  %v3487_v7 = vld [vmem:[%s7913_s3 + $0x190] sm:$0xff]  ;;  %v3490_v5 = vld [vmem:[%s7913_s3 + $0x1a8] sm:$0xff] }
 0x7bc   : > { %2976 = vmatmul.mubr.f32.gmra.mrb[158].mxu1 %v4621_v14  ;;  %v8019_v14 = vpack.c.bf16 %v7024_v55, %v8018_v53  ;;  %v4649_v55 = vld [vmem:[%s7915_s5 + $0x1f0] sm:$0xff]  ;;  %v3494_v53 = vld [vmem:[%s7913_s3 + $0x1c8] sm:$0xff] }
 0x7bd   : > { %5169 = vmatpush1.bf16.msra.mxu1 %v7983_v10  ;;  %2980 = vmatprep.mubr.f32.mxu1 %v4624_v62  ;;  %v8020_v62 = vld [vmem:[#allocation33_spill] sm:$0xff]  ;;  %v8021_v10 = vld [vmem:[#allocation31_spill] sm:$0xff] }
 0x7be   : > { %5171 = vmatprep.subr.bf16.mxu1 %v7984_v0  ;;  %v4650_v0 = vld [vmem:[%s7915_s5 + $0x1f8] sm:$0xff] }
 0x7c0   : > { %2981 = vmatmul.mubr.f32.gmra.mrb[160].mxu1 %v4623_v63  ;;  %v8022_v63 = vpack.c.bf16 %v8020_v62, %v8021_v10  ;;  %v3495_v62 = vld [vmem:[%s7913_s3 + $0x1d0] sm:$0xff]  ;;  %v3498_v10 = vld [vmem:[%s7913_s3 + $0x1e8] sm:$0xff] }
 0x7c1   : > { %5173 = vmatpush1.bf16.msra.mxu1 %v7985_v17  ;;  %2985 = vmatprep.mubr.f32.mxu1 %v4626_v13  ;;  %v3438_v13 = vld [vmem:[%s7913_s3 + $0x8] sm:$0xff]  ;;  %v3437_v17 = vld [vmem:[%s7913_s3] sm:$0xff] }
 0x7c2   : > { %5175 = vmatprep.subr.bf16.mxu1 %v7986_v15  ;;  %v3439_v15 = vld [vmem:[%s7913_s3 + $0x10] sm:$0xff] }
 0x7c4   : > { %2986 = vmatmul.mubr.f32.gmra.mrb[162].mxu1 %v4625_v8  ;;  %v3440_v8 = vld [vmem:[%s7913_s3 + $0x18] sm:$0xff] }
 0x7c5   : > { %5177 = vmatpush1.bf16.msra.mxu1 %v7987_v48  ;;  %2990 = vmatprep.mubr.f32.mxu1 %v4628_v57  ;;  %v3442_v57 = vld [vmem:[%s7913_s3 + $0x28] sm:$0xff]  ;;  %v3441_v48 = vld [vmem:[%s7913_s3 + $0x20] sm:$0xff] }
 0x7c6   : > { %5179 = vmatprep.subr.bf16.mxu1 %v7988_v59  ;;  %v3443_v59 = vld [vmem:[%s7913_s3 + $0x30] sm:$0xff] }
 0x7c8   : > { %2991 = vmatmul.mubr.f32.gmra.mrb[164].mxu1 %v4627_v28  ;;  %v3444_v28 = vld [vmem:[%s7913_s3 + $0x38] sm:$0xff] }
 0x7c9   : > { %5181 = vmatpush1.bf16.msra.mxu1 %v7989_v40  ;;  %2995 = vmatprep.mubr.f32.mxu1 %v4630_v27  ;;  %v3446_v27 = vld [vmem:[%s7913_s3 + $0x48] sm:$0xff]  ;;  %v3445_v40 = vld [vmem:[%s7913_s3 + $0x40] sm:$0xff] }
 0x7ca   : > { %5183 = vmatprep.subr.bf16.mxu1 %v7990_v32  ;;  %v3447_v32 = vld [vmem:[%s7913_s3 + $0x50] sm:$0xff] }
 0x7cc   : > { %2996 = vmatmul.mubr.f32.gmra.mrb[166].mxu1 %v4629_v22  ;;  %v3448_v22 = vld [vmem:[%s7913_s3 + $0x58] sm:$0xff] }
 0x7cd   : > { %5185 = vmatpush1.bf16.msra.mxu1 %v7991_v41  ;;  %3000 = vmatprep.mubr.f32.mxu1 %v4632_v29  ;;  %v3450_v29 = vld [vmem:[%s7913_s3 + $0x68] sm:$0xff]  ;;  %v3449_v41 = vld [vmem:[%s7913_s3 + $0x60] sm:$0xff] }
 0x7ce   : > { %5187 = vmatprep.subr.bf16.mxu1 %v7992_v49  ;;  %v3451_v49 = vld [vmem:[%s7913_s3 + $0x70] sm:$0xff] }
 0x7d0   : > { %3001 = vmatmul.mubr.f32.gmra.mrb[168].mxu1 %v4631_v46  ;;  %v3452_v46 = vld [vmem:[%s7913_s3 + $0x78] sm:$0xff] }
 0x7d1   : > { %5189 = vmatpush1.bf16.msra.mxu1 %v7993_v56  ;;  %3005 = vmatprep.mubr.f32.mxu1 %v4634_v51  ;;  %v3454_v51 = vld [vmem:[%s7913_s3 + $0x88] sm:$0xff]  ;;  %v3453_v56 = vld [vmem:[%s7913_s3 + $0x80] sm:$0xff] }
 0x7d2   : > { %5191 = vmatprep.subr.bf16.mxu1 %v7994_v38  ;;  %v3455_v38 = vld [vmem:[%s7913_s3 + $0x90] sm:$0xff] }
 0x7d4   : > { %3006 = vmatmul.mubr.f32.gmra.mrb[170].mxu1 %v4633_v19  ;;  %v3456_v19 = vld [vmem:[%s7913_s3 + $0x98] sm:$0xff] }
 0x7d5   : > { %5193 = vmatpush1.bf16.msra.mxu1 %v7995_v9  ;;  %3010 = vmatprep.mubr.f32.mxu1 %v4636_v11  ;;  %v3458_v11 = vld [vmem:[%s7913_s3 + $0xa8] sm:$0xff]  ;;  %v3457_v9 = vld [vmem:[%s7913_s3 + $0xa0] sm:$0xff] }
 0x7d6   : > { %5195 = vmatprep.subr.bf16.mxu1 %v7996_v25  ;;  %v3459_v25 = vld [vmem:[%s7913_s3 + $0xb0] sm:$0xff] }
 0x7d8   : > { %3011 = vmatmul.mubr.f32.gmra.mrb[172].mxu1 %v4635_v47  ;;  %v3460_v47 = vld [vmem:[%s7913_s3 + $0xb8] sm:$0xff] }
 0x7d9   : > { %5197 = vmatpush1.bf16.msra.mxu1 %v7997_v26  ;;  %3015 = vmatprep.mubr.f32.mxu1 %v4638_v58  ;;  %v3462_v58 = vld [vmem:[%s7913_s3 + $0xc8] sm:$0xff]  ;;  %v3461_v26 = vld [vmem:[%s7913_s3 + $0xc0] sm:$0xff] }
 0x7da   : > { %5199 = vmatprep.subr.bf16.mxu1 %v7999_v16  ;;  %v3466_v16 = vld [vmem:[%s7913_s3 + $0xe8] sm:$0xff] }
 0x7dc   : > { %3016 = vmatmul.mubr.f32.gmra.mrb[174].mxu1 %v4637_v52  ;;  %v3464_v52 = vld [vmem:[%s7913_s3 + $0xd8] sm:$0xff] }
 0x7dd   : > { %5201 = vmatpush1.bf16.msra.mxu1 %v8002_v24  ;;  %3020 = vmatprep.mubr.f32.mxu1 %v4640_v20  ;;  %v3465_v20 = vld [vmem:[%s7913_s3 + $0xe0] sm:$0xff]  ;;  %v3470_v24 = vld [vmem:[%s7913_s3 + $0x108] sm:$0xff] }
 0x7de   : > { %5203 = vmatprep.subr.bf16.mxu1 %v8005_v4  ;;  %v3474_v4 = vld [vmem:[%s7913_s3 + $0x128] sm:$0xff] }
 0x7e0   : > { %3021 = vmatmul.mubr.f32.gmra.mrb[176].mxu1 %v4639_v34  ;;  %v3469_v34 = vld [vmem:[%s7913_s3 + $0x100] sm:$0xff] }
 0x7e1   : > { %5205 = vmatpush1.bf16.msra.mxu1 %v8008_v3  ;;  %3025 = vmatprep.mubr.f32.mxu1 %v4642_v35  ;;  %v3473_v35 = vld [vmem:[%s7913_s3 + $0x120] sm:$0xff]  ;;  %v3478_v3 = vld [vmem:[%s7913_s3 + $0x148] sm:$0xff] }
 0x7e2   : > { %5207 = vmatprep.subr.bf16.mxu1 %v8009_v33  ;;  %v3480_v33 = vld [vmem:[%s7913_s3 + $0x158] sm:$0xff] }
 0x7e4   : > { %3026 = vmatmul.mubr.f32.gmra.mrb[178].mxu1 %v4641_v39  ;;  %v3477_v39 = vld [vmem:[%s7913_s3 + $0x140] sm:$0xff] }
 0x7e5   : > { %5209 = vmatpush1.bf16.msra.mxu1 %v8012_v30  ;;  %3030 = vmatprep.mubr.f32.mxu1 %v4644_v44  ;;  %v3479_v44 = vld [vmem:[%s7913_s3 + $0x150] sm:$0xff]  ;;  %v3484_v30 = vld [vmem:[%s7913_s3 + $0x178] sm:$0xff] }
 0x7e6   : > { %5211 = vmatprep.subr.bf16.mxu1 %v8014_v54  ;;  %v3485_v54 = vld [vmem:[%s7913_s3 + $0x180] sm:$0xff] }
 0x7e8   : > { %3031 = vmatmul.mubr.f32.gmra.mrb[180].mxu1 %v4643_v23  ;;  %v3483_v23 = vld [vmem:[%s7913_s3 + $0x170] sm:$0xff] }
 0x7e9   : > { %5213 = vmatpush1.bf16.msra.mxu1 %v8017_v6  ;;  %3035 = vmatprep.mubr.f32.mxu1 %v4646_v31  ;;  %v3488_v31 = vld [vmem:[%s7913_s3 + $0x198] sm:$0xff]  ;;  %v3489_v6 = vld [vmem:[%s7913_s3 + $0x1a0] sm:$0xff] }
 0x7ea   : > { %5215 = vmatprep.subr.bf16.mxu1 %v8019_v14  ;;  %v3493_v14 = vld [vmem:[%s7913_s3 + $0x1c0] sm:$0xff] }
 0x7ec   : > { %3036 = vmatmul.mubr.f32.gmra.mrb[182].mxu1 %v4645_v36  ;;  %v3492_v36 = vld [vmem:[%s7913_s3 + $0x1b8] sm:$0xff] }
 0x7ed   : > { %3040 = vmatprep.mubr.f32.mxu1 %v4648_v12  ;;  %5217 = vmatpush1.bf16.msra.mxu1 %v8022_v63  ;;  %v3491_v12 = vld [vmem:[%s7913_s3 + $0x1b0] sm:$0xff]  ;;  %v3497_v63 = vld [vmem:[%s7913_s3 + $0x1e0] sm:$0xff] }
 0x7f0   : > { %3041 = vmatmul.mubr.f32.gmra.mrb[184].mxu1 %v4647_v61  ;;  %v3496_v61 = vld [vmem:[%s7913_s3 + $0x1d8] sm:$0xff] }
 0x7f1   : > { %3045 = vmatprep.mubr.f32.mxu1 %v4650_v0  ;;  %v3500_v0 = vld [vmem:[%s7913_s3 + $0x1f8] sm:$0xff] }
 0x7f4   : > { %3046 = vmatmul.mubr.f32.gmra.mrb[186].mxu1 %v4649_v55  ;;  %v3499_v55 = vld [vmem:[%s7913_s3 + $0x1f0] sm:$0xff] }
 0x7f5   : > { %4679 = vmatprep.mubr.msk.f32.mxu1 %vm908_vm1, %v3438_v13  ;;  %v578_v13 = vld [vmem:[%s7916_s6] sm:$0xff] }
 0x7f8   : > { %3662 = vmatmul.mubr.f32.vlgmr.msra.gmra.mrb[188].mxu1 %v3437_v17 }
 0x7f9   : > { %4680 = vmatprep.mubr.msk.f32.mxu1 %vm908_vm1, %v3440_v8 }
 0x7fc   : > { %3668 = vmatmul.mubr.f32.gmra.mrb[190].mxu1 %v3439_v15  ;;  %v8023_v15 = vld [vmem:[#allocation3_spill] sm:$0xff] }
 0x7fd   : > { %4681 = vmatprep.mubr.msk.f32.mxu1 %vm908_vm1, %v3442_v57  ;;  %v1814_v57 = vadd.f32 %v8023_v15, %v578_v13 }
 0x800   : > { %3674 = vmatmul.mubr.f32.gmra.mrb[192].mxu1 %v3441_v48 }
 0x801   : > { %4682 = vmatprep.mubr.msk.f32.mxu1 %vm908_vm1, %v3444_v28  ;;  %v579_v28 = vld [vmem:[%s7916_s6 + $0x8] sm:$0xff] }
 0x804   : > { %3680 = vmatmul.mubr.f32.gmra.mrb[194].mxu1 %v3443_v59 }
 0x805   : > { %4683 = vmatprep.mubr.msk.f32.mxu1 %vm908_vm1, %v3446_v27 }
 0x808   : > { %3686 = vmatmul.mubr.f32.gmra.mrb[196].mxu1 %v3445_v40 }
 0x809   : > { %4684 = vmatprep.mubr.msk.f32.mxu1 %vm908_vm1, %v3448_v22  ;;  %v8024_v22 = vld [vmem:[#allocation4_spill] sm:$0xff] }
 0x80c   : > { %3692 = vmatmul.mubr.f32.gmra.mrb[198].mxu1 %v3447_v32  ;;  %v1815_v32 = vadd.f32 %v8024_v22, %v579_v28  ;;  %v8033_v22 = vld [vmem:[#allocation13_spill] sm:$0xff] }
 0x80d   : > { %4685 = vmatprep.mubr.msk.f32.mxu1 %vm908_vm1, %v3450_v29 }
 0x810   : > { %3698 = vmatmul.mubr.f32.gmra.mrb[200].mxu1 %v3449_v41  ;;  %v580_v41 = vld [vmem:[%s7916_s6 + $0x10] sm:$0xff] }
 0x811   : > { %4686 = vmatprep.mubr.msk.f32.mxu1 %vm908_vm1, %v3452_v46 }
 0x814   : > { %3704 = vmatmul.mubr.f32.gmra.mrb[202].mxu1 %v3451_v49 }
 0x815   : > { %4687 = vmatprep.mubr.msk.f32.mxu1 %vm908_vm1, %v3454_v51 }
 0x818   : > { %3710 = vmatmul.mubr.f32.gmra.mrb[204].mxu1 %v3453_v56  ;;  %v8025_v56 = vld [vmem:[#allocation5_spill] sm:$0xff] }
 0x819   : > { %4688 = vmatprep.mubr.msk.f32.mxu1 %vm908_vm1, %v3456_v19  ;;  %v1816_v19 = vadd.f32 %v8025_v56, %v580_v41  ;;  %v589_v41 = vld [vmem:[%s7916_s6 + $0x58] sm:$0xff] }
 0x81c   : > { %3716 = vmatmul.mubr.f32.gmra.mrb[206].mxu1 %v3455_v38 }
 0x81d   : > { %4689 = vmatprep.mubr.msk.f32.mxu1 %vm908_vm1, %v3458_v11  ;;  %v581_v11 = vld [vmem:[%s7916_s6 + $0x18] sm:$0xff] }
 0x820   : > { %3722 = vmatmul.mubr.f32.gmra.mrb[208].mxu1 %v3457_v9 }
 0x821   : > { %4690 = vmatprep.mubr.msk.f32.mxu1 %vm908_vm1, %v3460_v47 }
 0x824   : > { %3728 = vmatmul.mubr.f32.gmra.mrb[210].mxu1 %v3459_v25 }
 0x825   : > { %4691 = vmatprep.mubr.msk.f32.mxu1 %vm908_vm1, %v3462_v58  ;;  %v8026_v58 = vld [vmem:[#allocation6_spill] sm:$0xff] }
 0x828   : > { %3734 = vmatmul.mubr.f32.gmra.mrb[212].mxu1 %v3461_v26  ;;  %v1817_v26 = vadd.f32 %v8026_v58, %v581_v11 }
 0x829   : > { %4692 = vmatprep.mubr.msk.f32.mxu1 %vm908_vm1, %v3464_v52 }
 0x82c   : > { %3740 = vmatmul.mubr.f32.gmra.mrb[214].mxu1 %v3463_v50  ;;  %v582_v50 = vld [vmem:[%s7916_s6 + $0x20] sm:$0xff] }
 0x82d   : > { %4693 = vmatprep.mubr.msk.f32.mxu1 %vm908_vm1, %v3466_v16 }
 0x830   : > { %3746 = vmatmul.mubr.f32.gmra.mrb[216].mxu1 %v3465_v20 }
 0x831   : > { %4694 = vmatprep.mubr.msk.f32.mxu1 %vm908_vm1, %v3468_v18 }
 0x834   : > { %3752 = vmatmul.mubr.f32.gmra.mrb[218].mxu1 %v3467_v2  ;;  %v8027_v2 = vld [vmem:[#allocation7_spill] sm:$0xff] }
 0x835   : > { %4695 = vmatprep.mubr.msk.f32.mxu1 %vm908_vm1, %v3470_v24  ;;  %v1818_v24 = vadd.f32 %v8027_v2, %v582_v50 }
 0x838   : > { %3758 = vmatmul.mubr.f32.gmra.mrb[220].mxu1 %v3469_v34 }
 0x839   : > { %4696 = vmatprep.mubr.msk.f32.mxu1 %vm908_vm1, %v3472_v43  ;;  %v583_v43 = vld [vmem:[%s7916_s6 + $0x28] sm:$0xff] }
 0x83c   : > { %3764 = vmatmul.mubr.f32.gmra.mrb[222].mxu1 %v3471_v1 }
 0x83d   : > { %4697 = vmatprep.mubr.msk.f32.mxu1 %vm908_vm1, %v3474_v4 }
 0x840   : > { %3770 = vmatmul.mubr.f32.gmra.mrb[224].mxu1 %v3473_v35 }
 0x841   : > { %4698 = vmatprep.mubr.msk.f32.mxu1 %vm908_vm1, %v3476_v45  ;;  %v8028_v45 = vld [vmem:[#allocation8_spill] sm:$0xff] }
 0x844   : > { %3776 = vmatmul.mubr.f32.gmra.mrb[226].mxu1 %v3475_v42  ;;  %v1819_v42 = vadd.f32 %v8028_v45, %v583_v43  ;;  %v8036_v43 = vld [vmem:[#allocation16_spill] sm:$0xff]  ;;  %v592_v45 = vld [vmem:[%s7916_s6 + $0x70] sm:$0xff] }
 0x845   : > { %4699 = vmatprep.mubr.msk.f32.mxu1 %vm908_vm1, %v3478_v3 }
 0x848   : > { %3782 = vmatmul.mubr.f32.gmra.mrb[228].mxu1 %v3477_v39  ;;  %v584_v39 = vld [vmem:[%s7916_s6 + $0x30] sm:$0xff] }
 0x849   : > { %4700 = vmatprep.mubr.msk.f32.mxu1 %vm908_vm1, %v3480_v33 }
 0x84c   : > { %3788 = vmatmul.mubr.f32.gmra.mrb[230].mxu1 %v3479_v44 }
 0x84d   : > { %4701 = vmatprep.mubr.msk.f32.mxu1 %vm908_vm1, %v3482_v21 }
 0x850   : > { %3794 = vmatmul.mubr.f32.gmra.mrb[232].mxu1 %v3481_v37  ;;  %v8029_v37 = vld [vmem:[#allocation9_spill] sm:$0xff] }
 0x851   : > { %4702 = vmatprep.mubr.msk.f32.mxu1 %vm908_vm1, %v3484_v30  ;;  %v1820_v30 = vadd.f32 %v8029_v37, %v584_v39 }
 0x854   : > { %3800 = vmatmul.mubr.f32.gmra.mrb[234].mxu1 %v3483_v23 }
 0x855   : > { %4703 = vmatprep.mubr.msk.f32.mxu1 %vm908_vm1, %v3486_v60  ;;  %v585_v60 = vld [vmem:[%s7916_s6 + $0x38] sm:$0xff] }
 0x858   : > { %3806 = vmatmul.mubr.f32.gmra.mrb[236].mxu1 %v3485_v54 }
 0x859   : > { %4704 = vmatprep.mubr.msk.f32.mxu1 %vm908_vm1, %v3488_v31 }
 0x85c   : > { %3812 = vmatmul.mubr.f32.gmra.mrb[238].mxu1 %v3487_v7 }
 0x85d   : > { %4705 = vmatprep.mubr.msk.f32.mxu1 %vm908_vm1, %v3490_v5  ;;  %v8030_v5 = vld [vmem:[#allocation10_spill] sm:$0xff] }
 0x860   : > { %3818 = vmatmul.mubr.f32.gmra.mrb[240].mxu1 %v3489_v6  ;;  %v1821_v6 = vadd.f32 %v8030_v5, %v585_v60 }
 0x861   : > { %4706 = vmatprep.mubr.msk.f32.mxu1 %vm908_vm1, %v3492_v36 }
 0x864   : > { %3824 = vmatmul.mubr.f32.gmra.mrb[242].mxu1 %v3491_v12  ;;  %v586_v12 = vld [vmem:[%s7916_s6 + $0x40] sm:$0xff] }
 0x865   : > { %4707 = vmatprep.mubr.msk.f32.mxu1 %vm908_vm1, %v3494_v53 }
 0x868   : > { %3830 = vmatmul.mubr.f32.gmra.mrb[244].mxu1 %v3493_v14 }
 0x869   : > { %4708 = vmatprep.mubr.msk.f32.mxu1 %vm908_vm1, %v3496_v61 }
 0x86c   : > { %3836 = vmatmul.mubr.f32.gmra.mrb[246].mxu1 %v3495_v62  ;;  %v8031_v62 = vld [vmem:[#allocation11_spill] sm:$0xff] }
 0x86d   : > { %4709 = vmatprep.mubr.msk.f32.mxu1 %vm908_vm1, %v3498_v10  ;;  %v1822_v10 = vadd.f32 %v8031_v62, %v586_v12 }
 0x870   : > { %3842 = vmatmul.mubr.f32.gmra.mrb[248].mxu1 %v3497_v63 }
 0x871   : > { %4710 = vmatprep.mubr.msk.f32.mxu1 %vm908_vm1, %v3500_v0  ;;  %v587_v0 = vld [vmem:[%s7916_s6 + $0x48] sm:$0xff] }
 0x874   : > { %3848 = vmatmul.mubr.f32.gmra.mrb[250].mxu1 %v3499_v55 }
 0x88b   : > { %v4858_v17 = vpop.f32.mrb[156].mxu1 }
 0x88c   : > { %v4859_v8 = vpop.f32.mrb[157].mxu1 }
 0x88d   : > { %v4860_v48 = vadd.f32 %v4859_v8, %v4858_v17  ;;  %v8032_v8 = vld [vmem:[#allocation12_spill] sm:$0xff] }
 0x88e   : > { %v1823_v15 = vadd.f32 %v8032_v8, %v587_v0  ;;  %v3857_v0 = vld [vmem:[%s7914_s4 + $0x18] sm:$0xff] }
 0x88f   : > { %v7438_v59 = vadd.f32 %v4860_v48, %v1814_v57  ;;  %v4861_v27 = vpop.f32.mrb[158].mxu1  ;;  %v588_v48 = vld [vmem:[%s7916_s6 + $0x50] sm:$0xff] }
 0x890   : > { %v4862_v40 = vpop.f32.mrb[159].mxu1 }
 0x891   : > { %v4863_v29 = vadd.f32 %v4862_v40, %v4861_v27 }
 0x893   : > { %v7444_v46 = vadd.f32 %v4863_v29, %v1815_v32  ;;  %v4864_v49 = vpop.f32.mrb[160].mxu1  ;;  %v1824_v32 = vadd.f32 %v8033_v22, %v588_v48 }
 0x894   : > { %v4865_v51 = vpop.f32.mrb[161].mxu1 }
 0x895   : > { %v4866_v38 = vadd.f32 %v4865_v51, %v4864_v49 }
 0x897   : > { %v7450_v9 = vadd.f32 %v4866_v38, %v1816_v19  ;;  %v4867_v47 = vpop.f32.mrb[162].mxu1  ;;  %v8034_v19 = vld [vmem:[#allocation14_spill] sm:$0xff] }
 0x898   : > { %v4868_v25 = vpop.f32.mrb[163].mxu1  ;;  %v1825_v38 = vadd.f32 %v8034_v19, %v589_v41 }
 0x899   : > { %v4869_v52 = vadd.f32 %v4868_v25, %v4867_v47  ;;  %v590_v47 = vld [vmem:[%s7916_s6 + $0x60] sm:$0xff] }
 0x89b   : > { %v7456_v16 = vadd.f32 %v4869_v52, %v1817_v26  ;;  %v4870_v20 = vpop.f32.mrb[164].mxu1  ;;  %v8035_v52 = vld [vmem:[#allocation15_spill] sm:$0xff] }
 0x89c   : > { %v4871_v18 = vpop.f32.mrb[165].mxu1  ;;  %v1826_v50 = vadd.f32 %v8035_v52, %v590_v47  ;;  %v3860_v47 = vld [vmem:[%s7914_s4 + $0x30] sm:$0xff] }
 0x89d   : > { %v4872_v34 = vadd.f32 %v4871_v18, %v4870_v20  ;;  %v591_v18 = vld [vmem:[%s7916_s6 + $0x68] sm:$0xff] }
 0x89f   : > { %v7462_v1 = vadd.f32 %v4872_v34, %v1818_v24  ;;  %v4873_v4 = vpop.f32.mrb[166].mxu1 }
 0x8a0   : > { %v4874_v35 = vpop.f32.mrb[167].mxu1 }
 0x8a1   : > { %v4875_v3 = vadd.f32 %v4874_v35, %v4873_v4  ;;  %v1827_v4 = vadd.f32 %v8036_v43, %v591_v18  ;;  %v3863_v18 = vld [vmem:[%s7914_s4 + $0x48] sm:$0xff] }
 0x8a3   : > { %v7468_v33 = vadd.f32 %v4875_v3, %v1819_v42  ;;  %v4876_v44 = vpop.f32.mrb[168].mxu1 }
 0x8a4   : > { %v4877_v21 = vpop.f32.mrb[169].mxu1 }
 0x8a5   : > { %v4878_v23 = vadd.f32 %v4877_v21, %v4876_v44  ;;  %v8037_v44 = vld [vmem:[#allocation17_spill] sm:$0xff] }
 0x8a6   : > { %v1828_v21 = vadd.f32 %v8037_v44, %v592_v45 }
 0x8a7   : > { %v7474_v54 = vadd.f32 %v4878_v23, %v1820_v30  ;;  %v4879_v31 = vpop.f32.mrb[170].mxu1  ;;  %v593_v30 = vld [vmem:[%s7916_s6 + $0x78] sm:$0xff] }
 0x8a8   : > { %v4880_v7 = vpop.f32.mrb[171].mxu1 }
 0x8a9   : > { %v4881_v36 = vadd.f32 %v4880_v7, %v4879_v31  ;;  %v8038_v7 = vld [vmem:[#allocation18_spill] sm:$0xff] }
 0x8aa   : > { %v1829_v5 = vadd.f32 %v8038_v7, %v593_v30 }
 0x8ab   : > { %v7480_v53 = vadd.f32 %v4881_v36, %v1821_v6  ;;  %v4882_v14 = vpop.f32.mrb[172].mxu1  ;;  %v3855_v36 = vld [vmem:[%s7914_s4 + $0x8] sm:$0xff] }
 0x8ac   : > { %v4883_v61 = vpop.f32.mrb[173].mxu1 }
 0x8ad   : > { %v4884_v63 = vadd.f32 %v4883_v61, %v4882_v14  ;;  %v3854_v61 = vld [vmem:[%s7914_s4] sm:$0xff] }
 0x8af   : > { %v7486_v55 = vadd.f32 %v4884_v63, %v1822_v10  ;;  %v4885_v13 = vpop.f32.mrb[174].mxu1 }
 0x8b0   : > { %v4886_v17 = vpop.f32.mrb[175].mxu1 }
 0x8b1   : > { %v4887_v57 = vadd.f32 %v4886_v17, %v4885_v13  ;;  %v3856_v17 = vld [vmem:[%s7914_s4 + $0x10] sm:$0xff] }
 0x8b3   : > { %v7492_v28 = vadd.f32 %v4887_v57, %v1823_v15  ;;  %v4888_v27 = vpop.f32.mrb[176].mxu1 }
 0x8b4   : > { %v4889_v40 = vpop.f32.mrb[177].mxu1 }
 0x8b5   : > { %v4890_v29 = vadd.f32 %v4889_v40, %v4888_v27  ;;  %v3859_v40 = vld [vmem:[%s7914_s4 + $0x28] sm:$0xff] }
 0x8b7   : > { %v7498_v49 = vadd.f32 %v4890_v29, %v1824_v32  ;;  %v4891_v51 = vpop.f32.mrb[178].mxu1  ;;  %v3858_v32 = vld [vmem:[%s7914_s4 + $0x20] sm:$0xff] }
 0x8b8   : > { %v4892_v56 = vpop.f32.mrb[179].mxu1 }
 0x8b9   : > { %v4893_v11 = vadd.f32 %v4892_v56, %v4891_v51 }
 0x8bb   : > { %v7504_v25 = vadd.f32 %v4893_v11, %v1825_v38  ;;  %v4894_v58 = vpop.f32.mrb[180].mxu1  ;;  %v3861_v38 = vld [vmem:[%s7914_s4 + $0x38] sm:$0xff] }
 0x8bc   : > { %v4895_v26 = vpop.f32.mrb[181].mxu1 }
 0x8bd   : > { %v4896_v20 = vadd.f32 %v4895_v26, %v4894_v58 }
 0x8bf   : > { %v7510_v2 = vadd.f32 %v4896_v20, %v1826_v50  ;;  %v4897_v24 = vpop.f32.mrb[182].mxu1 }
 0x8c0   : > { %v4898_v34 = vpop.f32.mrb[183].mxu1 }
 0x8c1   : > { %v4899_v35 = vadd.f32 %v4898_v34, %v4897_v24  ;;  %v3862_v34 = vld [vmem:[%s7914_s4 + $0x40] sm:$0xff] }
 0x8c3   : > { %v7516_v42 = vadd.f32 %v4899_v35, %v1827_v4  ;;  %v4900_v3 = vpop.f32.mrb[184].mxu1 }
 0x8c4   : > { %v4901_v39 = vpop.f32.mrb[185].mxu1 }
 0x8c5   : > { %v4902_v37 = vadd.f32 %v4901_v39, %v4900_v3  ;;  %v3865_v39 = vld [vmem:[%s7914_s4 + $0x58] sm:$0xff] }
 0x8c7   : > { %v7522_v23 = vadd.f32 %v4902_v37, %v1828_v21  ;;  %v4903_v60 = vpop.f32.mrb[186].mxu1  ;;  %v3864_v21 = vld [vmem:[%s7914_s4 + $0x50] sm:$0xff] }
 0x8c8   : > { %v4904_v31 = vpop.f32.mrb[187].mxu1 }
 0x8c9   : > { %v4905_v6 = vadd.f32 %v4904_v31, %v4903_v60 }
 0x8cb   : > { %v7528_v12 = vadd.f32 %v4905_v6, %v1829_v5  ;;  %v3663_v14 = vpop.f32.mrb[188].mxu1  ;;  %v3867_v5 = vld [vmem:[%s7914_s4 + $0x68] sm:$0xff] }
 0x8cc   : > { %v3665_v62 = vpop.f32.mrb[189].mxu1  ;;  %v3918_v63 = vmul.f32 %v3854_v61, %v3663_v14 }
 0x8cd   : > { %v3919_v10 = vmul.f32 %v3855_v36, %v3665_v62  ;;  %v3866_v36 = vld [vmem:[%s7914_s4 + $0x60] sm:$0xff] }
 0x8cf   : > { %v3669_v13 = vpop.f32.mrb[190].mxu1  ;;  %v3982_v8 = vsel %vm908_vm1, %v3919_v10, 0.0 }
 0x8d0   : > { %v3671_v15 = vpop.f32.mrb[191].mxu1  ;;  %v3983_v57 = vadd.f32 %v3982_v8, %v3918_v63  ;;  %v3920_v27 = vmul.f32 %v3856_v17, %v3669_v13  ;;  %v3868_v17 = vld [vmem:[%s7914_s4 + $0x70] sm:$0xff] }
 0x8d1   : > { %v3921_v48 = vmul.f32 %v3857_v0, %v3671_v15  ;;  %v3869_v0 = vld [vmem:[%s7914_s4 + $0x78] sm:$0xff] }
 0x8d2   : > { %3984 = vadd.xlane.f32.xlu0 %v3983_v57 }
 0x8d3   : > { %v3675_v22 = vpop.f32.mrb[192].mxu1  ;;  %v3986_v29 = vsel %vm908_vm1, %v3921_v48, 0.0 }
 0x8d4   : > { %v3677_v41 = vpop.f32.mrb[193].mxu1  ;;  %v3987_v51 = vadd.f32 %v3986_v29, %v3920_v27  ;;  %v3922_v19 = vmul.f32 %v3858_v32, %v3675_v22  ;;  %v3870_v32 = vld [vmem:[%s7914_s4 + $0x80] sm:$0xff] }
 0x8d5   : > { %v3923_v56 = vmul.f32 %v3859_v40, %v3677_v41  ;;  %v3871_v40 = vld [vmem:[%s7914_s4 + $0x88] sm:$0xff] }
 0x8d6   : > { %3988 = vadd.xlane.f32.xlu1 %v3987_v51 }
 0x8d7   : > { %v3681_v11 = vpop.f32.mrb[194].mxu1  ;;  %v3990_v58 = vsel %vm908_vm1, %v3923_v56, 0.0 }
 0x8d8   : > { %v3683_v26 = vpop.f32.mrb[195].mxu1  ;;  %v3991_v52 = vadd.f32 %v3990_v58, %v3922_v19  ;;  %v3924_v20 = vmul.f32 %v3860_v47, %v3681_v11  ;;  %v3872_v47 = vld [vmem:[%s7914_s4 + $0x90] sm:$0xff] }
 0x8d9   : > { %v3925_v50 = vmul.f32 %v3861_v38, %v3683_v26  ;;  %v3873_v38 = vld [vmem:[%s7914_s4 + $0x98] sm:$0xff] }
 0x8da   : > { %3992 = vadd.xlane.f32.xlu0 %v3991_v52 }
 0x8db   : > { %v3687_v24 = vpop.f32.mrb[196].mxu1  ;;  %v3994_v43 = vsel %vm908_vm1, %v3925_v50, 0.0 }
 0x8dc   : > { %v3689_v4 = vpop.f32.mrb[197].mxu1  ;;  %v3995_v35 = vadd.f32 %v3994_v43, %v3924_v20  ;;  %v3926_v3 = vmul.f32 %v3862_v34, %v3687_v24  ;;  %v3874_v34 = vld [vmem:[%s7914_s4 + $0xa0] sm:$0xff] }
 0x8dd   : > { %v3927_v45 = vmul.f32 %v3863_v18, %v3689_v4  ;;  %v3875_v18 = vld [vmem:[%s7914_s4 + $0xa8] sm:$0xff] }
 0x8de   : > { %3996 = vadd.xlane.f32.xlu1 %v3995_v35 }
 0x8df   : > { %v3693_v44 = vpop.f32.mrb[198].mxu1  ;;  %v3998_v37 = vsel %vm908_vm1, %v3927_v45, 0.0 }
 0x8e0   : > { %v3695_v30 = vpop.f32.mrb[199].mxu1  ;;  %v3999_v60 = vadd.f32 %v3998_v37, %v3926_v3  ;;  %v3928_v7 = vmul.f32 %v3864_v21, %v3693_v44  ;;  %v3876_v21 = vld [vmem:[%s7914_s4 + $0xb0] sm:$0xff] }
 0x8e1   : > { %v3929_v31 = vmul.f32 %v3865_v39, %v3695_v30  ;;  %v3877_v39 = vld [vmem:[%s7914_s4 + $0xb8] sm:$0xff] }
 0x8e2   : > { %4000 = vadd.xlane.f32.xlu0 %v3999_v60 }
 0x8e3   : > { %v3699_v6 = vpop.f32.mrb[200].mxu1  ;;  %v4002_v14 = vsel %vm908_vm1, %v3929_v31, 0.0 }
 0x8e4   : > { %v3701_v61 = vpop.f32.mrb[201].mxu1  ;;  %v4003_v62 = vadd.f32 %v4002_v14, %v3928_v7  ;;  %v3930_v63 = vmul.f32 %v3866_v36, %v3699_v6  ;;  %v3878_v36 = vld [vmem:[%s7914_s4 + $0xc0] sm:$0xff] }
 0x8e5   : > { %v3931_v10 = vmul.f32 %v3867_v5, %v3701_v61  ;;  %v3879_v5 = vld [vmem:[%s7914_s4 + $0xc8] sm:$0xff] }
 0x8e6   : > { %4004 = vadd.xlane.f32.xlu1 %v4003_v62 }
 0x8e7   : > { %v3705_v13 = vpop.f32.mrb[202].mxu1  ;;  %v4006_v8 = vsel %vm908_vm1, %v3931_v10, 0.0 }
 0x8e8   : > { %v3707_v15 = vpop.f32.mrb[203].mxu1  ;;  %v4007_v57 = vadd.f32 %v4006_v8, %v3930_v63  ;;  %v3932_v27 = vmul.f32 %v3868_v17, %v3705_v13  ;;  %v3880_v17 = vld [vmem:[%s7914_s4 + $0xd0] sm:$0xff] }
 0x8e9   : > { %v3933_v48 = vmul.f32 %v3869_v0, %v3707_v15  ;;  %v3881_v0 = vld [vmem:[%s7914_s4 + $0xd8] sm:$0xff] }
 0x8ea   : > { %4008 = vadd.xlane.f32.xlu0 %v4007_v57 }
 0x8eb   : > { %v3711_v22 = vpop.f32.mrb[204].mxu1  ;;  %v4010_v29 = vsel %vm908_vm1, %v3933_v48, 0.0 }
 0x8ec   : > { %v3713_v41 = vpop.f32.mrb[205].mxu1  ;;  %v4011_v51 = vadd.f32 %v4010_v29, %v3932_v27  ;;  %v3934_v19 = vmul.f32 %v3870_v32, %v3711_v22  ;;  %v3882_v32 = vld [vmem:[%s7914_s4 + $0xe0] sm:$0xff] }
 0x8ed   : > { %v3935_v56 = vmul.f32 %v3871_v40, %v3713_v41  ;;  %v3883_v40 = vld [vmem:[%s7914_s4 + $0xe8] sm:$0xff] }
 0x8ee   : > { %4012 = vadd.xlane.f32.xlu1 %v4011_v51 }
 0x8ef   : > { %v3717_v11 = vpop.f32.mrb[206].mxu1  ;;  %v4014_v58 = vsel %vm908_vm1, %v3935_v56, 0.0 }
 0x8f0   : > { %v3719_v26 = vpop.f32.mrb[207].mxu1  ;;  %v4015_v52 = vadd.f32 %v4014_v58, %v3934_v19  ;;  %v3936_v20 = vmul.f32 %v3872_v47, %v3717_v11  ;;  %v3884_v47 = vld [vmem:[%s7914_s4 + $0xf0] sm:$0xff] }
 0x8f1   : > { %v3937_v50 = vmul.f32 %v3873_v38, %v3719_v26  ;;  %v3885_v38 = vld [vmem:[%s7914_s4 + $0xf8] sm:$0xff] }
 0x8f2   : > { %4016 = vadd.xlane.f32.xlu0 %v4015_v52 }
 0x8f3   : > { %v3723_v24 = vpop.f32.mrb[208].mxu1  ;;  %v4018_v43 = vsel %vm908_vm1, %v3937_v50, 0.0 }
 0x8f4   : > { %v3725_v4 = vpop.f32.mrb[209].mxu1  ;;  %v4019_v35 = vadd.f32 %v4018_v43, %v3936_v20  ;;  %v3938_v3 = vmul.f32 %v3874_v34, %v3723_v24  ;;  %v3886_v34 = vld [vmem:[%s7914_s4 + $0x100] sm:$0xff] }
 0x8f5   : > { %v3939_v45 = vmul.f32 %v3875_v18, %v3725_v4  ;;  %v3887_v18 = vld [vmem:[%s7914_s4 + $0x108] sm:$0xff] }
 0x8f6   : > { %4020 = vadd.xlane.f32.xlu1 %v4019_v35 }
 0x8f7   : > { %v3729_v44 = vpop.f32.mrb[210].mxu1  ;;  %v4022_v37 = vsel %vm908_vm1, %v3939_v45, 0.0 }
 0x8f8   : > { %v3731_v30 = vpop.f32.mrb[211].mxu1  ;;  %v4023_v60 = vadd.f32 %v4022_v37, %v3938_v3  ;;  %v3940_v7 = vmul.f32 %v3876_v21, %v3729_v44  ;;  %v3888_v21 = vld [vmem:[%s7914_s4 + $0x110] sm:$0xff] }
 0x8f9   : > { %v3941_v31 = vmul.f32 %v3877_v39, %v3731_v30  ;;  %v3889_v39 = vld [vmem:[%s7914_s4 + $0x118] sm:$0xff] }
 0x8fa   : > { %4024 = vadd.xlane.f32.xlu0 %v4023_v60 }
 0x8fb   : > { %v3735_v6 = vpop.f32.mrb[212].mxu1  ;;  %v4026_v14 = vsel %vm908_vm1, %v3941_v31, 0.0 }
 0x8fc   : > { %v3737_v61 = vpop.f32.mrb[213].mxu1  ;;  %v4027_v62 = vadd.f32 %v4026_v14, %v3940_v7  ;;  %v3942_v63 = vmul.f32 %v3878_v36, %v3735_v6  ;;  %v3890_v36 = vld [vmem:[%s7914_s4 + $0x120] sm:$0xff] }
 0x8fd   : > { %v3943_v10 = vmul.f32 %v3879_v5, %v3737_v61  ;;  %v3891_v5 = vld [vmem:[%s7914_s4 + $0x128] sm:$0xff] }
 0x8fe   : > { %4028 = vadd.xlane.f32.xlu1 %v4027_v62 }
 0x8ff   : > { %v3741_v13 = vpop.f32.mrb[214].mxu1  ;;  %v4030_v8 = vsel %vm908_vm1, %v3943_v10, 0.0 }
 0x900   : > { %v3743_v15 = vpop.f32.mrb[215].mxu1  ;;  %v4031_v57 = vadd.f32 %v4030_v8, %v3942_v63  ;;  %v3944_v27 = vmul.f32 %v3880_v17, %v3741_v13  ;;  %v3892_v17 = vld [vmem:[%s7914_s4 + $0x130] sm:$0xff] }
 0x901   : > { %v3945_v48 = vmul.f32 %v3881_v0, %v3743_v15  ;;  %v3893_v0 = vld [vmem:[%s7914_s4 + $0x138] sm:$0xff] }
 0x902   : > { %4032 = vadd.xlane.f32.xlu0 %v4031_v57 }
 0x903   : > { %v3747_v22 = vpop.f32.mrb[216].mxu1  ;;  %v4034_v29 = vsel %vm908_vm1, %v3945_v48, 0.0 }
 0x904   : > { %v3749_v41 = vpop.f32.mrb[217].mxu1  ;;  %v4035_v51 = vadd.f32 %v4034_v29, %v3944_v27  ;;  %v3946_v19 = vmul.f32 %v3882_v32, %v3747_v22  ;;  %v3894_v32 = vld [vmem:[%s7914_s4 + $0x140] sm:$0xff] }
 0x905   : > { %v3947_v56 = vmul.f32 %v3883_v40, %v3749_v41  ;;  %v3895_v40 = vld [vmem:[%s7914_s4 + $0x148] sm:$0xff] }
 0x906   : > { %4036 = vadd.xlane.f32.xlu1 %v4035_v51 }
 0x907   : > { %v3753_v11 = vpop.f32.mrb[218].mxu1  ;;  %v4038_v58 = vsel %vm908_vm1, %v3947_v56, 0.0 }
 0x908   : > { %v3755_v26 = vpop.f32.mrb[219].mxu1  ;;  %v7638_v52 = vadd.f32 %v4038_v58, %v3946_v19  ;;  %v3948_v20 = vmul.f32 %v3884_v47, %v3753_v11  ;;  %v3896_v47 = vld [vmem:[%s7914_s4 + $0x150] sm:$0xff] }
 0x909   : > { %v3949_v50 = vmul.f32 %v3885_v38, %v3755_v26  ;;  %v3897_v38 = vld [vmem:[%s7914_s4 + $0x158] sm:$0xff] }
 0x90b   : > { %v3759_v24 = vpop.f32.mrb[220].mxu1  ;;  %v4042_v43 = vsel %vm908_vm1, %v3949_v50, 0.0 }
 0x90c   : > { %v3761_v4 = vpop.f32.mrb[221].mxu1  ;;  %v7647_v35 = vadd.f32 %v4042_v43, %v3948_v20  ;;  %v3950_v3 = vmul.f32 %v3886_v34, %v3759_v24  ;;  %v3899_v24 = vld [vmem:[%s7914_s4 + $0x168] sm:$0xff]  ;;  %v3898_v43 = vld [vmem:[%s7914_s4 + $0x160] sm:$0xff] }
 0x90d   : > { %v3951_v45 = vmul.f32 %v3887_v18, %v3761_v4 }
 0x90f   : > { %v3765_v44 = vpop.f32.mrb[222].mxu1  ;;  %v4046_v37 = vsel %vm908_vm1, %v3951_v45, 0.0 }
 0x910   : > { %v3767_v30 = vpop.f32.mrb[223].mxu1  ;;  %v4047_v60 = vadd.f32 %v4046_v37, %v3950_v3  ;;  %v3952_v7 = vmul.f32 %v3888_v21, %v3765_v44  ;;  %v3901_v21 = vld [vmem:[%s7914_s4 + $0x178] sm:$0xff] }
 0x911   : > { %v3953_v31 = vmul.f32 %v3889_v39, %v3767_v30  ;;  %v3900_v30 = vld [vmem:[%s7914_s4 + $0x170] sm:$0xff] }
 0x912   : > { %4048 = vadd.xlane.f32.xlu0 %v4047_v60 }
 0x913   : > { %v3771_v6 = vpop.f32.mrb[224].mxu1  ;;  %v4050_v14 = vsel %vm908_vm1, %v3953_v31, 0.0 }
 0x914   : > { %v4051_v61 = vadd.f32 %v4050_v14, %v3952_v7  ;;  %v3773_v62 = vpop.f32.mrb[225].mxu1  ;;  %v3954_v63 = vmul.f32 %v3890_v36, %v3771_v6  ;;  %v3903_v36 = vld [vmem:[%s7914_s4 + $0x188] sm:$0xff] }
 0x915   : > { %v3955_v10 = vmul.f32 %v3891_v5, %v3773_v62 }
 0x916   : > { %4052 = vadd.xlane.f32.xlu1 %v4051_v61  ;;  %v3902_v61 = vld [vmem:[%s7914_s4 + $0x180] sm:$0xff] }
 0x917   : > { %v3777_v13 = vpop.f32.mrb[226].mxu1  ;;  %v4054_v8 = vsel %vm908_vm1, %v3955_v10, 0.0 }
 0x918   : > { %v3779_v15 = vpop.f32.mrb[227].mxu1  ;;  %v4055_v57 = vadd.f32 %v4054_v8, %v3954_v63  ;;  %v3956_v27 = vmul.f32 %v3892_v17, %v3777_v13  ;;  %v3905_v17 = vld [vmem:[%s7914_s4 + $0x198] sm:$0xff] }
 0x919   : > { %v3957_v48 = vmul.f32 %v3893_v0, %v3779_v15  ;;  %v3904_v15 = vld [vmem:[%s7914_s4 + $0x190] sm:$0xff] }
 0x91a   : > { %4056 = vadd.xlane.f32.xlu0 %v4055_v57 }
 0x91b   : > { %v3783_v22 = vpop.f32.mrb[228].mxu1  ;;  %v4058_v29 = vsel %vm908_vm1, %v3957_v48, 0.0 }
 0x91c   : > { %v4059_v41 = vadd.f32 %v4058_v29, %v3956_v27  ;;  %v3785_v51 = vpop.f32.mrb[229].mxu1  ;;  %v3958_v19 = vmul.f32 %v3894_v32, %v3783_v22  ;;  %v3907_v32 = vld [vmem:[%s7914_s4 + $0x1a8] sm:$0xff] }
 0x91d   : > { %v3959_v56 = vmul.f32 %v3895_v40, %v3785_v51 }
 0x91e   : > { %4060 = vadd.xlane.f32.xlu1 %v4059_v41  ;;  %v3906_v41 = vld [vmem:[%s7914_s4 + $0x1a0] sm:$0xff] }
 0x91f   : > { %v3789_v11 = vpop.f32.mrb[230].mxu1  ;;  %v4062_v58 = vsel %vm908_vm1, %v3959_v56, 0.0 }
 0x920   : > { %v3791_v26 = vpop.f32.mrb[231].mxu1  ;;  %v4063_v50 = vadd.f32 %v4062_v58, %v3958_v19  ;;  %v3960_v18 = vmul.f32 %v3896_v47, %v3789_v11  ;;  %v3909_v47 = vld [vmem:[%s7914_s4 + $0x1b8] sm:$0xff] }
 0x921   : > { %v3961_v20 = vmul.f32 %v3897_v38, %v3791_v26  ;;  %v3908_v26 = vld [vmem:[%s7914_s4 + $0x1b0] sm:$0xff] }
 0x922   : > { %4064 = vadd.xlane.f32.xlu0 %v4063_v50 }
 0x923   : > { %v3795_v34 = vpop.f32.mrb[232].mxu1  ;;  %v4066_v4 = vsel %vm908_vm1, %v3961_v20, 0.0 }
 0x924   : > { %v4067_v45 = vadd.f32 %v4066_v4, %v3960_v18  ;;  %v3797_v3 = vpop.f32.mrb[233].mxu1  ;;  %v3962_v44 = vmul.f32 %v3898_v43, %v3795_v34  ;;  %v3911_v43 = vld [vmem:[%s7914_s4 + $0x1c8] sm:$0xff] }
 0x925   : > { %v3963_v39 = vmul.f32 %v3899_v24, %v3797_v3 }
 0x926   : > { %4068 = vadd.xlane.f32.xlu1 %v4067_v45  ;;  %v3910_v45 = vld [vmem:[%s7914_s4 + $0x1c0] sm:$0xff] }
 0x927   : > { %v3801_v37 = vpop.f32.mrb[234].mxu1  ;;  %v4070_v60 = vsel %vm908_vm1, %v3963_v39, 0.0 }
 0x928   : > { %v3803_v31 = vpop.f32.mrb[235].mxu1  ;;  %v4071_v7 = vadd.f32 %v4070_v60, %v3962_v44  ;;  %v3964_v6 = vmul.f32 %v3900_v30, %v3801_v37  ;;  %v3913_v30 = vld [vmem:[%s7914_s4 + $0x1d8] sm:$0xff] }
 0x929   : > { %v3965_v5 = vmul.f32 %v3901_v21, %v3803_v31  ;;  %v3912_v31 = vld [vmem:[%s7914_s4 + $0x1d0] sm:$0xff] }
 0x92a   : > { %4072 = vadd.xlane.f32.xlu0 %v4071_v7 }
 0x92b   : > { %v3807_v14 = vpop.f32.mrb[236].mxu1  ;;  %v4074_v62 = vsel %vm908_vm1, %v3965_v5, 0.0 }
 0x92c   : > { %v4075_v10 = vadd.f32 %v4074_v62, %v3964_v6  ;;  %v3809_v63 = vpop.f32.mrb[237].mxu1  ;;  %v3966_v13 = vmul.f32 %v3902_v61, %v3807_v14  ;;  %v3915_v61 = vld [vmem:[%s7914_s4 + $0x1e8] sm:$0xff] }
 0x92d   : > { %v3967_v0 = vmul.f32 %v3903_v36, %v3809_v63 }
 0x92e   : > { %4076 = vadd.xlane.f32.xlu1 %v4075_v10  ;;  %v3914_v10 = vld [vmem:[%s7914_s4 + $0x1e0] sm:$0xff] }
 0x92f   : > { %v3813_v8 = vpop.f32.mrb[238].mxu1  ;;  %v4078_v57 = vsel %vm908_vm1, %v3967_v0, 0.0 }
 0x930   : > { %v3815_v48 = vpop.f32.mrb[239].mxu1  ;;  %v4079_v27 = vadd.f32 %v4078_v57, %v3966_v13  ;;  %v3968_v22 = vmul.f32 %v3904_v15, %v3813_v8  ;;  %v3917_v15 = vld [vmem:[%s7914_s4 + $0x1f8] sm:$0xff] }
 0x931   : > { %v3969_v40 = vmul.f32 %v3905_v17, %v3815_v48  ;;  %v3916_v48 = vld [vmem:[%s7914_s4 + $0x1f0] sm:$0xff] }
 0x932   : > { %4080 = vadd.xlane.f32.xlu0 %v4079_v27 }
 0x933   : > { %v3819_v29 = vpop.f32.mrb[240].mxu1  ;;  %v4082_v51 = vsel %vm908_vm1, %v3969_v40, 0.0 }
 0x934   : > { %v4083_v56 = vadd.f32 %v4082_v51, %v3968_v22  ;;  %v3821_v19 = vpop.f32.mrb[241].mxu1  ;;  %v3970_v11 = vmul.f32 %v3906_v41, %v3819_v29 }
 0x935   : > { %v3971_v38 = vmul.f32 %v3907_v32, %v3821_v19 }
 0x936   : > { %4084 = vadd.xlane.f32.xlu1 %v4083_v56  ;;  %v4712_v56 = vld [vmem:[%s7915_s5 + $0x208] sm:$0xff] }
 0x937   : > { %v3825_v58 = vpop.f32.mrb[242].mxu1  ;;  %v4086_v50 = vsel %vm908_vm1, %v3971_v38, 0.0  ;;  %4207 = vmatprep.mubr.f32.mxu0 %v4712_v56 }
 0x938   : > { %v3827_v20 = vpop.f32.mrb[243].mxu1  ;;  %v4087_v18 = vadd.f32 %v4086_v50, %v3970_v11  ;;  %v3972_v34 = vmul.f32 %v3908_v26, %v3825_v58 }
 0x939   : > { %v3973_v24 = vmul.f32 %v3909_v47, %v3827_v20 }
 0x93a   : > { %4088 = vadd.xlane.f32.xlu0 %v4087_v18 }
 0x93b   : > { %v3831_v4 = vpop.f32.mrb[244].mxu1  ;;  %v4090_v3 = vsel %vm908_vm1, %v3973_v24, 0.0 }
 0x93c   : > { %v4091_v39 = vadd.f32 %v4090_v3, %v3972_v34  ;;  %v3833_v44 = vpop.f32.mrb[245].mxu1  ;;  %v3974_v37 = vmul.f32 %v3910_v45, %v3831_v4 }
 0x93d   : > { %v3975_v21 = vmul.f32 %v3911_v43, %v3833_v44 }
 0x93e   : > { %4092 = vadd.xlane.f32.xlu1 %v4091_v39 }
 0x93f   : > { %v3837_v60 = vpop.f32.mrb[246].mxu1  ;;  %v4094_v7 = vsel %vm908_vm1, %v3975_v21, 0.0 }
 0x940   : > { %v3839_v5 = vpop.f32.mrb[247].mxu1  ;;  %v4095_v6 = vadd.f32 %v4094_v7, %v3974_v37  ;;  %v3976_v14 = vmul.f32 %v3912_v31, %v3837_v60 }
 0x941   : > { %v3977_v36 = vmul.f32 %v3913_v30, %v3839_v5 }
 0x942   : > { %4096 = vadd.xlane.f32.xlu0 %v4095_v6 }
 0x943   : > { %v3843_v62 = vpop.f32.mrb[248].mxu1  ;;  %v4098_v63 = vsel %vm908_vm1, %v3977_v36, 0.0 }
 0x944   : > { %v3845_v0 = vpop.f32.mrb[249].mxu1  ;;  %v4099_v13 = vadd.f32 %v4098_v63, %v3976_v14  ;;  %v3978_v8 = vmul.f32 %v3914_v10, %v3843_v62 }
 0x945   : > { %v3979_v17 = vmul.f32 %v3915_v61, %v3845_v0 }
 0x946   : > { %4100 = vadd.xlane.f32.xlu1 %v4099_v13 }
 0x947   : > { %v3849_v57 = vpop.f32.mrb[250].mxu1  ;;  %v4102_v27 = vsel %vm908_vm1, %v3979_v17, 0.0 }
 0x948   : > { %v3851_v40 = vpop.f32.mrb[251].mxu1  ;;  %v4103_v22 = vadd.f32 %v4102_v27, %v3978_v8  ;;  %v3980_v29 = vmul.f32 %v3916_v48, %v3849_v57 }
 0x949   : > { %v3981_v32 = vmul.f32 %v3917_v15, %v3851_v40 }
 0x94a   : > { %4104 = vadd.xlane.f32.xlu0 %v4103_v22 }
 0x94b   : > { %v4106_v41 = vsel %vm908_vm1, %v3981_v32, 0.0 }
 0x94c   : > { %v4107_v51 = vadd.f32 %v4106_v41, %v3980_v29 }
 0x94e   : > { %4040 = vadd.xlane.f32.xlu0 %v7638_v52  ;;  %4108 = vadd.xlane.f32.xlu1 %v4107_v51 }
 0x952   : > { %4044 = vadd.xlane.f32.xlu1 %v7647_v35 }
 0x95f   : > { %v3985_v19 = vpop.xlane.xlu0 %3984 }
 0x963   : > { %v3989_v38 = vpop.xlane.xlu1 %3988 }
 0x964   : > { %v5220_v39 = vpack.c.bf16 %v3989_v38, %v3985_v19  ;;  %v4711_v19 = vld [vmem:[%s7915_s5 + $0x200] sm:$0xff]  ;;  %v4714_v38 = vld [vmem:[%s7915_s5 + $0x218] sm:$0xff] }
 0x967   : > { %v3993_v11 = vpop.xlane.xlu0 %3992 }
 0x96b   : > { %v3997_v47 = vpop.xlane.xlu1 %3996 }
 0x96c   : > { %v5224_v30 = vpack.c.bf16 %v3997_v47, %v3993_v11  ;;  %v4713_v11 = vld [vmem:[%s7915_s5 + $0x210] sm:$0xff]  ;;  %v4716_v47 = vld [vmem:[%s7915_s5 + $0x228] sm:$0xff] }
 0x96f   : > { %v4001_v58 = vpop.xlane.xlu0 %4000 }
 0x973   : > { %v4005_v26 = vpop.xlane.xlu1 %4004 }
 0x974   : > { %v5228_v5 = vpack.c.bf16 %v4005_v26, %v4001_v58  ;;  %v4715_v58 = vld [vmem:[%s7915_s5 + $0x220] sm:$0xff]  ;;  %v4718_v26 = vld [vmem:[%s7915_s5 + $0x238] sm:$0xff] }
 0x977   : > { %v4009_v50 = vpop.xlane.xlu0 %4008 }
 0x97b   : > { %v4013_v20 = vpop.xlane.xlu1 %4012 }
 0x97c   : > { %v5232_v61 = vpack.c.bf16 %v4013_v20, %v4009_v50  ;;  %v4717_v50 = vld [vmem:[%s7915_s5 + $0x230] sm:$0xff]  ;;  %v4720_v20 = vld [vmem:[%s7915_s5 + $0x248] sm:$0xff] }
 0x97f   : > { %v4017_v18 = vpop.xlane.xlu0 %4016 }
 0x983   : > { %v4021_v24 = vpop.xlane.xlu1 %4020 }
 0x984   : > { %v5236_v0 = vpack.c.bf16 %v4021_v24, %v4017_v18  ;;  %v4719_v18 = vld [vmem:[%s7915_s5 + $0x240] sm:$0xff]  ;;  %v4722_v24 = vld [vmem:[%s7915_s5 + $0x258] sm:$0xff] }
 0x987   : > { %v4025_v34 = vpop.xlane.xlu0 %4024 }
 0x98b   : > { %v4029_v52 = vpop.xlane.xlu1 %4028 }
 0x98c   : > { %v5240_v15 = vpack.c.bf16 %v4029_v52, %v4025_v34  ;;  %v4721_v34 = vld [vmem:[%s7915_s5 + $0x250] sm:$0xff]  ;;  %v4724_v52 = vld [vmem:[%s7915_s5 + $0x268] sm:$0xff] }
 0x98f   : > { %v4033_v43 = vpop.xlane.xlu0 %4032 }
 0x993   : > { %v4037_v4 = vpop.xlane.xlu1 %4036 }
 0x994   : > { %v5244_v40 = vpack.c.bf16 %v4037_v4, %v4033_v43  ;;  %v4723_v43 = vld [vmem:[%s7915_s5 + $0x260] sm:$0xff]  ;;  %v4726_v4 = vld [vmem:[%s7915_s5 + $0x278] sm:$0xff] }
 0x99f   : > { %v4049_v35 = vpop.xlane.xlu0 %4048 }
 0x9a3   : > { %v4053_v45 = vpop.xlane.xlu1 %4052 }
 0x9a4   : > { %v5218_v3 = vpack.c.bf16 %v4053_v45, %v4049_v35  ;;  %v4725_v35 = vld [vmem:[%s7915_s5 + $0x270] sm:$0xff]  ;;  %v4728_v45 = vld [vmem:[%s7915_s5 + $0x288] sm:$0xff] }
 0x9a6   : > { %5219 = vmatprep.subr.bf16.mxu0 %v5218_v3  ;;  %v4727_v3 = vld [vmem:[%s7915_s5 + $0x280] sm:$0xff] }
 0x9a7   : > { %5221 = vmatpush3.bf16.msra.mxu0 %v5220_v39  ;;  %v4057_v44 = vpop.xlane.xlu0 %4056  ;;  %v4730_v39 = vld [vmem:[%s7915_s5 + $0x298] sm:$0xff] }
 0x9ab   : > { %v4061_v21 = vpop.xlane.xlu1 %4060 }
 0x9ac   : > { %v5222_v37 = vpack.c.bf16 %v4061_v21, %v4057_v44  ;;  %v4729_v44 = vld [vmem:[%s7915_s5 + $0x290] sm:$0xff]  ;;  %v4732_v21 = vld [vmem:[%s7915_s5 + $0x2a8] sm:$0xff] }
 0x9ae   : > { %5223 = vmatprep.subr.bf16.mxu0 %v5222_v37  ;;  %v4731_v37 = vld [vmem:[%s7915_s5 + $0x2a0] sm:$0xff] }
 0x9af   : > { %5225 = vmatpush3.bf16.msra.mxu0 %v5224_v30  ;;  %v4065_v60 = vpop.xlane.xlu0 %4064  ;;  %v4734_v30 = vld [vmem:[%s7915_s5 + $0x2b8] sm:$0xff] }
 0x9b3   : > { %v4069_v31 = vpop.xlane.xlu1 %4068 }
 0x9b4   : > { %v5226_v7 = vpack.c.bf16 %v4069_v31, %v4065_v60  ;;  %v4733_v60 = vld [vmem:[%s7915_s5 + $0x2b0] sm:$0xff]  ;;  %v4736_v31 = vld [vmem:[%s7915_s5 + $0x2c8] sm:$0xff] }
 0x9b6   : > { %5227 = vmatprep.subr.bf16.mxu0 %v5226_v7  ;;  %v4735_v7 = vld [vmem:[%s7915_s5 + $0x2c0] sm:$0xff] }
 0x9b7   : > { %5229 = vmatpush3.bf16.msra.mxu0 %v5228_v5  ;;  %v4073_v6 = vpop.xlane.xlu0 %4072  ;;  %v4738_v5 = vld [vmem:[%s7915_s5 + $0x2d8] sm:$0xff] }
 0x9bb   : > { %v4077_v36 = vpop.xlane.xlu1 %4076 }
 0x9bc   : > { %v5230_v14 = vpack.c.bf16 %v4077_v36, %v4073_v6  ;;  %v4737_v6 = vld [vmem:[%s7915_s5 + $0x2d0] sm:$0xff]  ;;  %v4740_v36 = vld [vmem:[%s7915_s5 + $0x2e8] sm:$0xff] }
 0x9be   : > { %5231 = vmatprep.subr.bf16.mxu0 %v5230_v14  ;;  %v4739_v14 = vld [vmem:[%s7915_s5 + $0x2e0] sm:$0xff] }
 0x9bf   : > { %5233 = vmatpush3.bf16.msra.mxu0 %v5232_v61  ;;  %v4081_v62 = vpop.xlane.xlu0 %4080  ;;  %v4742_v61 = vld [vmem:[%s7915_s5 + $0x2f8] sm:$0xff] }
 0x9c3   : > { %v4085_v10 = vpop.xlane.xlu1 %4084 }
 0x9c4   : > { %v5234_v63 = vpack.c.bf16 %v4085_v10, %v4081_v62  ;;  %v4741_v62 = vld [vmem:[%s7915_s5 + $0x2f0] sm:$0xff] }
 0x9c6   : > { %5235 = vmatprep.subr.bf16.mxu0 %v5234_v63 }
 0x9c7   : > { %5237 = vmatpush3.bf16.msra.mxu0 %v5236_v0  ;;  %v4089_v13 = vpop.xlane.xlu0 %4088 }
 0x9cb   : > { %v4093_v17 = vpop.xlane.xlu1 %4092 }
 0x9cc   : > { %v5238_v8 = vpack.c.bf16 %v4093_v17, %v4089_v13 }
 0x9ce   : > { %5239 = vmatprep.subr.bf16.mxu0 %v5238_v8 }
 0x9cf   : > { %5241 = vmatpush3.bf16.msra.mxu0 %v5240_v15  ;;  %v4097_v57 = vpop.xlane.xlu0 %4096 }
 0x9d3   : > { %v4101_v48 = vpop.xlane.xlu1 %4100 }
 0x9d4   : > { %v5242_v27 = vpack.c.bf16 %v4101_v48, %v4097_v57 }
 0x9d6   : > { %5243 = vmatprep.subr.bf16.mxu0 %v5242_v27 }
 0x9d7   : > { %5245 = vmatpush3.bf16.msra.mxu0 %v5244_v40  ;;  %v4105_v22 = vpop.xlane.xlu0 %4104 }
 0x9db   : > { %v4109_v32 = vpop.xlane.xlu1 %4108  ;;  %v4041_v41 = vpop.xlane.xlu0 %4040 }
 0x9dc   : > { %v5246_v29 = vpack.c.bf16 %v4109_v32, %v4105_v22 }
 0x9de   : > { %5247 = vmatprep.subr.bf16.mxu0 %v5246_v29 }
 0x9df   : > { %v4045_v51 = vpop.xlane.xlu1 %4044 }
 0x9e0   : > { %v5248_v56 = vpack.c.bf16 %v4045_v51, %v4041_v41 }
 0x9e2   : > { %5249 = vmatpush3.bf16.msra.mxu0 %v5248_v56 }
 0x9e5   : > { %4208 = vmatmul.mubr.f32.vlgmr.msra.gmra.mrb[220].mxu0 %v4711_v19 }
 0x9e6   : > { %4212 = vmatprep.mubr.f32.mxu0 %v4714_v38 }
 0x9e9   : > { %4213 = vmatmul.mubr.f32.gmra.mrb[222].mxu0 %v4713_v11 }
 0x9ea   : > { %4217 = vmatprep.mubr.f32.mxu0 %v4716_v47 }
 0x9ed   : > { %4218 = vmatmul.mubr.f32.gmra.mrb[224].mxu0 %v4715_v58 }
 0x9ee   : > { %4222 = vmatprep.mubr.f32.mxu0 %v4718_v26 }
 0x9f1   : > { %4223 = vmatmul.mubr.f32.gmra.mrb[226].mxu0 %v4717_v50 }
 0x9f2   : > { %4227 = vmatprep.mubr.f32.mxu0 %v4720_v20 }
 0x9f5   : > { %4228 = vmatmul.mubr.f32.gmra.mrb[228].mxu0 %v4719_v18 }
 0x9f6   : > { %4232 = vmatprep.mubr.f32.mxu0 %v4722_v24 }
 0x9f9   : > { %4233 = vmatmul.mubr.f32.gmra.mrb[230].mxu0 %v4721_v34 }
 0x9fa   : > { %4237 = vmatprep.mubr.f32.mxu0 %v4724_v52 }
 0x9fd   : > { %4238 = vmatmul.mubr.f32.gmra.mrb[232].mxu0 %v4723_v43 }
 0x9fe   : > { %4242 = vmatprep.mubr.f32.mxu0 %v4726_v4 }
 0xa01   : > { %4243 = vmatmul.mubr.f32.gmra.mrb[234].mxu0 %v4725_v35 }
 0xa02   : > { %4247 = vmatprep.mubr.f32.mxu0 %v4728_v45 }
 0xa05   : > { %4248 = vmatmul.mubr.f32.gmra.mrb[236].mxu0 %v4727_v3 }
 0xa06   : > { %4252 = vmatprep.mubr.f32.mxu0 %v4730_v39 }
 0xa09   : > { %4253 = vmatmul.mubr.f32.gmra.mrb[238].mxu0 %v4729_v44 }
 0xa0a   : > { %4257 = vmatprep.mubr.f32.mxu0 %v4732_v21 }
 0xa0d   : > { %4258 = vmatmul.mubr.f32.gmra.mrb[240].mxu0 %v4731_v37 }
 0xa0e   : > { %4262 = vmatprep.mubr.f32.mxu0 %v4734_v30 }
 0xa11   : > { %4263 = vmatmul.mubr.f32.gmra.mrb[242].mxu0 %v4733_v60 }
 0xa12   : > { %4267 = vmatprep.mubr.f32.mxu0 %v4736_v31 }
 0xa15   : > { %4268 = vmatmul.mubr.f32.gmra.mrb[244].mxu0 %v4735_v7 }
 0xa16   : > { %4272 = vmatprep.mubr.f32.mxu0 %v4738_v5 }
 0xa19   : > { %4273 = vmatmul.mubr.f32.gmra.mrb[246].mxu0 %v4737_v6 }
 0xa1a   : > { %4277 = vmatprep.mubr.f32.mxu0 %v4740_v36 }
 0xa1d   : > { %4278 = vmatmul.mubr.f32.gmra.mrb[248].mxu0 %v4739_v14 }
 0xa1e   : > { %4282 = vmatprep.mubr.f32.mxu0 %v4742_v61 }
 0xa21   : > { %4283 = vmatmul.mubr.f32.gmra.mrb[250].mxu0 %v4741_v62 }
 0xab8   : > { %v4938_v10 = vpop.f32.mrb[220].mxu0 }
 0xab9   : > { %v4939_v63 = vpop.f32.mrb[221].mxu0 }
 0xaba   : > { %v4940_v0 = vadd.f32 %v4939_v63, %v4938_v10 }
 0xabc   : > { %v4288_v13 = vadd.f32 %v4940_v0, %v7438_v59  ;;  %v4941_v17 = vpop.f32.mrb[222].mxu0 }
 0xabd   : > { %v4942_v8 = vpop.f32.mrb[223].mxu0 }
 0xabe   : > { %v4943_v15 = vadd.f32 %v4942_v8, %v4941_v17  ;;  %4306 = vperm.xlu0 %5268, %v4288_v13  }
 0xac0   : > { %v4289_v57 = vadd.f32 %v4943_v15, %v7444_v46  ;;  %v4944_v48 = vpop.f32.mrb[224].mxu0 }
 0xac1   : > { %v4945_v27 = vpop.f32.mrb[225].mxu0 }
 0xac2   : > { %v4946_v40 = vadd.f32 %v4945_v27, %v4944_v48  ;;  %4311 = vperm.xlu1 %5269, %v4289_v57  }
 0xac4   : > { %v4290_v22 = vadd.f32 %v4946_v40, %v7450_v9  ;;  %v4947_v32 = vpop.f32.mrb[226].mxu0 }
 0xac5   : > { %v4948_v29 = vpop.f32.mrb[227].mxu0 }
 0xac6   : > { %v4949_v41 = vadd.f32 %v4948_v29, %v4947_v32  ;;  %4316 = vperm.xlu1 %5269, %v4290_v22  }
 0xac8   : > { %v4291_v51 = vadd.f32 %v4949_v41, %v7456_v16  ;;  %v4950_v56 = vpop.f32.mrb[228].mxu0 }
 0xac9   : > { %v4951_v59 = vpop.f32.mrb[229].mxu0 }
 0xaca   : > { %v4952_v19 = vadd.f32 %v4951_v59, %v4950_v56  ;;  %4321 = vperm.xlu1 %5269, %v4291_v51  }
 0xacc   : > { %v4292_v38 = vadd.f32 %v4952_v19, %v7462_v1  ;;  %v4953_v11 = vpop.f32.mrb[230].mxu0 }
 0xacd   : > { %v4954_v46 = vpop.f32.mrb[231].mxu0 }
 0xace   : > { %v4955_v47 = vadd.f32 %v4954_v46, %v4953_v11  ;;  %4326 = vperm.xlu1 %5269, %v4292_v38  }
 0xad0   : > { %v4293_v58 = vadd.f32 %v4955_v47, %v7468_v33  ;;  %v4956_v26 = vpop.f32.mrb[232].mxu0 }
 0xad1   : > { %v4957_v9 = vpop.f32.mrb[233].mxu0 }
 0xad2   : > { %v4958_v50 = vadd.f32 %v4957_v9, %v4956_v26  ;;  %4331 = vperm.xlu1 %5269, %v4293_v58  }
 0xad4   : > { %v4294_v20 = vadd.f32 %v4958_v50, %v7474_v54  ;;  %v4959_v18 = vpop.f32.mrb[234].mxu0 }
 0xad5   : > { %v4960_v16 = vpop.f32.mrb[235].mxu0 }
 0xad6   : > { %v4961_v24 = vadd.f32 %v4960_v16, %v4959_v18  ;;  %4336 = vperm.xlu1 %5269, %v4294_v20  }
 0xad8   : > { %v4295_v34 = vadd.f32 %v4961_v24, %v7480_v53  ;;  %v4962_v52 = vpop.f32.mrb[236].mxu0 }
 0xad9   : > { %v4963_v1 = vpop.f32.mrb[237].mxu0 }
 0xada   : > { %v4964_v43 = vadd.f32 %v4963_v1, %v4962_v52  ;;  %4341 = vperm.xlu1 %5269, %v4295_v34  }
 0xadc   : > { %v4296_v4 = vadd.f32 %v4964_v43, %v7486_v55  ;;  %v4965_v35 = vpop.f32.mrb[238].mxu0 }
 0xadd   : > { %v4966_v33 = vpop.f32.mrb[239].mxu0 }
 0xade   : > { %v4967_v45 = vadd.f32 %v4966_v33, %v4965_v35  ;;  %4346 = vperm.xlu1 %5269, %v4296_v4  }
 0xae0   : > { %v4297_v3 = vadd.f32 %v4967_v45, %v7492_v28  ;;  %v4968_v39 = vpop.f32.mrb[240].mxu0 }
 0xae1   : > { %v4969_v54 = vpop.f32.mrb[241].mxu0 }
 0xae2   : > { %v4970_v44 = vadd.f32 %v4969_v54, %v4968_v39  ;;  %4351 = vperm.xlu0 %5268, %v4297_v3  }
 0xae4   : > { %v4298_v21 = vadd.f32 %v4970_v44, %v7498_v49  ;;  %v4971_v37 = vpop.f32.mrb[242].mxu0 }
 0xae5   : > { %v4972_v53 = vpop.f32.mrb[243].mxu0 }
 0xae6   : > { %v4973_v30 = vadd.f32 %v4972_v53, %v4971_v37  ;;  %4356 = vperm.xlu1 %5269, %v4298_v21  }
 0xae8   : > { %v4299_v60 = vadd.f32 %v4973_v30, %v7504_v25  ;;  %v4974_v31 = vpop.f32.mrb[244].mxu0 }
 0xae9   : > { %v4975_v55 = vpop.f32.mrb[245].mxu0 }
 0xaea   : > { %v4976_v7 = vadd.f32 %v4975_v55, %v4974_v31  ;;  %4361 = vperm.xlu0 %5268, %v4299_v60  }
 0xaec   : > { %v4300_v5 = vadd.f32 %v4976_v7, %v7510_v2  ;;  %v4977_v6 = vpop.f32.mrb[246].mxu0 }
 0xaed   : > { %v4978_v28 = vpop.f32.mrb[247].mxu0 }
 0xaee   : > { %v4979_v36 = vadd.f32 %v4978_v28, %v4977_v6  ;;  %4366 = vperm.xlu1 %5269, %v4300_v5  }
 0xaf0   : > { %v4301_v14 = vadd.f32 %v4979_v36, %v7516_v42  ;;  %v4980_v49 = vpop.f32.mrb[248].mxu0 }
 0xaf1   : > { %v4981_v61 = vpop.f32.mrb[249].mxu0 }
 0xaf2   : > { %v4982_v62 = vadd.f32 %v4981_v61, %v4980_v49  ;;  %4371 = vperm.xlu0 %5268, %v4301_v14  }
 0xaf4   : > { %v4302_v10 = vadd.f32 %v4982_v62, %v7522_v23  ;;  %v4983_v25 = vpop.f32.mrb[250].mxu0 }
 0xaf5   : > { %v4984_v63 = vpop.f32.mrb[251].mxu0 }
 0xaf6   : > { %v4985_v0 = vadd.f32 %v4984_v63, %v4983_v25  ;;  %4376 = vperm.xlu1 %5269, %v4302_v10  }
 0xaf8   : > { %v4303_v13 = vadd.f32 %v4985_v0, %v7528_v12 }
 0xafa   : > { %4381 = vperm.xlu0 %5268, %v4303_v13  }
 0xb3d   : > { %v4307_v2 = vpop.permute.xlu0 %4306 }
 0xb3e   : > { %4384 = vst [vmem:[%s7873_s11] sm:$0xff] %v4307_v2  ;;  %4385 = vst [vmem:[%s7873_s11 + $0x8] sm:$0xff] %v4307_v2 }
 0xb41   : > { %v4312_v42 = vpop.permute.xlu1 %4311 }
 0xb42   : > { %4386 = vst [vmem:[%s7873_s11 + $0x10] sm:$0xff] %v4312_v42  ;;  %4387 = vst [vmem:[%s7873_s11 + $0x18] sm:$0xff] %v4312_v42 }
 0xb45   : > { %v4317_v23 = vpop.permute.xlu1 %4316 }
 0xb46   : > { %4388 = vst [vmem:[%s7873_s11 + $0x20] sm:$0xff] %v4317_v23  ;;  %4389 = vst [vmem:[%s7873_s11 + $0x28] sm:$0xff] %v4317_v23 }
 0xb49   : > { %v4322_v12 = vpop.permute.xlu1 %4321 }
 0xb4a   : > { %4390 = vst [vmem:[%s7873_s11 + $0x30] sm:$0xff] %v4322_v12  ;;  %4391 = vst [vmem:[%s7873_s11 + $0x38] sm:$0xff] %v4322_v12 }
 0xb4d   : > { %v4327_v17 = vpop.permute.xlu1 %4326 }
 0xb4e   : > { %4392 = vst [vmem:[%s7873_s11 + $0x40] sm:$0xff] %v4327_v17  ;;  %4393 = vst [vmem:[%s7873_s11 + $0x48] sm:$0xff] %v4327_v17 }
 0xb51   : > { %v4332_v8 = vpop.permute.xlu1 %4331 }
 0xb52   : > { %4394 = vst [vmem:[%s7873_s11 + $0x50] sm:$0xff] %v4332_v8  ;;  %4395 = vst [vmem:[%s7873_s11 + $0x58] sm:$0xff] %v4332_v8 }
 0xb55   : > { %v4337_v15 = vpop.permute.xlu1 %4336 }
 0xb56   : > { %4396 = vst [vmem:[%s7873_s11 + $0x60] sm:$0xff] %v4337_v15  ;;  %4397 = vst [vmem:[%s7873_s11 + $0x68] sm:$0xff] %v4337_v15 }
 0xb59   : > { %v4342_v57 = vpop.permute.xlu1 %4341 }
 0xb5a   : > { %4398 = vst [vmem:[%s7873_s11 + $0x70] sm:$0xff] %v4342_v57  ;;  %4399 = vst [vmem:[%s7873_s11 + $0x78] sm:$0xff] %v4342_v57 }
 0xb5d   : > { %v4347_v48 = vpop.permute.xlu1 %4346 }
 0xb5e   : > { %4400 = vst [vmem:[%s7873_s11 + $0x80] sm:$0xff] %v4347_v48  ;;  %4401 = vst [vmem:[%s7873_s11 + $0x88] sm:$0xff] %v4347_v48 }
 0xb61   : > { %v4352_v27 = vpop.permute.xlu0 %4351 }
 0xb62   : > { %4402 = vst [vmem:[%s7873_s11 + $0x90] sm:$0xff] %v4352_v27  ;;  %4403 = vst [vmem:[%s7873_s11 + $0x98] sm:$0xff] %v4352_v27 }
 0xb65   : > { %v4357_v40 = vpop.permute.xlu1 %4356 }
 0xb66   : > { %4404 = vst [vmem:[%s7873_s11 + $0xa0] sm:$0xff] %v4357_v40  ;;  %4405 = vst [vmem:[%s7873_s11 + $0xa8] sm:$0xff] %v4357_v40 }
 0xb69   : > { %v4362_v22 = vpop.permute.xlu0 %4361 }
 0xb6a   : > { %4406 = vst [vmem:[%s7873_s11 + $0xb0] sm:$0xff] %v4362_v22  ;;  %4407 = vst [vmem:[%s7873_s11 + $0xb8] sm:$0xff] %v4362_v22 }
 0xb6d   : > { %v4367_v32 = vpop.permute.xlu1 %4366 }
 0xb6e   : > { %4408 = vst [vmem:[%s7873_s11 + $0xc0] sm:$0xff] %v4367_v32  ;;  %4409 = vst [vmem:[%s7873_s11 + $0xc8] sm:$0xff] %v4367_v32 }
 0xb71   : > { %v4372_v29 = vpop.permute.xlu0 %4371 }
 0xb72   : > { %4410 = vst [vmem:[%s7873_s11 + $0xd0] sm:$0xff] %v4372_v29  ;;  %4411 = vst [vmem:[%s7873_s11 + $0xd8] sm:$0xff] %v4372_v29 }
 0xb75   : > { %v4377_v41 = vpop.permute.xlu1 %4376 }
 0xb76   : > { %4412 = vst [vmem:[%s7873_s11 + $0xe0] sm:$0xff] %v4377_v41  ;;  %4413 = vst [vmem:[%s7873_s11 + $0xe8] sm:$0xff] %v4377_v41 }
 0xb79   : > { %v4382_v51 = vpop.permute.xlu0 %4381 }
 0xb7a   : > { %4414 = vst [vmem:[%s7873_s11 + $0xf0] sm:$0xff] %v4382_v51  ;;  %4415 = vst [vmem:[%s7873_s11 + $0xf8] sm:$0xff] %v4382_v51 }
 0xb7b PF: > { %s17_s24 = sadd.s32 1, %s5330_s24  }
 0xb7c   : > { %p14_p4 = scmp.ge.s32.totalorder %s17_s24, 4  }
 0xb7e   :  { %16 = sbr.rel (!%p14_p4) target bundleno = 1 (0x1), region = 82 }

</bundles_post_ra>
